<compile_context>
chip_gen: v7x
topology: tpu7x:2x2x1
jax: 0.10.0
libtpu: 0.0.40
codegen_flags: <defaults>
</compile_context>

<pallas_src>
import jax
import jax.numpy as jnp
from jax import lax
from jax.experimental import pallas as pl
from jax.experimental.pallas import tpu as pltpu


# ------------------------------- helpers --------------------------------------

def _round_up(x, m):
    return (x + m - 1) // m * m


def _pad_to(a, shape):
    pads = [(0, s - d) for d, s in zip(a.shape, shape)]
    return jnp.pad(a, pads)


def _gate_pad_cols(w, H, Hp):
    """(rows, 4H) -> (rows, 4Hp): each PyTorch gate block (i,f,g,o) placed lane-aligned
    at column offset g*Hp; padded columns are zero."""
    rows = w.shape[0]
    out = jnp.zeros((rows, 4 * Hp), w.dtype)
    for g in range(4):
        out = out.at[:, g * Hp:g * Hp + H].set(w[:, g * H:(g + 1) * H])
    return out


# --------------------------- fused multi-layer LSTM ----------------------------

def make_lstm_kernel(T, Bp, Hp, n_layers):
    """Builds a kernel over refs:
       inputs : x(T*Bp, Ip), h0(L,Bp,Hp), c0(L,Bp,Hp), [wih_l, whh_l, b_l] * L
       outputs: out(T*Bp, Hp) (last layer, time-major), hT(L,Bp,Hp), cT(L,Bp,Hp)
       scratch: act(T*Bp, Hp) inter-layer activations, pg(T*Bp, 4Hp) pre-gates
    """
    n_in = 3 + 3 * n_layers

    def kernel(*refs):
        x_ref, h0_ref, c0_ref = refs[0], refs[1], refs[2]
        w_refs = refs[3:n_in]
        out_ref, hT_ref, cT_ref = refs[n_in], refs[n_in + 1], refs[n_in + 2]
        act_ref, pg_ref = refs[n_in + 3], refs[n_in + 4]

        for layer in range(n_layers):
            # Hoisted: weight / bias loads happen once per layer, not per timestep.
            wih = w_refs[3 * layer][...]          # (Iin_pad, 4Hp)
            whh = w_refs[3 * layer + 1][...]      # (Hp, 4Hp)
            b = w_refs[3 * layer + 2][...]        # (1, 4Hp)

            # Whole-sequence input projection: one large MXU matmul (M = T*Bp).
            src = x_ref[...] if layer == 0 else act_ref[...]
            pg_ref[...] = jnp.dot(src, wih,
                                  preferred_element_type=jnp.float32) + b

            dst_ref = out_ref if layer == n_layers - 1 else act_ref

            def step(t, carry, whh=whh, dst_ref=dst_ref):
                h, c = carry
                row = pl.multiple_of(t * Bp, Bp)
                gates = pg_ref[pl.ds(row, Bp), :] + jnp.dot(
                    h, whh, preferred_element_type=jnp.float32)   # (Bp, 4Hp)
                # Gate slices are lane-aligned (multiples of Hp=128): no XLU traffic.
                i_g = jax.nn.sigmoid(gates[:, 0 * Hp:1 * Hp])
                f_g = jax.nn.sigmoid(gates[:, 1 * Hp:2 * Hp])
                g_g = jnp.tanh(gates[:, 2 * Hp:3 * Hp])
                o_g = jax.nn.sigmoid(gates[:, 3 * Hp:4 * Hp])
                c_new = f_g * c + i_g * g_g
                h_new = o_g * jnp.tanh(c_new)
                dst_ref[pl.ds(row, Bp), :] = h_new
                return (h_new, c_new)

            h, c = lax.fori_loop(0, T, step,
                                 (h0_ref[layer], c0_ref[layer]),
                                 unroll=True)
            hT_ref[layer] = h
            cT_ref[layer] = c

    return kernel


def lstm_forward(x_flat, h0p, c0p, layer_params):
    """x_flat: (T*Bp, Ip) time-major-flattened input; h0p/c0p: (L, Bp, Hp)."""
    TB, _ = x_flat.shape
    L, Bp, Hp = h0p.shape
    T = TB // Bp
    flat_w = []
    for lp in layer_params:
        flat_w += [lp["wih"], lp["whh"], lp["b"]]

    out_shapes = (
        jax.ShapeDtypeStruct((TB, Hp), jnp.float32),      # last-layer h_t (time-major)
        jax.ShapeDtypeStruct((L, Bp, Hp), jnp.float32),   # h_n
        jax.ShapeDtypeStruct((L, Bp, Hp), jnp.float32),   # c_n
    )
    return pl.pallas_call(
        make_lstm_kernel(T, Bp, Hp, L),
        out_shape=out_shapes,
        scratch_shapes=[
            pltpu.VMEM((TB, Hp), jnp.float32),       # inter-layer activations
            pltpu.VMEM((TB, 4 * Hp), jnp.float32),   # whole-sequence pre-gates
        ],
    )(x_flat, h0p, c0p, *flat_w)


# ------------------------------- Head kernel ----------------------------------

def head_kernel(x_ref, w1_ref, b1_ref, w2_ref, b2_ref, out_ref):
    """(Linear+folded-BN) -> ReLU -> Linear, on a (tile_n, Hp) block of rows."""
    h = jnp.dot(x_ref[...], w1_ref[...],
                preferred_element_type=jnp.float32) + b1_ref[...]
    h = jnp.maximum(h, 0.0)
    out_ref[...] = jnp.dot(h, w2_ref[...],
                           preferred_element_type=jnp.float32) + b2_ref[...]


def head_forward(x, w1, b1, w2, b2):
    N, Hp = x.shape
    Cp = w2.shape[1]
    tile_n = min(N, 512)                       # N is always a multiple of 8 (Bp-padded)
    grid = (pl.cdiv(N, tile_n),)
    return pl.pallas_call(
        head_kernel,
        out_shape=jax.ShapeDtypeStruct((N, Cp), jnp.float32),
        grid=grid,
        in_specs=[
            pl.BlockSpec((tile_n, Hp), lambda i: (i, 0)),
            pl.BlockSpec((Hp, Hp), lambda i: (0, 0)),   # weights resident across grid
            pl.BlockSpec((1, Hp), lambda i: (0, 0)),
            pl.BlockSpec((Hp, Cp), lambda i: (0, 0)),
            pl.BlockSpec((1, Cp), lambda i: (0, 0)),
        ],
        out_specs=pl.BlockSpec((tile_n, Cp), lambda i: (i, 0)),
        compiler_params=pltpu.CompilerParams(
            dimension_semantics=("parallel",)),
    )(x, w1, b1, w2, b2)


# ----------------------------- Parameter setup ---------------------------------

def init_params(key, chars_num, n_hidden, n_layers):
    """PyTorch-style uniform(-1/sqrt(H), 1/sqrt(H)) init, stored lane-padded."""
    H, C = n_hidden, chars_num
    Hp = _round_up(H, 128)
    Cp = _round_up(C, 128)
    Ip = _round_up(C, 128)
    k = 1.0 / (H ** 0.5)

    params = {"lstm": []}
    for layer in range(n_layers):
        in_dim = C if layer == 0 else H
        in_pad = Ip if layer == 0 else Hp
        key, k1, k2, k3, k4 = jax.random.split(key, 5)
        w_ih = jax.random.uniform(k1, (4 * H, in_dim), minval=-k, maxval=k,
                                  dtype=jnp.float32)
        w_hh = jax.random.uniform(k2, (4 * H, H), minval=-k, maxval=k,
                                  dtype=jnp.float32)
        b_ih = jax.random.uniform(k3, (4 * H,), minval=-k, maxval=k,
                                  dtype=jnp.float32)
        b_hh = jax.random.uniform(k4, (4 * H,), minval=-k, maxval=k,
                                  dtype=jnp.float32)
        params["lstm"].append({
            "wih": _pad_to(_gate_pad_cols(w_ih.T, H, Hp), (in_pad, 4 * Hp)),
            "whh": _pad_to(_gate_pad_cols(w_hh.T, H, Hp), (Hp, 4 * Hp)),
            "b": _gate_pad_cols((b_ih + b_hh)[None, :], H, Hp),
        })

    key, k1, k2, k3, k4 = jax.random.split(key, 5)
    lin_w = jax.random.uniform(k1, (H, H), minval=-k, maxval=k, dtype=jnp.float32)
    lin_b = jax.random.uniform(k2, (H,), minval=-k, maxval=k, dtype=jnp.float32)
    # BatchNorm1d eval-mode running stats (init values), folded into the linear.
    gamma = jnp.ones((H,), jnp.float32)
    beta = jnp.zeros((H,), jnp.float32)
    mean = jnp.zeros((H,), jnp.float32)
    var = jnp.ones((H,), jnp.float32)
    scale = gamma * lax.rsqrt(var + 1e-5)
    w1 = lin_w.T * scale[None, :]
    b1 = (lin_b - mean) * scale + beta
    params["head_w1"] = _pad_to(w1, (Hp, Hp))
    params["head_b1"] = _pad_to(b1[None, :], (1, Hp))

    fc_w = jax.random.uniform(k3, (C, H), minval=-k, maxval=k, dtype=jnp.float32)
    fc_b = jax.random.uniform(k4, (C,), minval=-k, maxval=k, dtype=jnp.float32)
    params["fc_w"] = _pad_to(fc_w.T, (Hp, Cp))
    params["fc_b"] = _pad_to(fc_b[None, :], (1, Cp))
    return params


# ------------------------------- Forward pass ----------------------------------

@jax.jit
def char_rnn_forward(params, x, h0, c0):
    """x: (B, T, chars_num) batch_first; h0/c0: (n_layers, B, n_hidden).

    Returns: out (B*T, chars_num), (h_n, c_n) each (n_layers, B, n_hidden).
    """
    B, T, C = x.shape
    L, _, H = h0.shape
    Hp = params["lstm"][0]["whh"].shape[0]
    Ip = params["lstm"][0]["wih"].shape[0]
    Cp = params["fc_w"].shape[1]
    Bp = _round_up(B, 8)

    # Zero-pad batch/feature dims to sublane/lane alignment (sliced off at the end).
    xp = jnp.pad(x, ((0, Bp - B), (0, 0), (0, Ip - C)))
    h0p = jnp.pad(h0, ((0, 0), (0, Bp - B), (0, Hp - H)))
    c0p = jnp.pad(c0, ((0, 0), (0, Bp - B), (0, Hp - H)))

    # Time-major flatten so the per-layer input projection is one big matmul.
    x_flat = jnp.transpose(xp, (1, 0, 2)).reshape(T * Bp, Ip)

    lstm_out, hT, cT = lstm_forward(x_flat, h0p, c0p, params["lstm"])

    # nn.Dropout / inter-layer LSTM dropout: identity in eval mode.
    logits = head_forward(lstm_out, params["head_w1"], params["head_b1"],
                          params["fc_w"], params["fc_b"])          # (T*Bp, Cp)

    # Only the small logits tensor is reordered to PyTorch's
    # out.contiguous().view(-1, n_hidden) (batch-major) row order.
    logits = logits.reshape(T, Bp, Cp)[:, :B, :C]
    out = jnp.transpose(logits, (1, 0, 2)).reshape(B * T, C)

    hidden = (hT[:, :B, :H], cT[:, :B, :H])
    return out, hidden


# ----------------------------------- Main ---------------------------------------

if __name__ == "__main__":
    chars_num = 16
    n_hidden = 32
    n_layers = 2
    batch = 2
    seq = 8

    key = jax.random.PRNGKey(0)
    key, pkey, xkey = jax.random.split(key, 3)

    params = init_params(pkey, chars_num, n_hidden, n_layers)

    # batch_first input like PyTorch: (B, T, chars_num)
    x = jax.random.normal(xkey, (batch, seq, chars_num), dtype=jnp.float32)
    h0 = jnp.zeros((n_layers, batch, n_hidden), jnp.float32)
    c0 = jnp.zeros((n_layers, batch, n_hidden), jnp.float32)

    out, (h_n, c_n) = char_rnn_forward(params, x, h0, c0)
    jax.block_until_ready(out)
    jax.block_until_ready(h_n)
    jax.block_until_ready(c_n)

    assert out.shape == (batch * seq, chars_num)
    assert h_n.shape == (n_layers, batch, n_hidden)
    assert c_n.shape == (n_layers, batch, n_hidden)
    assert bool(jnp.all(jnp.isfinite(out)))
    assert bool(jnp.all(jnp.isfinite(h_n))) and bool(jnp.all(jnp.isfinite(c_n)))

    print("KERNEL_OK")
</pallas_src>

<mosaic_0001>
module attributes {stable_mosaic.version = 11 : i64} {
  func.func @kernel(%arg0: memref<64x128xf32, #tpu.memory_space<vmem>>, %arg1: memref<2x8x128xf32, #tpu.memory_space<vmem>>, %arg2: memref<2x8x128xf32, #tpu.memory_space<vmem>>, %arg3: memref<128x512xf32, #tpu.memory_space<vmem>>, %arg4: memref<128x512xf32, #tpu.memory_space<vmem>>, %arg5: memref<1x512xf32, #tpu.memory_space<vmem>>, %arg6: memref<128x512xf32, #tpu.memory_space<vmem>>, %arg7: memref<128x512xf32, #tpu.memory_space<vmem>>, %arg8: memref<1x512xf32, #tpu.memory_space<vmem>>, %arg9: memref<64x128xf32, #tpu.memory_space<vmem>>, %arg10: memref<2x8x128xf32, #tpu.memory_space<vmem>>, %arg11: memref<2x8x128xf32, #tpu.memory_space<vmem>>, %arg12: memref<64x128xf32, #tpu.memory_space<vmem>>, %arg13: memref<64x512xf32, #tpu.memory_space<vmem>>) attributes {dimension_semantics = [], scalar_prefetch = 0 : i64, scratch_operands = 2 : i64, tpu.core_type = #tpu.core_type<tc>} {
    %c0 = arith.constant 0 : index
    %c0_0 = arith.constant 0 : index
    %0 = vector.load %arg3[%c0, %c0_0] : memref<128x512xf32, #tpu.memory_space<vmem>>, vector<128x512xf32>
    %c0_1 = arith.constant 0 : index
    %c0_2 = arith.constant 0 : index
    %1 = vector.load %arg4[%c0_1, %c0_2] : memref<128x512xf32, #tpu.memory_space<vmem>>, vector<128x512xf32>
    %c0_3 = arith.constant 0 : index
    %c0_4 = arith.constant 0 : index
    %2 = vector.load %arg5[%c0_3, %c0_4] : memref<1x512xf32, #tpu.memory_space<vmem>>, vector<1x512xf32>
    %c0_5 = arith.constant 0 : index
    %c0_6 = arith.constant 0 : index
    %3 = vector.load %arg0[%c0_5, %c0_6] : memref<64x128xf32, #tpu.memory_space<vmem>>, vector<64x128xf32>
    %cst = arith.constant dense<0.000000e+00> : vector<64x512xf32>
    %4 = tpu.matmul %3, %0, %cst {dimension_numbers = #tpu.dot_dimension_numbers<[1], [0], [0], [1], [0, 0, 1, 1], [], []>} : vector<64x128xf32>, vector<128x512xf32>, vector<64x512xf32> -> vector<64x512xf32>
    %5 = vector.broadcast %2 : vector<1x512xf32> to vector<64x512xf32>
    %6 = arith.addf %4, %5 : vector<64x512xf32>
    %c0_7 = arith.constant 0 : index
    %c0_8 = arith.constant 0 : index
    %7 = vector.load %arg13[%c0_7, %c0_8] : memref<64x512xf32, #tpu.memory_space<vmem>>, vector<64x512xf32>
    tpu.vector_store %arg13[%c0_7, %c0_8], %6 {strides = array<i32>} : memref<64x512xf32, #tpu.memory_space<vmem>>, vector<64x512xf32>,
    %c0_9 = arith.constant 0 : index
    %c0_10 = arith.constant 0 : index
    %c0_11 = arith.constant 0 : index
    %8 = vector.load %arg1[%c0_9, %c0_10, %c0_11] : memref<2x8x128xf32, #tpu.memory_space<vmem>>, vector<1x8x128xf32>
    %9 = vector.shape_cast %8 : vector<1x8x128xf32> to vector<8x128xf32>
    %c0_12 = arith.constant 0 : index
    %c0_13 = arith.constant 0 : index
    %c0_14 = arith.constant 0 : index
    %10 = vector.load %arg2[%c0_12, %c0_13, %c0_14] : memref<2x8x128xf32, #tpu.memory_space<vmem>>, vector<1x8x128xf32>
    %11 = vector.shape_cast %10 : vector<1x8x128xf32> to vector<8x128xf32>
    %c0_i32 = arith.constant 0 : i32
    %c8_i32 = arith.constant 8 : i32
    %12 = arith.muli %c0_i32, %c8_i32 : i32
    %13 = tpu.assume_multiple %12, 8 : i32
    %14 = arith.index_cast %13 : i32 to index
    %c0_15 = arith.constant 0 : index
    %15 = vector.load %arg13[%14, %c0_15] : memref<64x512xf32, #tpu.memory_space<vmem>>, vector<8x512xf32>
    %cst_16 = arith.constant dense<0.000000e+00> : vector<8x512xf32>
    %16 = tpu.matmul %9, %1, %cst_16 {dimension_numbers = #tpu.dot_dimension_numbers<[1], [0], [0], [1], [0, 0, 1, 1], [], []>} : vector<8x128xf32>, vector<128x512xf32>, vector<8x512xf32> -> vector<8x512xf32>
    %17 = arith.addf %15, %16 : vector<8x512xf32>
    %18 = vector.extract_strided_slice %17 {offsets = [0, 0], sizes = [8, 128], strides = [1, 1]} : vector<8x512xf32> to vector<8x128xf32>
    %19 = arith.negf %18 : vector<8x128xf32>
    %20 = math.exp %19 : vector<8x128xf32>
    %cst_17 = arith.constant 1.000000e+00 : f32
    %21 = vector.broadcast %cst_17 : f32 to vector<8x128xf32>
    %22 = arith.addf %21, %20 : vector<8x128xf32>
    %23 = arith.divf %21, %22 : vector<8x128xf32>
    %24 = vector.extract_strided_slice %17 {offsets = [0, 128], sizes = [8, 128], strides = [1, 1]} : vector<8x512xf32> to vector<8x128xf32>
    %25 = arith.negf %24 : vector<8x128xf32>
    %26 = math.exp %25 : vector<8x128xf32>
    %cst_18 = arith.constant 1.000000e+00 : f32
    %27 = vector.broadcast %cst_18 : f32 to vector<8x128xf32>
    %28 = arith.addf %27, %26 : vector<8x128xf32>
    %29 = arith.divf %27, %28 : vector<8x128xf32>
    %30 = vector.extract_strided_slice %17 {offsets = [0, 256], sizes = [8, 128], strides = [1, 1]} : vector<8x512xf32> to vector<8x128xf32>
    %31 = math.tanh %30 : vector<8x128xf32>
    %32 = vector.extract_strided_slice %17 {offsets = [0, 384], sizes = [8, 128], strides = [1, 1]} : vector<8x512xf32> to vector<8x128xf32>
    %33 = arith.negf %32 : vector<8x128xf32>
    %34 = math.exp %33 : vector<8x128xf32>
    %cst_19 = arith.constant 1.000000e+00 : f32
    %35 = vector.broadcast %cst_19 : f32 to vector<8x128xf32>
    %36 = arith.addf %35, %34 : vector<8x128xf32>
    %37 = arith.divf %35, %36 : vector<8x128xf32>
    %38 = arith.mulf %29, %11 : vector<8x128xf32>
    %39 = arith.mulf %23, %31 : vector<8x128xf32>
    %40 = arith.addf %38, %39 : vector<8x128xf32>
    %41 = math.tanh %40 : vector<8x128xf32>
    %42 = arith.mulf %37, %41 : vector<8x128xf32>
    %43 = arith.index_cast %13 : i32 to index
    %c0_20 = arith.constant 0 : index
    %44 = vector.load %arg12[%43, %c0_20] : memref<64x128xf32, #tpu.memory_space<vmem>>, vector<8x128xf32>
    tpu.vector_store %arg12[%43, %c0_20], %42 {strides = array<i32>} : memref<64x128xf32, #tpu.memory_space<vmem>>, vector<8x128xf32>,
    %c1_i32 = arith.constant 1 : i32
    %c8_i32_21 = arith.constant 8 : i32
    %45 = arith.muli %c1_i32, %c8_i32_21 : i32
    %46 = tpu.assume_multiple %45, 8 : i32
    %47 = arith.index_cast %46 : i32 to index
    %c0_22 = arith.constant 0 : index
    %48 = vector.load %arg13[%47, %c0_22] : memref<64x512xf32, #tpu.memory_space<vmem>>, vector<8x512xf32>
    %cst_23 = arith.constant dense<0.000000e+00> : vector<8x512xf32>
    %49 = tpu.matmul %42, %1, %cst_23 {dimension_numbers = #tpu.dot_dimension_numbers<[1], [0], [0], [1], [0, 0, 1, 1], [], []>} : vector<8x128xf32>, vector<128x512xf32>, vector<8x512xf32> -> vector<8x512xf32>
    %50 = arith.addf %48, %49 : vector<8x512xf32>
    %51 = vector.extract_strided_slice %50 {offsets = [0, 0], sizes = [8, 128], strides = [1, 1]} : vector<8x512xf32> to vector<8x128xf32>
    %52 = arith.negf %51 : vector<8x128xf32>
    %53 = math.exp %52 : vector<8x128xf32>
    %cst_24 = arith.constant 1.000000e+00 : f32
    %54 = vector.broadcast %cst_24 : f32 to vector<8x128xf32>
    %55 = arith.addf %54, %53 : vector<8x128xf32>
    %56 = arith.divf %54, %55 : vector<8x128xf32>
    %57 = vector.extract_strided_slice %50 {offsets = [0, 128], sizes = [8, 128], strides = [1, 1]} : vector<8x512xf32> to vector<8x128xf32>
    %58 = arith.negf %57 : vector<8x128xf32>
    %59 = math.exp %58 : vector<8x128xf32>
    %cst_25 = arith.constant 1.000000e+00 : f32
    %60 = vector.broadcast %cst_25 : f32 to vector<8x128xf32>
    %61 = arith.addf %60, %59 : vector<8x128xf32>
    %62 = arith.divf %60, %61 : vector<8x128xf32>
    %63 = vector.extract_strided_slice %50 {offsets = [0, 256], sizes = [8, 128], strides = [1, 1]} : vector<8x512xf32> to vector<8x128xf32>
    %64 = math.tanh %63 : vector<8x128xf32>
    %65 = vector.extract_strided_slice %50 {offsets = [0, 384], sizes = [8, 128], strides = [1, 1]} : vector<8x512xf32> to vector<8x128xf32>
    %66 = arith.negf %65 : vector<8x128xf32>
    %67 = math.exp %66 : vector<8x128xf32>
    %cst_26 = arith.constant 1.000000e+00 : f32
    %68 = vector.broadcast %cst_26 : f32 to vector<8x128xf32>
    %69 = arith.addf %68, %67 : vector<8x128xf32>
    %70 = arith.divf %68, %69 : vector<8x128xf32>
    %71 = arith.mulf %62, %40 : vector<8x128xf32>
    %72 = arith.mulf %56, %64 : vector<8x128xf32>
    %73 = arith.addf %71, %72 : vector<8x128xf32>
    %74 = math.tanh %73 : vector<8x128xf32>
    %75 = arith.mulf %70, %74 : vector<8x128xf32>
    %76 = arith.index_cast %46 : i32 to index
    %c0_27 = arith.constant 0 : index
    %77 = vector.load %arg12[%76, %c0_27] : memref<64x128xf32, #tpu.memory_space<vmem>>, vector<8x128xf32>
    tpu.vector_store %arg12[%76, %c0_27], %75 {strides = array<i32>} : memref<64x128xf32, #tpu.memory_space<vmem>>, vector<8x128xf32>,
    %c2_i32 = arith.constant 2 : i32
    %c8_i32_28 = arith.constant 8 : i32
    %78 = arith.muli %c2_i32, %c8_i32_28 : i32
    %79 = tpu.assume_multiple %78, 8 : i32
    %80 = arith.index_cast %79 : i32 to index
    %c0_29 = arith.constant 0 : index
    %81 = vector.load %arg13[%80, %c0_29] : memref<64x512xf32, #tpu.memory_space<vmem>>, vector<8x512xf32>
    %cst_30 = arith.constant dense<0.000000e+00> : vector<8x512xf32>
    %82 = tpu.matmul %75, %1, %cst_30 {dimension_numbers = #tpu.dot_dimension_numbers<[1], [0], [0], [1], [0, 0, 1, 1], [], []>} : vector<8x128xf32>, vector<128x512xf32>, vector<8x512xf32> -> vector<8x512xf32>
    %83 = arith.addf %81, %82 : vector<8x512xf32>
    %84 = vector.extract_strided_slice %83 {offsets = [0, 0], sizes = [8, 128], strides = [1, 1]} : vector<8x512xf32> to vector<8x128xf32>
    %85 = arith.negf %84 : vector<8x128xf32>
    %86 = math.exp %85 : vector<8x128xf32>
    %cst_31 = arith.constant 1.000000e+00 : f32
    %87 = vector.broadcast %cst_31 : f32 to vector<8x128xf32>
    %88 = arith.addf %87, %86 : vector<8x128xf32>
    %89 = arith.divf %87, %88 : vector<8x128xf32>
    %90 = vector.extract_strided_slice %83 {offsets = [0, 128], sizes = [8, 128], strides = [1, 1]} : vector<8x512xf32> to vector<8x128xf32>
    %91 = arith.negf %90 : vector<8x128xf32>
    %92 = math.exp %91 : vector<8x128xf32>
    %cst_32 = arith.constant 1.000000e+00 : f32
    %93 = vector.broadcast %cst_32 : f32 to vector<8x128xf32>
    %94 = arith.addf %93, %92 : vector<8x128xf32>
    %95 = arith.divf %93, %94 : vector<8x128xf32>
    %96 = vector.extract_strided_slice %83 {offsets = [0, 256], sizes = [8, 128], strides = [1, 1]} : vector<8x512xf32> to vector<8x128xf32>
    %97 = math.tanh %96 : vector<8x128xf32>
    %98 = vector.extract_strided_slice %83 {offsets = [0, 384], sizes = [8, 128], strides = [1, 1]} : vector<8x512xf32> to vector<8x128xf32>
    %99 = arith.negf %98 : vector<8x128xf32>
    %100 = math.exp %99 : vector<8x128xf32>
    %cst_33 = arith.constant 1.000000e+00 : f32
    %101 = vector.broadcast %cst_33 : f32 to vector<8x128xf32>
    %102 = arith.addf %101, %100 : vector<8x128xf32>
    %103 = arith.divf %101, %102 : vector<8x128xf32>
    %104 = arith.mulf %95, %73 : vector<8x128xf32>
    %105 = arith.mulf %89, %97 : vector<8x128xf32>
    %106 = arith.addf %104, %105 : vector<8x128xf32>
    %107 = math.tanh %106 : vector<8x128xf32>
    %108 = arith.mulf %103, %107 : vector<8x128xf32>
    %109 = arith.index_cast %79 : i32 to index
    %c0_34 = arith.constant 0 : index
    %110 = vector.load %arg12[%109, %c0_34] : memref<64x128xf32, #tpu.memory_space<vmem>>, vector<8x128xf32>
    tpu.vector_store %arg12[%109, %c0_34], %108 {strides = array<i32>} : memref<64x128xf32, #tpu.memory_space<vmem>>, vector<8x128xf32>,
    %c3_i32 = arith.constant 3 : i32
    %c8_i32_35 = arith.constant 8 : i32
    %111 = arith.muli %c3_i32, %c8_i32_35 : i32
    %112 = tpu.assume_multiple %111, 8 : i32
    %113 = arith.index_cast %112 : i32 to index
    %c0_36 = arith.constant 0 : index
    %114 = vector.load %arg13[%113, %c0_36] : memref<64x512xf32, #tpu.memory_space<vmem>>, vector<8x512xf32>
    %cst_37 = arith.constant dense<0.000000e+00> : vector<8x512xf32>
    %115 = tpu.matmul %108, %1, %cst_37 {dimension_numbers = #tpu.dot_dimension_numbers<[1], [0], [0], [1], [0, 0, 1, 1], [], []>} : vector<8x128xf32>, vector<128x512xf32>, vector<8x512xf32> -> vector<8x512xf32>
    %116 = arith.addf %114, %115 : vector<8x512xf32>
    %117 = vector.extract_strided_slice %116 {offsets = [0, 0], sizes = [8, 128], strides = [1, 1]} : vector<8x512xf32> to vector<8x128xf32>
    %118 = arith.negf %117 : vector<8x128xf32>
    %119 = math.exp %118 : vector<8x128xf32>
    %cst_38 = arith.constant 1.000000e+00 : f32
    %120 = vector.broadcast %cst_38 : f32 to vector<8x128xf32>
    %121 = arith.addf %120, %119 : vector<8x128xf32>
    %122 = arith.divf %120, %121 : vector<8x128xf32>
    %123 = vector.extract_strided_slice %116 {offsets = [0, 128], sizes = [8, 128], strides = [1, 1]} : vector<8x512xf32> to vector<8x128xf32>
    %124 = arith.negf %123 : vector<8x128xf32>
    %125 = math.exp %124 : vector<8x128xf32>
    %cst_39 = arith.constant 1.000000e+00 : f32
    %126 = vector.broadcast %cst_39 : f32 to vector<8x128xf32>
    %127 = arith.addf %126, %125 : vector<8x128xf32>
    %128 = arith.divf %126, %127 : vector<8x128xf32>
    %129 = vector.extract_strided_slice %116 {offsets = [0, 256], sizes = [8, 128], strides = [1, 1]} : vector<8x512xf32> to vector<8x128xf32>
    %130 = math.tanh %129 : vector<8x128xf32>
    %131 = vector.extract_strided_slice %116 {offsets = [0, 384], sizes = [8, 128], strides = [1, 1]} : vector<8x512xf32> to vector<8x128xf32>
    %132 = arith.negf %131 : vector<8x128xf32>
    %133 = math.exp %132 : vector<8x128xf32>
    %cst_40 = arith.constant 1.000000e+00 : f32
    %134 = vector.broadcast %cst_40 : f32 to vector<8x128xf32>
    %135 = arith.addf %134, %133 : vector<8x128xf32>
    %136 = arith.divf %134, %135 : vector<8x128xf32>
    %137 = arith.mulf %128, %106 : vector<8x128xf32>
    %138 = arith.mulf %122, %130 : vector<8x128xf32>
    %139 = arith.addf %137, %138 : vector<8x128xf32>
    %140 = math.tanh %139 : vector<8x128xf32>
    %141 = arith.mulf %136, %140 : vector<8x128xf32>
    %142 = arith.index_cast %112 : i32 to index
    %c0_41 = arith.constant 0 : index
    %143 = vector.load %arg12[%142, %c0_41] : memref<64x128xf32, #tpu.memory_space<vmem>>, vector<8x128xf32>
    tpu.vector_store %arg12[%142, %c0_41], %141 {strides = array<i32>} : memref<64x128xf32, #tpu.memory_space<vmem>>, vector<8x128xf32>,
    %c4_i32 = arith.constant 4 : i32
    %c8_i32_42 = arith.constant 8 : i32
    %144 = arith.muli %c4_i32, %c8_i32_42 : i32
    %145 = tpu.assume_multiple %144, 8 : i32
    %146 = arith.index_cast %145 : i32 to index
    %c0_43 = arith.constant 0 : index
    %147 = vector.load %arg13[%146, %c0_43] : memref<64x512xf32, #tpu.memory_space<vmem>>, vector<8x512xf32>
    %cst_44 = arith.constant dense<0.000000e+00> : vector<8x512xf32>
    %148 = tpu.matmul %141, %1, %cst_44 {dimension_numbers = #tpu.dot_dimension_numbers<[1], [0], [0], [1], [0, 0, 1, 1], [], []>} : vector<8x128xf32>, vector<128x512xf32>, vector<8x512xf32> -> vector<8x512xf32>
    %149 = arith.addf %147, %148 : vector<8x512xf32>
    %150 = vector.extract_strided_slice %149 {offsets = [0, 0], sizes = [8, 128], strides = [1, 1]} : vector<8x512xf32> to vector<8x128xf32>
    %151 = arith.negf %150 : vector<8x128xf32>
    %152 = math.exp %151 : vector<8x128xf32>
    %cst_45 = arith.constant 1.000000e+00 : f32
    %153 = vector.broadcast %cst_45 : f32 to vector<8x128xf32>
    %154 = arith.addf %153, %152 : vector<8x128xf32>
    %155 = arith.divf %153, %154 : vector<8x128xf32>
    %156 = vector.extract_strided_slice %149 {offsets = [0, 128], sizes = [8, 128], strides = [1, 1]} : vector<8x512xf32> to vector<8x128xf32>
    %157 = arith.negf %156 : vector<8x128xf32>
    %158 = math.exp %157 : vector<8x128xf32>
    %cst_46 = arith.constant 1.000000e+00 : f32
    %159 = vector.broadcast %cst_46 : f32 to vector<8x128xf32>
    %160 = arith.addf %159, %158 : vector<8x128xf32>
    %161 = arith.divf %159, %160 : vector<8x128xf32>
    %162 = vector.extract_strided_slice %149 {offsets = [0, 256], sizes = [8, 128], strides = [1, 1]} : vector<8x512xf32> to vector<8x128xf32>
    %163 = math.tanh %162 : vector<8x128xf32>
    %164 = vector.extract_strided_slice %149 {offsets = [0, 384], sizes = [8, 128], strides = [1, 1]} : vector<8x512xf32> to vector<8x128xf32>
    %165 = arith.negf %164 : vector<8x128xf32>
    %166 = math.exp %165 : vector<8x128xf32>
    %cst_47 = arith.constant 1.000000e+00 : f32
    %167 = vector.broadcast %cst_47 : f32 to vector<8x128xf32>
    %168 = arith.addf %167, %166 : vector<8x128xf32>
    %169 = arith.divf %167, %168 : vector<8x128xf32>
    %170 = arith.mulf %161, %139 : vector<8x128xf32>
    %171 = arith.mulf %155, %163 : vector<8x128xf32>
    %172 = arith.addf %170, %171 : vector<8x128xf32>
    %173 = math.tanh %172 : vector<8x128xf32>
    %174 = arith.mulf %169, %173 : vector<8x128xf32>
    %175 = arith.index_cast %145 : i32 to index
    %c0_48 = arith.constant 0 : index
    %176 = vector.load %arg12[%175, %c0_48] : memref<64x128xf32, #tpu.memory_space<vmem>>, vector<8x128xf32>
    tpu.vector_store %arg12[%175, %c0_48], %174 {strides = array<i32>} : memref<64x128xf32, #tpu.memory_space<vmem>>, vector<8x128xf32>,
    %c5_i32 = arith.constant 5 : i32
    %c8_i32_49 = arith.constant 8 : i32
    %177 = arith.muli %c5_i32, %c8_i32_49 : i32
    %178 = tpu.assume_multiple %177, 8 : i32
    %179 = arith.index_cast %178 : i32 to index
    %c0_50 = arith.constant 0 : index
    %180 = vector.load %arg13[%179, %c0_50] : memref<64x512xf32, #tpu.memory_space<vmem>>, vector<8x512xf32>
    %cst_51 = arith.constant dense<0.000000e+00> : vector<8x512xf32>
    %181 = tpu.matmul %174, %1, %cst_51 {dimension_numbers = #tpu.dot_dimension_numbers<[1], [0], [0], [1], [0, 0, 1, 1], [], []>} : vector<8x128xf32>, vector<128x512xf32>, vector<8x512xf32> -> vector<8x512xf32>
    %182 = arith.addf %180, %181 : vector<8x512xf32>
    %183 = vector.extract_strided_slice %182 {offsets = [0, 0], sizes = [8, 128], strides = [1, 1]} : vector<8x512xf32> to vector<8x128xf32>
    %184 = arith.negf %183 : vector<8x128xf32>
    %185 = math.exp %184 : vector<8x128xf32>
    %cst_52 = arith.constant 1.000000e+00 : f32
    %186 = vector.broadcast %cst_52 : f32 to vector<8x128xf32>
    %187 = arith.addf %186, %185 : vector<8x128xf32>
    %188 = arith.divf %186, %187 : vector<8x128xf32>
    %189 = vector.extract_strided_slice %182 {offsets = [0, 128], sizes = [8, 128], strides = [1, 1]} : vector<8x512xf32> to vector<8x128xf32>
    %190 = arith.negf %189 : vector<8x128xf32>
    %191 = math.exp %190 : vector<8x128xf32>
    %cst_53 = arith.constant 1.000000e+00 : f32
    %192 = vector.broadcast %cst_53 : f32 to vector<8x128xf32>
    %193 = arith.addf %192, %191 : vector<8x128xf32>
    %194 = arith.divf %192, %193 : vector<8x128xf32>
    %195 = vector.extract_strided_slice %182 {offsets = [0, 256], sizes = [8, 128], strides = [1, 1]} : vector<8x512xf32> to vector<8x128xf32>
    %196 = math.tanh %195 : vector<8x128xf32>
    %197 = vector.extract_strided_slice %182 {offsets = [0, 384], sizes = [8, 128], strides = [1, 1]} : vector<8x512xf32> to vector<8x128xf32>
    %198 = arith.negf %197 : vector<8x128xf32>
    %199 = math.exp %198 : vector<8x128xf32>
    %cst_54 = arith.constant 1.000000e+00 : f32
    %200 = vector.broadcast %cst_54 : f32 to vector<8x128xf32>
    %201 = arith.addf %200, %199 : vector<8x128xf32>
    %202 = arith.divf %200, %201 : vector<8x128xf32>
    %203 = arith.mulf %194, %172 : vector<8x128xf32>
    %204 = arith.mulf %188, %196 : vector<8x128xf32>
    %205 = arith.addf %203, %204 : vector<8x128xf32>
    %206 = math.tanh %205 : vector<8x128xf32>
    %207 = arith.mulf %202, %206 : vector<8x128xf32>
    %208 = arith.index_cast %178 : i32 to index
    %c0_55 = arith.constant 0 : index
    %209 = vector.load %arg12[%208, %c0_55] : memref<64x128xf32, #tpu.memory_space<vmem>>, vector<8x128xf32>
    tpu.vector_store %arg12[%208, %c0_55], %207 {strides = array<i32>} : memref<64x128xf32, #tpu.memory_space<vmem>>, vector<8x128xf32>,
    %c6_i32 = arith.constant 6 : i32
    %c8_i32_56 = arith.constant 8 : i32
    %210 = arith.muli %c6_i32, %c8_i32_56 : i32
    %211 = tpu.assume_multiple %210, 8 : i32
    %212 = arith.index_cast %211 : i32 to index
    %c0_57 = arith.constant 0 : index
    %213 = vector.load %arg13[%212, %c0_57] : memref<64x512xf32, #tpu.memory_space<vmem>>, vector<8x512xf32>
    %cst_58 = arith.constant dense<0.000000e+00> : vector<8x512xf32>
    %214 = tpu.matmul %207, %1, %cst_58 {dimension_numbers = #tpu.dot_dimension_numbers<[1], [0], [0], [1], [0, 0, 1, 1], [], []>} : vector<8x128xf32>, vector<128x512xf32>, vector<8x512xf32> -> vector<8x512xf32>
    %215 = arith.addf %213, %214 : vector<8x512xf32>
    %216 = vector.extract_strided_slice %215 {offsets = [0, 0], sizes = [8, 128], strides = [1, 1]} : vector<8x512xf32> to vector<8x128xf32>
    %217 = arith.negf %216 : vector<8x128xf32>
    %218 = math.exp %217 : vector<8x128xf32>
    %cst_59 = arith.constant 1.000000e+00 : f32
    %219 = vector.broadcast %cst_59 : f32 to vector<8x128xf32>
    %220 = arith.addf %219, %218 : vector<8x128xf32>
    %221 = arith.divf %219, %220 : vector<8x128xf32>
    %222 = vector.extract_strided_slice %215 {offsets = [0, 128], sizes = [8, 128], strides = [1, 1]} : vector<8x512xf32> to vector<8x128xf32>
    %223 = arith.negf %222 : vector<8x128xf32>
    %224 = math.exp %223 : vector<8x128xf32>
    %cst_60 = arith.constant 1.000000e+00 : f32
    %225 = vector.broadcast %cst_60 : f32 to vector<8x128xf32>
    %226 = arith.addf %225, %224 : vector<8x128xf32>
    %227 = arith.divf %225, %226 : vector<8x128xf32>
    %228 = vector.extract_strided_slice %215 {offsets = [0, 256], sizes = [8, 128], strides = [1, 1]} : vector<8x512xf32> to vector<8x128xf32>
    %229 = math.tanh %228 : vector<8x128xf32>
    %230 = vector.extract_strided_slice %215 {offsets = [0, 384], sizes = [8, 128], strides = [1, 1]} : vector<8x512xf32> to vector<8x128xf32>
    %231 = arith.negf %230 : vector<8x128xf32>
    %232 = math.exp %231 : vector<8x128xf32>
    %cst_61 = arith.constant 1.000000e+00 : f32
    %233 = vector.broadcast %cst_61 : f32 to vector<8x128xf32>
    %234 = arith.addf %233, %232 : vector<8x128xf32>
    %235 = arith.divf %233, %234 : vector<8x128xf32>
    %236 = arith.mulf %227, %205 : vector<8x128xf32>
    %237 = arith.mulf %221, %229 : vector<8x128xf32>
    %238 = arith.addf %236, %237 : vector<8x128xf32>
    %239 = math.tanh %238 : vector<8x128xf32>
    %240 = arith.mulf %235, %239 : vector<8x128xf32>
    %241 = arith.index_cast %211 : i32 to index
    %c0_62 = arith.constant 0 : index
    %242 = vector.load %arg12[%241, %c0_62] : memref<64x128xf32, #tpu.memory_space<vmem>>, vector<8x128xf32>
    tpu.vector_store %arg12[%241, %c0_62], %240 {strides = array<i32>} : memref<64x128xf32, #tpu.memory_space<vmem>>, vector<8x128xf32>,
    %c7_i32 = arith.constant 7 : i32
    %c8_i32_63 = arith.constant 8 : i32
    %243 = arith.muli %c7_i32, %c8_i32_63 : i32
    %244 = tpu.assume_multiple %243, 8 : i32
    %245 = arith.index_cast %244 : i32 to index
    %c0_64 = arith.constant 0 : index
    %246 = vector.load %arg13[%245, %c0_64] : memref<64x512xf32, #tpu.memory_space<vmem>>, vector<8x512xf32>
    %cst_65 = arith.constant dense<0.000000e+00> : vector<8x512xf32>
    %247 = tpu.matmul %240, %1, %cst_65 {dimension_numbers = #tpu.dot_dimension_numbers<[1], [0], [0], [1], [0, 0, 1, 1], [], []>} : vector<8x128xf32>, vector<128x512xf32>, vector<8x512xf32> -> vector<8x512xf32>
    %248 = arith.addf %246, %247 : vector<8x512xf32>
    %249 = vector.extract_strided_slice %248 {offsets = [0, 0], sizes = [8, 128], strides = [1, 1]} : vector<8x512xf32> to vector<8x128xf32>
    %250 = arith.negf %249 : vector<8x128xf32>
    %251 = math.exp %250 : vector<8x128xf32>
    %cst_66 = arith.constant 1.000000e+00 : f32
    %252 = vector.broadcast %cst_66 : f32 to vector<8x128xf32>
    %253 = arith.addf %252, %251 : vector<8x128xf32>
    %254 = arith.divf %252, %253 : vector<8x128xf32>
    %255 = vector.extract_strided_slice %248 {offsets = [0, 128], sizes = [8, 128], strides = [1, 1]} : vector<8x512xf32> to vector<8x128xf32>
    %256 = arith.negf %255 : vector<8x128xf32>
    %257 = math.exp %256 : vector<8x128xf32>
    %cst_67 = arith.constant 1.000000e+00 : f32
    %258 = vector.broadcast %cst_67 : f32 to vector<8x128xf32>
    %259 = arith.addf %258, %257 : vector<8x128xf32>
    %260 = arith.divf %258, %259 : vector<8x128xf32>
    %261 = vector.extract_strided_slice %248 {offsets = [0, 256], sizes = [8, 128], strides = [1, 1]} : vector<8x512xf32> to vector<8x128xf32>
    %262 = math.tanh %261 : vector<8x128xf32>
    %263 = vector.extract_strided_slice %248 {offsets = [0, 384], sizes = [8, 128], strides = [1, 1]} : vector<8x512xf32> to vector<8x128xf32>
    %264 = arith.negf %263 : vector<8x128xf32>
    %265 = math.exp %264 : vector<8x128xf32>
    %cst_68 = arith.constant 1.000000e+00 : f32
    %266 = vector.broadcast %cst_68 : f32 to vector<8x128xf32>
    %267 = arith.addf %266, %265 : vector<8x128xf32>
    %268 = arith.divf %266, %267 : vector<8x128xf32>
    %269 = arith.mulf %260, %238 : vector<8x128xf32>
    %270 = arith.mulf %254, %262 : vector<8x128xf32>
    %271 = arith.addf %269, %270 : vector<8x128xf32>
    %272 = math.tanh %271 : vector<8x128xf32>
    %273 = arith.mulf %268, %272 : vector<8x128xf32>
    %274 = arith.index_cast %244 : i32 to index
    %c0_69 = arith.constant 0 : index
    %275 = vector.load %arg12[%274, %c0_69] : memref<64x128xf32, #tpu.memory_space<vmem>>, vector<8x128xf32>
    tpu.vector_store %arg12[%274, %c0_69], %273 {strides = array<i32>} : memref<64x128xf32, #tpu.memory_space<vmem>>, vector<8x128xf32>,
    %c8_i32_70 = arith.constant 8 : i32
    %c0_71 = arith.constant 0 : index
    %c0_72 = arith.constant 0 : index
    %c0_73 = arith.constant 0 : index
    %276 = vector.load %arg10[%c0_71, %c0_72, %c0_73] : memref<2x8x128xf32, #tpu.memory_space<vmem>>, vector<1x8x128xf32>
    %277 = vector.shape_cast %276 : vector<1x8x128xf32> to vector<8x128xf32>
    %278 = vector.shape_cast %273 : vector<8x128xf32> to vector<1x8x128xf32>
    tpu.vector_store %arg10[%c0_71, %c0_72, %c0_73], %278 {strides = array<i32>} : memref<2x8x128xf32, #tpu.memory_space<vmem>>, vector<1x8x128xf32>,
    %c0_74 = arith.constant 0 : index
    %c0_75 = arith.constant 0 : index
    %c0_76 = arith.constant 0 : index
    %279 = vector.load %arg11[%c0_74, %c0_75, %c0_76] : memref<2x8x128xf32, #tpu.memory_space<vmem>>, vector<1x8x128xf32>
    %280 = vector.shape_cast %279 : vector<1x8x128xf32> to vector<8x128xf32>
    %281 = vector.shape_cast %271 : vector<8x128xf32> to vector<1x8x128xf32>
    tpu.vector_store %arg11[%c0_74, %c0_75, %c0_76], %281 {strides = array<i32>} : memref<2x8x128xf32, #tpu.memory_space<vmem>>, vector<1x8x128xf32>,
    %c0_77 = arith.constant 0 : index
    %c0_78 = arith.constant 0 : index
    %282 = vector.load %arg6[%c0_77, %c0_78] : memref<128x512xf32, #tpu.memory_space<vmem>>, vector<128x512xf32>
    %c0_79 = arith.constant 0 : index
    %c0_80 = arith.constant 0 : index
    %283 = vector.load %arg7[%c0_79, %c0_80] : memref<128x512xf32, #tpu.memory_space<vmem>>, vector<128x512xf32>
    %c0_81 = arith.constant 0 : index
    %c0_82 = arith.constant 0 : index
    %284 = vector.load %arg8[%c0_81, %c0_82] : memref<1x512xf32, #tpu.memory_space<vmem>>, vector<1x512xf32>
    %c0_83 = arith.constant 0 : index
    %c0_84 = arith.constant 0 : index
    %285 = vector.load %arg12[%c0_83, %c0_84] : memref<64x128xf32, #tpu.memory_space<vmem>>, vector<64x128xf32>
    %cst_85 = arith.constant dense<0.000000e+00> : vector<64x512xf32>
    %286 = tpu.matmul %285, %282, %cst_85 {dimension_numbers = #tpu.dot_dimension_numbers<[1], [0], [0], [1], [0, 0, 1, 1], [], []>} : vector<64x128xf32>, vector<128x512xf32>, vector<64x512xf32> -> vector<64x512xf32>
    %287 = vector.broadcast %284 : vector<1x512xf32> to vector<64x512xf32>
    %288 = arith.addf %286, %287 : vector<64x512xf32>
    %c0_86 = arith.constant 0 : index
    %c0_87 = arith.constant 0 : index
    %289 = vector.load %arg13[%c0_86, %c0_87] : memref<64x512xf32, #tpu.memory_space<vmem>>, vector<64x512xf32>
    tpu.vector_store %arg13[%c0_86, %c0_87], %288 {strides = array<i32>} : memref<64x512xf32, #tpu.memory_space<vmem>>, vector<64x512xf32>,
    %c1 = arith.constant 1 : index
    %c0_88 = arith.constant 0 : index
    %c0_89 = arith.constant 0 : index
    %290 = vector.load %arg1[%c1, %c0_88, %c0_89] : memref<2x8x128xf32, #tpu.memory_space<vmem>>, vector<1x8x128xf32>
    %291 = vector.shape_cast %290 : vector<1x8x128xf32> to vector<8x128xf32>
    %c1_90 = arith.constant 1 : index
    %c0_91 = arith.constant 0 : index
    %c0_92 = arith.constant 0 : index
    %292 = vector.load %arg2[%c1_90, %c0_91, %c0_92] : memref<2x8x128xf32, #tpu.memory_space<vmem>>, vector<1x8x128xf32>
    %293 = vector.shape_cast %292 : vector<1x8x128xf32> to vector<8x128xf32>
    %c0_i32_93 = arith.constant 0 : i32
    %c8_i32_94 = arith.constant 8 : i32
    %294 = arith.muli %c0_i32_93, %c8_i32_94 : i32
    %295 = tpu.assume_multiple %294, 8 : i32
    %296 = arith.index_cast %295 : i32 to index
    %c0_95 = arith.constant 0 : index
    %297 = vector.load %arg13[%296, %c0_95] : memref<64x512xf32, #tpu.memory_space<vmem>>, vector<8x512xf32>
    %cst_96 = arith.constant dense<0.000000e+00> : vector<8x512xf32>
    %298 = tpu.matmul %291, %283, %cst_96 {dimension_numbers = #tpu.dot_dimension_numbers<[1], [0], [0], [1], [0, 0, 1, 1], [], []>} : vector<8x128xf32>, vector<128x512xf32>, vector<8x512xf32> -> vector<8x512xf32>
    %299 = arith.addf %297, %298 : vector<8x512xf32>
    %300 = vector.extract_strided_slice %299 {offsets = [0, 0], sizes = [8, 128], strides = [1, 1]} : vector<8x512xf32> to vector<8x128xf32>
    %301 = arith.negf %300 : vector<8x128xf32>
    %302 = math.exp %301 : vector<8x128xf32>
    %cst_97 = arith.constant 1.000000e+00 : f32
    %303 = vector.broadcast %cst_97 : f32 to vector<8x128xf32>
    %304 = arith.addf %303, %302 : vector<8x128xf32>
    %305 = arith.divf %303, %304 : vector<8x128xf32>
    %306 = vector.extract_strided_slice %299 {offsets = [0, 128], sizes = [8, 128], strides = [1, 1]} : vector<8x512xf32> to vector<8x128xf32>
    %307 = arith.negf %306 : vector<8x128xf32>
    %308 = math.exp %307 : vector<8x128xf32>
    %cst_98 = arith.constant 1.000000e+00 : f32
    %309 = vector.broadcast %cst_98 : f32 to vector<8x128xf32>
    %310 = arith.addf %309, %308 : vector<8x128xf32>
    %311 = arith.divf %309, %310 : vector<8x128xf32>
    %312 = vector.extract_strided_slice %299 {offsets = [0, 256], sizes = [8, 128], strides = [1, 1]} : vector<8x512xf32> to vector<8x128xf32>
    %313 = math.tanh %312 : vector<8x128xf32>
    %314 = vector.extract_strided_slice %299 {offsets = [0, 384], sizes = [8, 128], strides = [1, 1]} : vector<8x512xf32> to vector<8x128xf32>
    %315 = arith.negf %314 : vector<8x128xf32>
    %316 = math.exp %315 : vector<8x128xf32>
    %cst_99 = arith.constant 1.000000e+00 : f32
    %317 = vector.broadcast %cst_99 : f32 to vector<8x128xf32>
    %318 = arith.addf %317, %316 : vector<8x128xf32>
    %319 = arith.divf %317, %318 : vector<8x128xf32>
    %320 = arith.mulf %311, %293 : vector<8x128xf32>
    %321 = arith.mulf %305, %313 : vector<8x128xf32>
    %322 = arith.addf %320, %321 : vector<8x128xf32>
    %323 = math.tanh %322 : vector<8x128xf32>
    %324 = arith.mulf %319, %323 : vector<8x128xf32>
    %325 = arith.index_cast %295 : i32 to index
    %c0_100 = arith.constant 0 : index
    %326 = vector.load %arg9[%325, %c0_100] : memref<64x128xf32, #tpu.memory_space<vmem>>, vector<8x128xf32>
    tpu.vector_store %arg9[%325, %c0_100], %324 {strides = array<i32>} : memref<64x128xf32, #tpu.memory_space<vmem>>, vector<8x128xf32>,
    %c1_i32_101 = arith.constant 1 : i32
    %c8_i32_102 = arith.constant 8 : i32
    %327 = arith.muli %c1_i32_101, %c8_i32_102 : i32
    %328 = tpu.assume_multiple %327, 8 : i32
    %329 = arith.index_cast %328 : i32 to index
    %c0_103 = arith.constant 0 : index
    %330 = vector.load %arg13[%329, %c0_103] : memref<64x512xf32, #tpu.memory_space<vmem>>, vector<8x512xf32>
    %cst_104 = arith.constant dense<0.000000e+00> : vector<8x512xf32>
    %331 = tpu.matmul %324, %283, %cst_104 {dimension_numbers = #tpu.dot_dimension_numbers<[1], [0], [0], [1], [0, 0, 1, 1], [], []>} : vector<8x128xf32>, vector<128x512xf32>, vector<8x512xf32> -> vector<8x512xf32>
    %332 = arith.addf %330, %331 : vector<8x512xf32>
    %333 = vector.extract_strided_slice %332 {offsets = [0, 0], sizes = [8, 128], strides = [1, 1]} : vector<8x512xf32> to vector<8x128xf32>
    %334 = arith.negf %333 : vector<8x128xf32>
    %335 = math.exp %334 : vector<8x128xf32>
    %cst_105 = arith.constant 1.000000e+00 : f32
    %336 = vector.broadcast %cst_105 : f32 to vector<8x128xf32>
    %337 = arith.addf %336, %335 : vector<8x128xf32>
    %338 = arith.divf %336, %337 : vector<8x128xf32>
    %339 = vector.extract_strided_slice %332 {offsets = [0, 128], sizes = [8, 128], strides = [1, 1]} : vector<8x512xf32> to vector<8x128xf32>
    %340 = arith.negf %339 : vector<8x128xf32>
    %341 = math.exp %340 : vector<8x128xf32>
    %cst_106 = arith.constant 1.000000e+00 : f32
    %342 = vector.broadcast %cst_106 : f32 to vector<8x128xf32>
    %343 = arith.addf %342, %341 : vector<8x128xf32>
    %344 = arith.divf %342, %343 : vector<8x128xf32>
    %345 = vector.extract_strided_slice %332 {offsets = [0, 256], sizes = [8, 128], strides = [1, 1]} : vector<8x512xf32> to vector<8x128xf32>
    %346 = math.tanh %345 : vector<8x128xf32>
    %347 = vector.extract_strided_slice %332 {offsets = [0, 384], sizes = [8, 128], strides = [1, 1]} : vector<8x512xf32> to vector<8x128xf32>
    %348 = arith.negf %347 : vector<8x128xf32>
    %349 = math.exp %348 : vector<8x128xf32>
    %cst_107 = arith.constant 1.000000e+00 : f32
    %350 = vector.broadcast %cst_107 : f32 to vector<8x128xf32>
    %351 = arith.addf %350, %349 : vector<8x128xf32>
    %352 = arith.divf %350, %351 : vector<8x128xf32>
    %353 = arith.mulf %344, %322 : vector<8x128xf32>
    %354 = arith.mulf %338, %346 : vector<8x128xf32>
    %355 = arith.addf %353, %354 : vector<8x128xf32>
    %356 = math.tanh %355 : vector<8x128xf32>
    %357 = arith.mulf %352, %356 : vector<8x128xf32>
    %358 = arith.index_cast %328 : i32 to index
    %c0_108 = arith.constant 0 : index
    %359 = vector.load %arg9[%358, %c0_108] : memref<64x128xf32, #tpu.memory_space<vmem>>, vector<8x128xf32>
    tpu.vector_store %arg9[%358, %c0_108], %357 {strides = array<i32>} : memref<64x128xf32, #tpu.memory_space<vmem>>, vector<8x128xf32>,
    %c2_i32_109 = arith.constant 2 : i32
    %c8_i32_110 = arith.constant 8 : i32
    %360 = arith.muli %c2_i32_109, %c8_i32_110 : i32
    %361 = tpu.assume_multiple %360, 8 : i32
    %362 = arith.index_cast %361 : i32 to index
    %c0_111 = arith.constant 0 : index
    %363 = vector.load %arg13[%362, %c0_111] : memref<64x512xf32, #tpu.memory_space<vmem>>, vector<8x512xf32>
    %cst_112 = arith.constant dense<0.000000e+00> : vector<8x512xf32>
    %364 = tpu.matmul %357, %283, %cst_112 {dimension_numbers = #tpu.dot_dimension_numbers<[1], [0], [0], [1], [0, 0, 1, 1], [], []>} : vector<8x128xf32>, vector<128x512xf32>, vector<8x512xf32> -> vector<8x512xf32>
    %365 = arith.addf %363, %364 : vector<8x512xf32>
    %366 = vector.extract_strided_slice %365 {offsets = [0, 0], sizes = [8, 128], strides = [1, 1]} : vector<8x512xf32> to vector<8x128xf32>
    %367 = arith.negf %366 : vector<8x128xf32>
    %368 = math.exp %367 : vector<8x128xf32>
    %cst_113 = arith.constant 1.000000e+00 : f32
    %369 = vector.broadcast %cst_113 : f32 to vector<8x128xf32>
    %370 = arith.addf %369, %368 : vector<8x128xf32>
    %371 = arith.divf %369, %370 : vector<8x128xf32>
    %372 = vector.extract_strided_slice %365 {offsets = [0, 128], sizes = [8, 128], strides = [1, 1]} : vector<8x512xf32> to vector<8x128xf32>
    %373 = arith.negf %372 : vector<8x128xf32>
    %374 = math.exp %373 : vector<8x128xf32>
    %cst_114 = arith.constant 1.000000e+00 : f32
    %375 = vector.broadcast %cst_114 : f32 to vector<8x128xf32>
    %376 = arith.addf %375, %374 : vector<8x128xf32>
    %377 = arith.divf %375, %376 : vector<8x128xf32>
    %378 = vector.extract_strided_slice %365 {offsets = [0, 256], sizes = [8, 128], strides = [1, 1]} : vector<8x512xf32> to vector<8x128xf32>
    %379 = math.tanh %378 : vector<8x128xf32>
    %380 = vector.extract_strided_slice %365 {offsets = [0, 384], sizes = [8, 128], strides = [1, 1]} : vector<8x512xf32> to vector<8x128xf32>
    %381 = arith.negf %380 : vector<8x128xf32>
    %382 = math.exp %381 : vector<8x128xf32>
    %cst_115 = arith.constant 1.000000e+00 : f32
    %383 = vector.broadcast %cst_115 : f32 to vector<8x128xf32>
    %384 = arith.addf %383, %382 : vector<8x128xf32>
    %385 = arith.divf %383, %384 : vector<8x128xf32>
    %386 = arith.mulf %377, %355 : vector<8x128xf32>
    %387 = arith.mulf %371, %379 : vector<8x128xf32>
    %388 = arith.addf %386, %387 : vector<8x128xf32>
    %389 = math.tanh %388 : vector<8x128xf32>
    %390 = arith.mulf %385, %389 : vector<8x128xf32>
    %391 = arith.index_cast %361 : i32 to index
    %c0_116 = arith.constant 0 : index
    %392 = vector.load %arg9[%391, %c0_116] : memref<64x128xf32, #tpu.memory_space<vmem>>, vector<8x128xf32>
    tpu.vector_store %arg9[%391, %c0_116], %390 {strides = array<i32>} : memref<64x128xf32, #tpu.memory_space<vmem>>, vector<8x128xf32>,
    %c3_i32_117 = arith.constant 3 : i32
    %c8_i32_118 = arith.constant 8 : i32
    %393 = arith.muli %c3_i32_117, %c8_i32_118 : i32
    %394 = tpu.assume_multiple %393, 8 : i32
    %395 = arith.index_cast %394 : i32 to index
    %c0_119 = arith.constant 0 : index
    %396 = vector.load %arg13[%395, %c0_119] : memref<64x512xf32, #tpu.memory_space<vmem>>, vector<8x512xf32>
    %cst_120 = arith.constant dense<0.000000e+00> : vector<8x512xf32>
    %397 = tpu.matmul %390, %283, %cst_120 {dimension_numbers = #tpu.dot_dimension_numbers<[1], [0], [0], [1], [0, 0, 1, 1], [], []>} : vector<8x128xf32>, vector<128x512xf32>, vector<8x512xf32> -> vector<8x512xf32>
    %398 = arith.addf %396, %397 : vector<8x512xf32>
    %399 = vector.extract_strided_slice %398 {offsets = [0, 0], sizes = [8, 128], strides = [1, 1]} : vector<8x512xf32> to vector<8x128xf32>
    %400 = arith.negf %399 : vector<8x128xf32>
    %401 = math.exp %400 : vector<8x128xf32>
    %cst_121 = arith.constant 1.000000e+00 : f32
    %402 = vector.broadcast %cst_121 : f32 to vector<8x128xf32>
    %403 = arith.addf %402, %401 : vector<8x128xf32>
    %404 = arith.divf %402, %403 : vector<8x128xf32>
    %405 = vector.extract_strided_slice %398 {offsets = [0, 128], sizes = [8, 128], strides = [1, 1]} : vector<8x512xf32> to vector<8x128xf32>
    %406 = arith.negf %405 : vector<8x128xf32>
    %407 = math.exp %406 : vector<8x128xf32>
    %cst_122 = arith.constant 1.000000e+00 : f32
    %408 = vector.broadcast %cst_122 : f32 to vector<8x128xf32>
    %409 = arith.addf %408, %407 : vector<8x128xf32>
    %410 = arith.divf %408, %409 : vector<8x128xf32>
    %411 = vector.extract_strided_slice %398 {offsets = [0, 256], sizes = [8, 128], strides = [1, 1]} : vector<8x512xf32> to vector<8x128xf32>
    %412 = math.tanh %411 : vector<8x128xf32>
    %413 = vector.extract_strided_slice %398 {offsets = [0, 384], sizes = [8, 128], strides = [1, 1]} : vector<8x512xf32> to vector<8x128xf32>
    %414 = arith.negf %413 : vector<8x128xf32>
    %415 = math.exp %414 : vector<8x128xf32>
    %cst_123 = arith.constant 1.000000e+00 : f32
    %416 = vector.broadcast %cst_123 : f32 to vector<8x128xf32>
    %417 = arith.addf %416, %415 : vector<8x128xf32>
    %418 = arith.divf %416, %417 : vector<8x128xf32>
    %419 = arith.mulf %410, %388 : vector<8x128xf32>
    %420 = arith.mulf %404, %412 : vector<8x128xf32>
    %421 = arith.addf %419, %420 : vector<8x128xf32>
    %422 = math.tanh %421 : vector<8x128xf32>
    %423 = arith.mulf %418, %422 : vector<8x128xf32>
    %424 = arith.index_cast %394 : i32 to index
    %c0_124 = arith.constant 0 : index
    %425 = vector.load %arg9[%424, %c0_124] : memref<64x128xf32, #tpu.memory_space<vmem>>, vector<8x128xf32>
    tpu.vector_store %arg9[%424, %c0_124], %423 {strides = array<i32>} : memref<64x128xf32, #tpu.memory_space<vmem>>, vector<8x128xf32>,
    %c4_i32_125 = arith.constant 4 : i32
    %c8_i32_126 = arith.constant 8 : i32
    %426 = arith.muli %c4_i32_125, %c8_i32_126 : i32
    %427 = tpu.assume_multiple %426, 8 : i32
    %428 = arith.index_cast %427 : i32 to index
    %c0_127 = arith.constant 0 : index
    %429 = vector.load %arg13[%428, %c0_127] : memref<64x512xf32, #tpu.memory_space<vmem>>, vector<8x512xf32>
    %cst_128 = arith.constant dense<0.000000e+00> : vector<8x512xf32>
    %430 = tpu.matmul %423, %283, %cst_128 {dimension_numbers = #tpu.dot_dimension_numbers<[1], [0], [0], [1], [0, 0, 1, 1], [], []>} : vector<8x128xf32>, vector<128x512xf32>, vector<8x512xf32> -> vector<8x512xf32>
    %431 = arith.addf %429, %430 : vector<8x512xf32>
    %432 = vector.extract_strided_slice %431 {offsets = [0, 0], sizes = [8, 128], strides = [1, 1]} : vector<8x512xf32> to vector<8x128xf32>
    %433 = arith.negf %432 : vector<8x128xf32>
    %434 = math.exp %433 : vector<8x128xf32>
    %cst_129 = arith.constant 1.000000e+00 : f32
    %435 = vector.broadcast %cst_129 : f32 to vector<8x128xf32>
    %436 = arith.addf %435, %434 : vector<8x128xf32>
    %437 = arith.divf %435, %436 : vector<8x128xf32>
    %438 = vector.extract_strided_slice %431 {offsets = [0, 128], sizes = [8, 128], strides = [1, 1]} : vector<8x512xf32> to vector<8x128xf32>
    %439 = arith.negf %438 : vector<8x128xf32>
    %440 = math.exp %439 : vector<8x128xf32>
    %cst_130 = arith.constant 1.000000e+00 : f32
    %441 = vector.broadcast %cst_130 : f32 to vector<8x128xf32>
    %442 = arith.addf %441, %440 : vector<8x128xf32>
    %443 = arith.divf %441, %442 : vector<8x128xf32>
    %444 = vector.extract_strided_slice %431 {offsets = [0, 256], sizes = [8, 128], strides = [1, 1]} : vector<8x512xf32> to vector<8x128xf32>
    %445 = math.tanh %444 : vector<8x128xf32>
    %446 = vector.extract_strided_slice %431 {offsets = [0, 384], sizes = [8, 128], strides = [1, 1]} : vector<8x512xf32> to vector<8x128xf32>
    %447 = arith.negf %446 : vector<8x128xf32>
    %448 = math.exp %447 : vector<8x128xf32>
    %cst_131 = arith.constant 1.000000e+00 : f32
    %449 = vector.broadcast %cst_131 : f32 to vector<8x128xf32>
    %450 = arith.addf %449, %448 : vector<8x128xf32>
    %451 = arith.divf %449, %450 : vector<8x128xf32>
    %452 = arith.mulf %443, %421 : vector<8x128xf32>
    %453 = arith.mulf %437, %445 : vector<8x128xf32>
    %454 = arith.addf %452, %453 : vector<8x128xf32>
    %455 = math.tanh %454 : vector<8x128xf32>
    %456 = arith.mulf %451, %455 : vector<8x128xf32>
    %457 = arith.index_cast %427 : i32 to index
    %c0_132 = arith.constant 0 : index
    %458 = vector.load %arg9[%457, %c0_132] : memref<64x128xf32, #tpu.memory_space<vmem>>, vector<8x128xf32>
    tpu.vector_store %arg9[%457, %c0_132], %456 {strides = array<i32>} : memref<64x128xf32, #tpu.memory_space<vmem>>, vector<8x128xf32>,
    %c5_i32_133 = arith.constant 5 : i32
    %c8_i32_134 = arith.constant 8 : i32
    %459 = arith.muli %c5_i32_133, %c8_i32_134 : i32
    %460 = tpu.assume_multiple %459, 8 : i32
    %461 = arith.index_cast %460 : i32 to index
    %c0_135 = arith.constant 0 : index
    %462 = vector.load %arg13[%461, %c0_135] : memref<64x512xf32, #tpu.memory_space<vmem>>, vector<8x512xf32>
    %cst_136 = arith.constant dense<0.000000e+00> : vector<8x512xf32>
    %463 = tpu.matmul %456, %283, %cst_136 {dimension_numbers = #tpu.dot_dimension_numbers<[1], [0], [0], [1], [0, 0, 1, 1], [], []>} : vector<8x128xf32>, vector<128x512xf32>, vector<8x512xf32> -> vector<8x512xf32>
    %464 = arith.addf %462, %463 : vector<8x512xf32>
    %465 = vector.extract_strided_slice %464 {offsets = [0, 0], sizes = [8, 128], strides = [1, 1]} : vector<8x512xf32> to vector<8x128xf32>
    %466 = arith.negf %465 : vector<8x128xf32>
    %467 = math.exp %466 : vector<8x128xf32>
    %cst_137 = arith.constant 1.000000e+00 : f32
    %468 = vector.broadcast %cst_137 : f32 to vector<8x128xf32>
    %469 = arith.addf %468, %467 : vector<8x128xf32>
    %470 = arith.divf %468, %469 : vector<8x128xf32>
    %471 = vector.extract_strided_slice %464 {offsets = [0, 128], sizes = [8, 128], strides = [1, 1]} : vector<8x512xf32> to vector<8x128xf32>
    %472 = arith.negf %471 : vector<8x128xf32>
    %473 = math.exp %472 : vector<8x128xf32>
    %cst_138 = arith.constant 1.000000e+00 : f32
    %474 = vector.broadcast %cst_138 : f32 to vector<8x128xf32>
    %475 = arith.addf %474, %473 : vector<8x128xf32>
    %476 = arith.divf %474, %475 : vector<8x128xf32>
    %477 = vector.extract_strided_slice %464 {offsets = [0, 256], sizes = [8, 128], strides = [1, 1]} : vector<8x512xf32> to vector<8x128xf32>
    %478 = math.tanh %477 : vector<8x128xf32>
    %479 = vector.extract_strided_slice %464 {offsets = [0, 384], sizes = [8, 128], strides = [1, 1]} : vector<8x512xf32> to vector<8x128xf32>
    %480 = arith.negf %479 : vector<8x128xf32>
    %481 = math.exp %480 : vector<8x128xf32>
    %cst_139 = arith.constant 1.000000e+00 : f32
    %482 = vector.broadcast %cst_139 : f32 to vector<8x128xf32>
    %483 = arith.addf %482, %481 : vector<8x128xf32>
    %484 = arith.divf %482, %483 : vector<8x128xf32>
    %485 = arith.mulf %476, %454 : vector<8x128xf32>
    %486 = arith.mulf %470, %478 : vector<8x128xf32>
    %487 = arith.addf %485, %486 : vector<8x128xf32>
    %488 = math.tanh %487 : vector<8x128xf32>
    %489 = arith.mulf %484, %488 : vector<8x128xf32>
    %490 = arith.index_cast %460 : i32 to index
    %c0_140 = arith.constant 0 : index
    %491 = vector.load %arg9[%490, %c0_140] : memref<64x128xf32, #tpu.memory_space<vmem>>, vector<8x128xf32>
    tpu.vector_store %arg9[%490, %c0_140], %489 {strides = array<i32>} : memref<64x128xf32, #tpu.memory_space<vmem>>, vector<8x128xf32>,
    %c6_i32_141 = arith.constant 6 : i32
    %c8_i32_142 = arith.constant 8 : i32
    %492 = arith.muli %c6_i32_141, %c8_i32_142 : i32
    %493 = tpu.assume_multiple %492, 8 : i32
    %494 = arith.index_cast %493 : i32 to index
    %c0_143 = arith.constant 0 : index
    %495 = vector.load %arg13[%494, %c0_143] : memref<64x512xf32, #tpu.memory_space<vmem>>, vector<8x512xf32>
    %cst_144 = arith.constant dense<0.000000e+00> : vector<8x512xf32>
    %496 = tpu.matmul %489, %283, %cst_144 {dimension_numbers = #tpu.dot_dimension_numbers<[1], [0], [0], [1], [0, 0, 1, 1], [], []>} : vector<8x128xf32>, vector<128x512xf32>, vector<8x512xf32> -> vector<8x512xf32>
    %497 = arith.addf %495, %496 : vector<8x512xf32>
    %498 = vector.extract_strided_slice %497 {offsets = [0, 0], sizes = [8, 128], strides = [1, 1]} : vector<8x512xf32> to vector<8x128xf32>
    %499 = arith.negf %498 : vector<8x128xf32>
    %500 = math.exp %499 : vector<8x128xf32>
    %cst_145 = arith.constant 1.000000e+00 : f32
    %501 = vector.broadcast %cst_145 : f32 to vector<8x128xf32>
    %502 = arith.addf %501, %500 : vector<8x128xf32>
    %503 = arith.divf %501, %502 : vector<8x128xf32>
    %504 = vector.extract_strided_slice %497 {offsets = [0, 128], sizes = [8, 128], strides = [1, 1]} : vector<8x512xf32> to vector<8x128xf32>
    %505 = arith.negf %504 : vector<8x128xf32>
    %506 = math.exp %505 : vector<8x128xf32>
    %cst_146 = arith.constant 1.000000e+00 : f32
    %507 = vector.broadcast %cst_146 : f32 to vector<8x128xf32>
    %508 = arith.addf %507, %506 : vector<8x128xf32>
    %509 = arith.divf %507, %508 : vector<8x128xf32>
    %510 = vector.extract_strided_slice %497 {offsets = [0, 256], sizes = [8, 128], strides = [1, 1]} : vector<8x512xf32> to vector<8x128xf32>
    %511 = math.tanh %510 : vector<8x128xf32>
    %512 = vector.extract_strided_slice %497 {offsets = [0, 384], sizes = [8, 128], strides = [1, 1]} : vector<8x512xf32> to vector<8x128xf32>
    %513 = arith.negf %512 : vector<8x128xf32>
    %514 = math.exp %513 : vector<8x128xf32>
    %cst_147 = arith.constant 1.000000e+00 : f32
    %515 = vector.broadcast %cst_147 : f32 to vector<8x128xf32>
    %516 = arith.addf %515, %514 : vector<8x128xf32>
    %517 = arith.divf %515, %516 : vector<8x128xf32>
    %518 = arith.mulf %509, %487 : vector<8x128xf32>
    %519 = arith.mulf %503, %511 : vector<8x128xf32>
    %520 = arith.addf %518, %519 : vector<8x128xf32>
    %521 = math.tanh %520 : vector<8x128xf32>
    %522 = arith.mulf %517, %521 : vector<8x128xf32>
    %523 = arith.index_cast %493 : i32 to index
    %c0_148 = arith.constant 0 : index
    %524 = vector.load %arg9[%523, %c0_148] : memref<64x128xf32, #tpu.memory_space<vmem>>, vector<8x128xf32>
    tpu.vector_store %arg9[%523, %c0_148], %522 {strides = array<i32>} : memref<64x128xf32, #tpu.memory_space<vmem>>, vector<8x128xf32>,
    %c7_i32_149 = arith.constant 7 : i32
    %c8_i32_150 = arith.constant 8 : i32
    %525 = arith.muli %c7_i32_149, %c8_i32_150 : i32
    %526 = tpu.assume_multiple %525, 8 : i32
    %527 = arith.index_cast %526 : i32 to index
    %c0_151 = arith.constant 0 : index
    %528 = vector.load %arg13[%527, %c0_151] : memref<64x512xf32, #tpu.memory_space<vmem>>, vector<8x512xf32>
    %cst_152 = arith.constant dense<0.000000e+00> : vector<8x512xf32>
    %529 = tpu.matmul %522, %283, %cst_152 {dimension_numbers = #tpu.dot_dimension_numbers<[1], [0], [0], [1], [0, 0, 1, 1], [], []>} : vector<8x128xf32>, vector<128x512xf32>, vector<8x512xf32> -> vector<8x512xf32>
    %530 = arith.addf %528, %529 : vector<8x512xf32>
    %531 = vector.extract_strided_slice %530 {offsets = [0, 0], sizes = [8, 128], strides = [1, 1]} : vector<8x512xf32> to vector<8x128xf32>
    %532 = arith.negf %531 : vector<8x128xf32>
    %533 = math.exp %532 : vector<8x128xf32>
    %cst_153 = arith.constant 1.000000e+00 : f32
    %534 = vector.broadcast %cst_153 : f32 to vector<8x128xf32>
    %535 = arith.addf %534, %533 : vector<8x128xf32>
    %536 = arith.divf %534, %535 : vector<8x128xf32>
    %537 = vector.extract_strided_slice %530 {offsets = [0, 128], sizes = [8, 128], strides = [1, 1]} : vector<8x512xf32> to vector<8x128xf32>
    %538 = arith.negf %537 : vector<8x128xf32>
    %539 = math.exp %538 : vector<8x128xf32>
    %cst_154 = arith.constant 1.000000e+00 : f32
    %540 = vector.broadcast %cst_154 : f32 to vector<8x128xf32>
    %541 = arith.addf %540, %539 : vector<8x128xf32>
    %542 = arith.divf %540, %541 : vector<8x128xf32>
    %543 = vector.extract_strided_slice %530 {offsets = [0, 256], sizes = [8, 128], strides = [1, 1]} : vector<8x512xf32> to vector<8x128xf32>
    %544 = math.tanh %543 : vector<8x128xf32>
    %545 = vector.extract_strided_slice %530 {offsets = [0, 384], sizes = [8, 128], strides = [1, 1]} : vector<8x512xf32> to vector<8x128xf32>
    %546 = arith.negf %545 : vector<8x128xf32>
    %547 = math.exp %546 : vector<8x128xf32>
    %cst_155 = arith.constant 1.000000e+00 : f32
    %548 = vector.broadcast %cst_155 : f32 to vector<8x128xf32>
    %549 = arith.addf %548, %547 : vector<8x128xf32>
    %550 = arith.divf %548, %549 : vector<8x128xf32>
    %551 = arith.mulf %542, %520 : vector<8x128xf32>
    %552 = arith.mulf %536, %544 : vector<8x128xf32>
    %553 = arith.addf %551, %552 : vector<8x128xf32>
    %554 = math.tanh %553 : vector<8x128xf32>
    %555 = arith.mulf %550, %554 : vector<8x128xf32>
    %556 = arith.index_cast %526 : i32 to index
    %c0_156 = arith.constant 0 : index
    %557 = vector.load %arg9[%556, %c0_156] : memref<64x128xf32, #tpu.memory_space<vmem>>, vector<8x128xf32>
    tpu.vector_store %arg9[%556, %c0_156], %555 {strides = array<i32>} : memref<64x128xf32, #tpu.memory_space<vmem>>, vector<8x128xf32>,
    %c8_i32_157 = arith.constant 8 : i32
    %c1_158 = arith.constant 1 : index
    %c0_159 = arith.constant 0 : index
    %c0_160 = arith.constant 0 : index
    %558 = vector.load %arg10[%c1_158, %c0_159, %c0_160] : memref<2x8x128xf32, #tpu.memory_space<vmem>>, vector<1x8x128xf32>
    %559 = vector.shape_cast %558 : vector<1x8x128xf32> to vector<8x128xf32>
    %560 = vector.shape_cast %555 : vector<8x128xf32> to vector<1x8x128xf32>
    tpu.vector_store %arg10[%c1_158, %c0_159, %c0_160], %560 {strides = array<i32>} : memref<2x8x128xf32, #tpu.memory_space<vmem>>, vector<1x8x128xf32>,
    %c1_161 = arith.constant 1 : index
    %c0_162 = arith.constant 0 : index
    %c0_163 = arith.constant 0 : index
    %561 = vector.load %arg11[%c1_161, %c0_162, %c0_163] : memref<2x8x128xf32, #tpu.memory_space<vmem>>, vector<1x8x128xf32>
    %562 = vector.shape_cast %561 : vector<1x8x128xf32> to vector<8x128xf32>
    %563 = vector.shape_cast %553 : vector<8x128xf32> to vector<1x8x128xf32>
    tpu.vector_store %arg11[%c1_161, %c0_162, %c0_163], %563 {strides = array<i32>} : memref<2x8x128xf32, #tpu.memory_space<vmem>>, vector<1x8x128xf32>,
    return
  }
}

module attributes {stable_mosaic.version = 11 : i64} {
  func.func @head_kernel(%arg0: i32, %arg1: memref<64x128xf32, #tpu.memory_space<vmem>>, %arg2: memref<128x128xf32, #tpu.memory_space<vmem>>, %arg3: memref<1x128xf32, #tpu.memory_space<vmem>>, %arg4: memref<128x128xf32, #tpu.memory_space<vmem>>, %arg5: memref<1x128xf32, #tpu.memory_space<vmem>>, %arg6: memref<64x128xf32, #tpu.memory_space<vmem>>) attributes {dimension_semantics = [#tpu.dimension_semantics<parallel>], iteration_bounds = array<i64: 1>, scalar_prefetch = 0 : i64, scratch_operands = 0 : i64, tpu.core_type = #tpu.core_type<tc>, window_params = [{transform_indices = @transform_0, window_bounds = array<i64: 64, 128>}, {pipeline_mode = #tpu.pipeline_mode<synchronous>, transform_indices = @transform_1, window_bounds = array<i64: 128, 128>}, {pipeline_mode = #tpu.pipeline_mode<synchronous>, transform_indices = @transform_2, window_bounds = array<i64: 1, 128>}, {pipeline_mode = #tpu.pipeline_mode<synchronous>, transform_indices = @transform_3, window_bounds = array<i64: 128, 128>}, {pipeline_mode = #tpu.pipeline_mode<synchronous>, transform_indices = @transform_4, window_bounds = array<i64: 1, 128>}, {transform_indices = @transform_5, window_bounds = array<i64: 64, 128>}]} {
    %c0 = arith.constant 0 : index
    %c0_0 = arith.constant 0 : index
    %0 = vector.load %arg1[%c0, %c0_0] : memref<64x128xf32, #tpu.memory_space<vmem>>, vector<64x128xf32>
    %c0_1 = arith.constant 0 : index
    %c0_2 = arith.constant 0 : index
    %1 = vector.load %arg2[%c0_1, %c0_2] : memref<128x128xf32, #tpu.memory_space<vmem>>, vector<128x128xf32>
    %cst = arith.constant dense<0.000000e+00> : vector<64x128xf32>
    %2 = tpu.matmul %0, %1, %cst {dimension_numbers = #tpu.dot_dimension_numbers<[1], [0], [0], [1], [0, 0, 1, 1], [], []>} : vector<64x128xf32>, vector<128x128xf32>, vector<64x128xf32> -> vector<64x128xf32>
    %c0_3 = arith.constant 0 : index
    %c0_4 = arith.constant 0 : index
    %3 = vector.load %arg3[%c0_3, %c0_4] : memref<1x128xf32, #tpu.memory_space<vmem>>, vector<1x128xf32>
    %4 = vector.broadcast %3 : vector<1x128xf32> to vector<64x128xf32>
    %5 = arith.addf %2, %4 : vector<64x128xf32>
    %cst_5 = arith.constant 0.000000e+00 : f32
    %6 = vector.broadcast %cst_5 : f32 to vector<64x128xf32>
    %7 = arith.maximumf %5, %6 : vector<64x128xf32>
    %c0_6 = arith.constant 0 : index
    %c0_7 = arith.constant 0 : index
    %8 = vector.load %arg4[%c0_6, %c0_7] : memref<128x128xf32, #tpu.memory_space<vmem>>, vector<128x128xf32>
    %cst_8 = arith.constant dense<0.000000e+00> : vector<64x128xf32>
    %9 = tpu.matmul %7, %8, %cst_8 {dimension_numbers = #tpu.dot_dimension_numbers<[1], [0], [0], [1], [0, 0, 1, 1], [], []>} : vector<64x128xf32>, vector<128x128xf32>, vector<64x128xf32> -> vector<64x128xf32>
    %c0_9 = arith.constant 0 : index
    %c0_10 = arith.constant 0 : index
    %10 = vector.load %arg5[%c0_9, %c0_10] : memref<1x128xf32, #tpu.memory_space<vmem>>, vector<1x128xf32>
    %11 = vector.broadcast %10 : vector<1x128xf32> to vector<64x128xf32>
    %12 = arith.addf %9, %11 : vector<64x128xf32>
    %c0_11 = arith.constant 0 : index
    %c0_12 = arith.constant 0 : index
    %13 = vector.load %arg6[%c0_11, %c0_12] : memref<64x128xf32, #tpu.memory_space<vmem>>, vector<64x128xf32>
    tpu.vector_store %arg6[%c0_11, %c0_12], %12 {strides = array<i32>} : memref<64x128xf32, #tpu.memory_space<vmem>>, vector<64x128xf32>,
    return
  }
  func.func @transform_0(%arg0: i32) -> (i32, i32) {
    %c0_i32 = arith.constant 0 : i32
    %c0_i32_0 = arith.constant 0 : i32
    return %arg0, %c0_i32 : i32, i32
  }
  func.func @transform_1(%arg0: i32) -> (i32, i32) {
    %c0_i32 = arith.constant 0 : i32
    %c0_i32_0 = arith.constant 0 : i32
    %c0_i32_1 = arith.constant 0 : i32
    return %c0_i32, %c0_i32_0 : i32, i32
  }
  func.func @transform_2(%arg0: i32) -> (i32, i32) {
    %c0_i32 = arith.constant 0 : i32
    %c0_i32_0 = arith.constant 0 : i32
    %c0_i32_1 = arith.constant 0 : i32
    return %c0_i32, %c0_i32_0 : i32, i32
  }
  func.func @transform_3(%arg0: i32) -> (i32, i32) {
    %c0_i32 = arith.constant 0 : i32
    %c0_i32_0 = arith.constant 0 : i32
    %c0_i32_1 = arith.constant 0 : i32
    return %c0_i32, %c0_i32_0 : i32, i32
  }
  func.func @transform_4(%arg0: i32) -> (i32, i32) {
    %c0_i32 = arith.constant 0 : i32
    %c0_i32_0 = arith.constant 0 : i32
    %c0_i32_1 = arith.constant 0 : i32
    return %c0_i32, %c0_i32_0 : i32, i32
  }
  func.func @transform_5(%arg0: i32) -> (i32, i32) {
    %c0_i32 = arith.constant 0 : i32
    %c0_i32_0 = arith.constant 0 : i32
    return %arg0, %c0_i32 : i32, i32
  }
}

</mosaic_0001>

<bundles_post_ra>
// kernel: char_rnn_forward.3
= control target key start
LH: loop header
LB: loop body
LE: loop exit
PB: predicated region body
PF: predicated region fallthrough
CT: control target
= control target key end

     0   :  { %s686_s1 = inlined_call_operand.vmem [shape: f32[128,128], index: 1, kind: input, shape index: {}]   ;;  %s687_s0 = inlined_call_operand.vmem [shape: f32[64,128], index: 0, kind: input, shape index: {}]   ;;  %s688_s3 = inlined_call_operand.vmem [shape: f32[128,128], index: 3, kind: input, shape index: {}]   ;;  %s689_s2 = inlined_call_operand.vmem [shape: f32[1,128], index: 2, kind: input, shape index: {}]   ;;  %s690_s4 = inlined_call_operand.vmem [shape: f32[1,128], index: 4, kind: input, shape index: {}]   ;;  %s691_s5 = inlined_call_operand.vmem [shape: f32[64,128], index: 5, kind: output, shape index: {}]  }
   0x1   :  { %v28_v0 = vld [vmem:[%s686_s1] sm:$0xff]  ;;  %v29_v1 = vld [vmem:[%s686_s1 + $0x8] sm:$0xff]  ;;  %v30_v2 = vld [vmem:[%s686_s1 + $0x10] sm:$0xff] }
   0x2   :  { %v442_v3 = vpack.c.bf16 %v29_v1, %v28_v0  ;;  %v31_v4 = vld [vmem:[%s686_s1 + $0x18] sm:$0xff]  ;;  %v32_v6 = vld [vmem:[%s686_s1 + $0x20] sm:$0xff]  ;;  %v33_v7 = vld [vmem:[%s686_s1 + $0x28] sm:$0xff] }
   0x3   :  { %v446_v5 = vpack.c.bf16 %v31_v4, %v30_v2  ;;  %v450_v8 = vpack.c.bf16 %v33_v7, %v32_v6  ;;  %v20_v9 = vld [vmem:[%s687_s0] sm:$0xff]  ;;  %v34_v10 = vld [vmem:[%s686_s1 + $0x30] sm:$0xff]  ;;  %v35_v11 = vld [vmem:[%s686_s1 + $0x38] sm:$0xff] }
   0x4   :  { %443 = vmatprep.subr.bf16.mxu0 %v442_v3  ;;  %386 = vmatprep.mubr.f32.mxu0 %v20_v9  ;;  %v164_v12 = vld [vmem:[%s688_s3] sm:$0xff]  ;;  %v165_v13 = vld [vmem:[%s688_s3 + $0x8] sm:$0xff]  ;;  %v166_v14 = vld [vmem:[%s688_s3 + $0x10] sm:$0xff]  ;;  %v454_v15 = vpack.c.bf16 %v35_v11, %v34_v10 }
   0x5   :  { %445 = vmatpush3.bf16.msra.mxu0 %v442_v3  ;;  %v36_v16 = vld [vmem:[%s686_s1 + $0x40] sm:$0xff]  ;;  %v474_v17 = vpack.c.bf16 %v165_v13, %v164_v12  ;;  %v167_v18 = vld [vmem:[%s688_s3 + $0x18] sm:$0xff]  ;;  %v37_v19 = vld [vmem:[%s686_s1 + $0x48] sm:$0xff] }
   0x6   :  { %447 = vmatprep.subr.bf16.mxu0 %v446_v5  ;;  %v478_v20 = vpack.c.bf16 %v167_v18, %v166_v14  ;;  %v168_v21 = vld [vmem:[%s688_s3 + $0x20] sm:$0xff]  ;;  %v169_v22 = vld [vmem:[%s688_s3 + $0x28] sm:$0xff]  ;;  %v458_v23 = vpack.c.bf16 %v37_v19, %v36_v16  ;;  %v38_v24 = vld [vmem:[%s686_s1 + $0x50] sm:$0xff] }
   0x7   :  { %475 = vmatprep.subr.bf16.mxu1 %v474_v17  ;;  %v482_v25 = vpack.c.bf16 %v169_v22, %v168_v21  ;;  %v39_v26 = vld [vmem:[%s686_s1 + $0x58] sm:$0xff]  ;;  %v170_v27 = vld [vmem:[%s688_s3 + $0x30] sm:$0xff]  ;;  %v40_v30 = vld [vmem:[%s686_s1 + $0x60] sm:$0xff] }
   0x8   :  { %477 = vmatpush3.bf16.msra.mxu1 %v474_v17  ;;  %v171_v28 = vld [vmem:[%s688_s3 + $0x38] sm:$0xff]  ;;  %v462_v29 = vpack.c.bf16 %v39_v26, %v38_v24  ;;  %v41_v32 = vld [vmem:[%s686_s1 + $0x68] sm:$0xff]  ;;  %v172_v33 = vld [vmem:[%s688_s3 + $0x40] sm:$0xff] }
   0x9   :  { %449 = vmatpush3.bf16.msra.mxu0 %v446_v5  ;;  %479 = vmatprep.subr.bf16.mxu1 %v478_v20  ;;  %v486_v31 = vpack.c.bf16 %v171_v28, %v170_v27  ;;  %v173_v34 = vld [vmem:[%s688_s3 + $0x48] sm:$0xff]  ;;  %v466_v35 = vpack.c.bf16 %v41_v32, %v40_v30  ;;  %v42_v36 = vld [vmem:[%s686_s1 + $0x70] sm:$0xff]  ;;  %v43_v38 = vld [vmem:[%s686_s1 + $0x78] sm:$0xff] }
   0xa   :  { %451 = vmatprep.subr.bf16.mxu0 %v450_v8  ;;  %v490_v37 = vpack.c.bf16 %v173_v34, %v172_v33  ;;  %v174_v39 = vld [vmem:[%s688_s3 + $0x50] sm:$0xff]  ;;  %v175_v40 = vld [vmem:[%s688_s3 + $0x58] sm:$0xff]  ;;  %v470_v41 = vpack.c.bf16 %v43_v38, %v42_v36  ;;  %v176_v43 = vld [vmem:[%s688_s3 + $0x60] sm:$0xff] }
   0xb   :  { %v494_v42 = vpack.c.bf16 %v175_v40, %v174_v39  ;;  %v177_v44 = vld [vmem:[%s688_s3 + $0x68] sm:$0xff]  ;;  %v22_v47 = vld [vmem:[%s687_s0 + $0x10] sm:$0xff]  ;;  %v23_v48 = vld [vmem:[%s687_s0 + $0x18] sm:$0xff] }
   0xc   :  { %481 = vmatpush3.bf16.msra.mxu1 %v478_v20  ;;  %v498_v45 = vpack.c.bf16 %v177_v44, %v176_v43  ;;  %v21_v46 = vld [vmem:[%s687_s0 + $0x8] sm:$0xff]  ;;  %v24_v49 = vld [vmem:[%s687_s0 + $0x20] sm:$0xff]  ;;  %v26_v51 = vld [vmem:[%s687_s0 + $0x30] sm:$0xff] }
   0xd   :  { %453 = vmatpush3.bf16.msra.mxu0 %v450_v8  ;;  %483 = vmatprep.subr.bf16.mxu1 %v482_v25  ;;  %v25_v50 = vld [vmem:[%s687_s0 + $0x28] sm:$0xff]  ;;  %v27_v52 = vld [vmem:[%s687_s0 + $0x38] sm:$0xff]  ;;  %v178_v53 = vld [vmem:[%s688_s3 + $0x70] sm:$0xff] }
   0xe   :  { %455 = vmatprep.subr.bf16.mxu0 %v454_v15  ;;  %v179_v54 = vld [vmem:[%s688_s3 + $0x78] sm:$0xff]  ;;  %v304_v56 = vld [vmem:[%s689_s2] ss:$0 sm:$0xff] }
   0xf   :  { %v502_v55 = vpack.c.bf16 %v179_v54, %v178_v53  ;;  %v305_v17 = vld [vmem:[%s690_s4] ss:$0 sm:$0xff] }
  0x10   :  { %485 = vmatpush3.bf16.msra.mxu1 %v482_v25 }
  0x11   :  { %457 = vmatpush3.bf16.msra.mxu0 %v454_v15  ;;  %487 = vmatprep.subr.bf16.mxu1 %v486_v31 }
  0x12   :  { %459 = vmatprep.subr.bf16.mxu0 %v458_v23 }
  0x14   :  { %489 = vmatpush3.bf16.msra.mxu1 %v486_v31 }
  0x15   :  { %461 = vmatpush3.bf16.msra.mxu0 %v458_v23  ;;  %491 = vmatprep.subr.bf16.mxu1 %v490_v37 }
  0x16   :  { %463 = vmatprep.subr.bf16.mxu0 %v462_v29 }
  0x18   :  { %493 = vmatpush3.bf16.msra.mxu1 %v490_v37 }
  0x19   :  { %465 = vmatpush3.bf16.msra.mxu0 %v462_v29  ;;  %495 = vmatprep.subr.bf16.mxu1 %v494_v42 }
  0x1a   :  { %467 = vmatprep.subr.bf16.mxu0 %v466_v35 }
  0x1c   :  { %497 = vmatpush3.bf16.msra.mxu1 %v494_v42 }
  0x1d   :  { %469 = vmatpush3.bf16.msra.mxu0 %v466_v35  ;;  %499 = vmatprep.subr.bf16.mxu1 %v498_v45 }
  0x1e   :  { %471 = vmatprep.subr.bf16.mxu0 %v470_v41 }
  0x20   :  { %501 = vmatpush3.bf16.msra.mxu1 %v498_v45 }
  0x21   :  { %473 = vmatpush3.bf16.msra.mxu0 %v470_v41  ;;  %503 = vmatprep.subr.bf16.mxu1 %v502_v55 }
  0x24   :  { %387 = vmatmul.mubr.f32.vlgmr.msra.gmra.mrb[0].mxu0 %v21_v46  ;;  %505 = vmatpush3.bf16.msra.mxu1 %v502_v55 }
  0x25   :  { %389 = vmatprep.mubr.f32.mxu0 %v22_v47 }
  0x28   :  { %390 = vmatmul.mubr.f32.gmra.mrb[2].mxu0 %v23_v48 }
  0x29   :  { %392 = vmatprep.mubr.f32.mxu0 %v24_v49 }
  0x2c   :  { %393 = vmatmul.mubr.f32.gmra.mrb[4].mxu0 %v25_v50 }
  0x2d   :  { %395 = vmatprep.mubr.f32.mxu0 %v26_v51 }
  0x30   :  { %396 = vmatmul.mubr.f32.gmra.mrb[6].mxu0 %v27_v52 }
  0xf7   :  { %v388_v57 = vpop.f32.mrb[0].mxu0 }
  0xf8   :  { %v123_v58 = vadd.f32 %v388_v57, %v304_v56  ;;  %v117_v59 = vpop.f32.mrb[1].mxu0 }
  0xf9   :  { %v118_v60 = vadd.f32 %v304_v56, %v117_v59 }
  0xfa   :  { %v157_v63 = vmax.f32 %v123_v58, 0.0 }
  0xfb   :  { %v391_v61 = vpop.f32.mrb[2].mxu0  ;;  %v156_v62 = vmax.f32 %v118_v60, 0.0 }
  0xfc   :  { %v133_v0 = vadd.f32 %v391_v61, %v304_v56  ;;  %v127_v1 = vpop.f32.mrb[3].mxu0 }
  0xfd   :  { %v128_v2 = vadd.f32 %v304_v56, %v127_v1  ;;  %430 = vmatprep.mubr.f32.mxu1 %v156_v62 }
  0xfe   :  { %431 = vmatmul.mubr.f32.vlgmr.msra.gmra.mrb[0].mxu1 %v157_v63  ;;  %v159_v5 = vmax.f32 %v133_v0, 0.0 }
  0xff   :  { %v158_v3 = vmax.f32 %v128_v2, 0.0  ;;  %v394_v4 = vpop.f32.mrb[4].mxu0 }
 0x100   :  { %v143_v6 = vadd.f32 %v394_v4, %v304_v56  ;;  %v137_v7 = vpop.f32.mrb[5].mxu0 }
 0x101   :  { %v138_v8 = vadd.f32 %v304_v56, %v137_v7  ;;  %433 = vmatprep.mubr.f32.mxu1 %v158_v3 }
 0x102   :  { %434 = vmatmul.mubr.f32.gmra.mrb[2].mxu1 %v159_v5  ;;  %v161_v11 = vmax.f32 %v143_v6, 0.0 }
 0x103   :  { %v160_v9 = vmax.f32 %v138_v8, 0.0  ;;  %v397_v10 = vpop.f32.mrb[6].mxu0 }
 0x104   :  { %v153_v12 = vadd.f32 %v397_v10, %v304_v56  ;;  %v147_v13 = vpop.f32.mrb[7].mxu0 }
 0x105   :  { %v148_v14 = vadd.f32 %v304_v56, %v147_v13  ;;  %436 = vmatprep.mubr.f32.mxu1 %v160_v9 }
 0x106   :  { %437 = vmatmul.mubr.f32.gmra.mrb[4].mxu1 %v161_v11  ;;  %v163_v16 = vmax.f32 %v153_v12, 0.0 }
 0x107   :  { %v162_v15 = vmax.f32 %v148_v14, 0.0 }
 0x109   :  { %439 = vmatprep.mubr.f32.mxu1 %v162_v15 }
 0x10a   :  { %440 = vmatmul.mubr.f32.gmra.mrb[6].mxu1 %v163_v16 }
 0x1d1   :  { %v432_v18 = vpop.f32.mrb[0].mxu1 }
 0x1d2   :  { %v259_v19 = vadd.f32 %v432_v18, %v305_v17  ;;  %v253_v20 = vpop.f32.mrb[1].mxu1 }
 0x1d3   :  { %v254_v21 = vadd.f32 %v305_v17, %v253_v20 }
 0x1d4   :  { %293 = vst [vmem:[%s691_s5 + $0x8] sm:$0xff] %v259_v19 }
 0x1d5   :  { %292 = vst [vmem:[%s691_s5] sm:$0xff] %v254_v21  ;;  %v435_v22 = vpop.f32.mrb[2].mxu1 }
 0x1d6   :  { %v269_v23 = vadd.f32 %v435_v22, %v305_v17  ;;  %v263_v24 = vpop.f32.mrb[3].mxu1 }
 0x1d7   :  { %v264_v25 = vadd.f32 %v305_v17, %v263_v24 }
 0x1d8   :  { %295 = vst [vmem:[%s691_s5 + $0x18] sm:$0xff] %v269_v23 }
 0x1d9   :  { %294 = vst [vmem:[%s691_s5 + $0x10] sm:$0xff] %v264_v25  ;;  %v438_v26 = vpop.f32.mrb[4].mxu1 }
 0x1da   :  { %v279_v27 = vadd.f32 %v438_v26, %v305_v17  ;;  %v273_v28 = vpop.f32.mrb[5].mxu1 }
 0x1db   :  { %v274_v29 = vadd.f32 %v305_v17, %v273_v28 }
 0x1dc   :  { %297 = vst [vmem:[%s691_s5 + $0x28] sm:$0xff] %v279_v27 }
 0x1dd   :  { %296 = vst [vmem:[%s691_s5 + $0x20] sm:$0xff] %v274_v29  ;;  %v441_v30 = vpop.f32.mrb[6].mxu1 }
 0x1de   :  { %v289_v31 = vadd.f32 %v441_v30, %v305_v17  ;;  %v283_v32 = vpop.f32.mrb[7].mxu1 }
 0x1df   :  { %v284_v33 = vadd.f32 %v305_v17, %v283_v32 }
 0x1e0   :  { %299 = vst [vmem:[%s691_s5 + $0x38] sm:$0xff] %v289_v31 }
 0x1e1   :  { %298 = vst [vmem:[%s691_s5 + $0x30] sm:$0xff] %v284_v33 }

// kernel: char_rnn_forward.2
= control target key start
LH: loop header
LB: loop body
LE: loop exit
PB: predicated region body
PF: predicated region fallthrough
CT: control target
= control target key end

     0   :  { %17 = vsyncpa [#allocation5], 0  ;;  %s6609_s0 = inlined_call_operand.vmem [shape: f32[64,128], index: 0, kind: input, shape index: {}]   ;;  %s6610_s1 = inlined_call_operand.vmem [shape: f32[2,8,128], index: 1, kind: input, shape index: {}]   ;;  %s6611_s2 = inlined_call_operand.vmem [shape: f32[2,8,128], index: 2, kind: input, shape index: {}]   ;;  %s6612_s3 = inlined_call_operand.hbm [shape: f32[128,512], index: 3, kind: input, shape index: {}]   ;;  %s6613_s4 = inlined_call_operand.hbm [shape: f32[128,512], index: 4, kind: input, shape index: {}]   ;;  %s6614_s5 = inlined_call_operand.vmem [shape: f32[1,512], index: 5, kind: input, shape index: {}]   ;;  %s6615_s6 = inlined_call_operand.hbm [shape: f32[128,512], index: 6, kind: input, shape index: {}]   ;;  %s6616_s7 = inlined_call_operand.hbm [shape: f32[128,512], index: 7, kind: input, shape index: {}]   ;;  %s6617_s8 = inlined_call_operand.vmem [shape: f32[1,512], index: 8, kind: input, shape index: {}]   ;;  %s6618_s9 = inlined_call_operand.vmem [shape: f32[64,128], index: 9, kind: output, shape index: {0}]   ;;  %s6619_s10 = inlined_call_operand.vmem [shape: f32[2,8,128], index: 10, kind: output, shape index: {1}]   ;;  %s6620_s11 = inlined_call_operand.vmem [shape: f32[2,8,128], index: 11, kind: output, shape index: {2}]  }
   0x1   :  { %18 = vsyncpa [#allocation7], 0 }
   0x2   :  { %19 = vsyncpa [#allocation10], 0  ;;  %s5490_s17 = smov [#allocation6]   ;;  %s5491_s19 = smov [#allocation4]  }
   0x3   :  { %s43_s18 = sshll.u32 %s5490_s17, 4  ;;  %s31_s20 = sshll.u32 %s5491_s19, 4  ;;  %s44_s18 = int_to_ptr.vmem [resolvable:$true] %s43_s18  ;;  %s5557_s20 = int_to_ptr.vmem [resolvable:$true] %s31_s20 }
   0x4   :  { %s5396_s23 = scalar_lea.hbm %s6613_s4, 8192 }
   0x5   :  { %p5397_p0 = scmp.ne.s32.totalorder %s6613_s4, %s5396_s23  ;;  %p5400_p1 = scmp.lt.u32.totalorder %s5396_s23, %s6613_s4 }
   0x7   :  { %p5402_p2 = pnand %p5400_p1, %p5397_p0 }
   0x9   :  { %5405 = shalt.err (!%p5402_p2)
}
   0xa   :  { %s5406_s28 = scalar_lea.vmem %s44_s18, 8192  ;;  %p5411_p4 = scmp.lt.s32.totalorder %s44_s18, %s44_s18 }
   0xb   :  { %p5407_p3 = scmp.ne.s32.totalorder %s44_s18, %s5406_s28  ;;  %p5412_p5 = scmp.lt.s32.totalorder %s5406_s28, %s5406_s28 }
   0xd   :  { %p5413_p6 = por %p5412_p5, %p5411_p4 }
   0xf   :  { %p5414_p7 = pnand %p5413_p6, %p5407_p3 }
  0x11   :  { %5417 = shalt.err (!%p5414_p7)
}
  0x12   :  { %s5492_s29 = smov 512   ;;  %s5493_s30 = smov 32  }
  0x13   :  { %49 = dma.hbm_to_vmem [thread:$0]  %s6613_s4, 8192, %s44_s18, [#allocation7], %s5492_s29, %s5492_s29, %s5493_s30  }
  0x14   :  { %s5418_s16 = scalar_lea.hbm %s6612_s3, 8192 }
  0x15   :  { %p5419_p8 = scmp.ne.s32.totalorder %s6612_s3, %s5418_s16  ;;  %p5422_p9 = scmp.lt.u32.totalorder %s5418_s16, %s6612_s3 }
  0x17   :  { %p5424_p10 = pnand %p5422_p9, %p5419_p8 }
  0x19   :  { %5427 = shalt.err (!%p5424_p10)
}
  0x1a   :  { %s5428_s23 = scalar_lea.vmem %s5557_s20, 8192  ;;  %p5433_p12 = scmp.lt.s32.totalorder %s5557_s20, %s5557_s20 }
  0x1b   :  { %p5429_p11 = scmp.ne.s32.totalorder %s5557_s20, %s5428_s23  ;;  %p5434_p13 = scmp.lt.s32.totalorder %s5428_s23, %s5428_s23 }
  0x1d   :  { %p5435_p0 = por %p5434_p13, %p5433_p12 }
  0x1f   :  { %p5436_p1 = pnand %p5435_p0, %p5429_p11 }
  0x21   :  { %5439 = shalt.err (!%p5436_p1)
}
  0x22   :  { %37 = dma.hbm_to_vmem [thread:$0]  %s6612_s3, 8192, %s5557_s20, [#allocation5], %s5492_s29, %s5492_s29, %s5493_s30  }
  0x23   :  { %s5494_s24 = smov [#allocation8]   ;;  %s5495_s26 = smov [#allocation9]  }
  0x24   :  { %s57_s25 = sshll.u32 %s5494_s24, 4  ;;  %s69_s27 = sshll.u32 %s5495_s26, 4  ;;  %s58_s25 = int_to_ptr.vmem [resolvable:$true] %s57_s25  ;;  %s5594_s27 = int_to_ptr.vmem [resolvable:$true] %s69_s27 }
  0x25   :  { %s5440_s13 = scalar_lea.hbm %s6615_s6, 8192 }
  0x26   :  { %p5441_p2 = scmp.ne.s32.totalorder %s6615_s6, %s5440_s13  ;;  %p5444_p3 = scmp.lt.u32.totalorder %s5440_s13, %s6615_s6 }
  0x28   :  { %p5446_p4 = pnand %p5444_p3, %p5441_p2 }
  0x2a   :  { %5449 = shalt.err (!%p5446_p4)
}
  0x2b   :  { %s5450_s3 = scalar_lea.vmem %s58_s25, 8192  ;;  %p5455_p6 = scmp.lt.s32.totalorder %s58_s25, %s58_s25 }
  0x2c   :  { %p5451_p5 = scmp.ne.s32.totalorder %s58_s25, %s5450_s3  ;;  %p5456_p7 = scmp.lt.s32.totalorder %s5450_s3, %s5450_s3 }
  0x2e   :  { %p5457_p8 = por %p5456_p7, %p5455_p6 }
  0x30   :  { %p5458_p9 = pnand %p5457_p8, %p5451_p5 }
  0x32   :  { %5461 = shalt.err (!%p5458_p9)
}
  0x33   :  { %63 = dma.hbm_to_vmem [thread:$0]  %s6615_s6, 8192, %s58_s25, [#allocation7], %s5492_s29, %s5492_s29, %s5493_s30  }
  0x34   :  { %s5462_s23 = scalar_lea.hbm %s6616_s7, 8192 }
  0x35   :  { %p5463_p10 = scmp.ne.s32.totalorder %s6616_s7, %s5462_s23  ;;  %p5466_p11 = scmp.lt.u32.totalorder %s5462_s23, %s6616_s7 }
  0x37   :  { %p5468_p12 = pnand %p5466_p11, %p5463_p10 }
  0x39   :  { %5471 = shalt.err (!%p5468_p12)
}
  0x3a   :  { %s5472_s28 = scalar_lea.vmem %s5594_s27, 8192  ;;  %p5477_p0 = scmp.lt.s32.totalorder %s5594_s27, %s5594_s27 }
  0x3b   :  { %p5473_p13 = scmp.ne.s32.totalorder %s5594_s27, %s5472_s28  ;;  %p5478_p1 = scmp.lt.s32.totalorder %s5472_s28, %s5472_s28 }
  0x3d   :  { %p5479_p2 = por %p5478_p1, %p5477_p0 }
  0x3f   :  { %p5480_p3 = pnand %p5479_p2, %p5473_p13 }
  0x41   :  { %5483 = shalt.err (!%p5480_p3)
}
  0x42   :  { %75 = dma.hbm_to_vmem [thread:$0]  %s6616_s7, 8192, %s5594_s27, [#allocation10], %s5492_s29, %s5492_s29, %s5493_s30  }
  0x43   :  { %5484 = dma.done.wait [#allocation5], 8192  }
  0x44   :  { %5485 = vsyncadd [#allocation5], 4294959104 }
  0x45   :  { %5486 = dma.done.wait [#allocation7], 16384  }
  0x46   :  { %5487 = vsyncadd [#allocation7], 4294950912 }
  0x47   :  { %5488 = dma.done.wait [#allocation10], 8192  }
  0x48   :  { %5489 = vsyncadd [#allocation10], 4294959104  ;;  %v5496_v0 = vmov 0.0   ;;  %v91_v1 = vld [vmem:[#allocation4 + $0x8] sm:$0xff]  ;;  %v93_v3 = vld [vmem:[#allocation4 + $0x18] sm:$0xff] }
  0x49   :  { %312 = vmatprep.mubr.f32.mxu0 %v5496_v0  ;;  %425 = vmatprep.mubr.f32.mxu1 %v5496_v0  ;;  %v95_v2 = vld [vmem:[#allocation4 + $0x28] sm:$0xff]  ;;  %v97_v5 = vld [vmem:[#allocation4 + $0x38] sm:$0xff]  ;;  %v90_v6 = vld [vmem:[#allocation4] sm:$0xff] }
  0x4a   :  { %v3853_v4 = vpack.c.bf16 %v95_v2, %v91_v1  ;;  %v94_v7 = vld [vmem:[#allocation4 + $0x20] sm:$0xff]  ;;  %v3885_v8 = vpack.c.bf16 %v97_v5, %v93_v3  ;;  %v92_v10 = vld [vmem:[#allocation4 + $0x10] sm:$0xff]  ;;  %v99_v12 = vld [vmem:[#allocation4 + $0x48] sm:$0xff] }
  0x4b   :  { %v3855_v9 = vpack.c.bf16 %v94_v7, %v90_v6  ;;  %v96_v11 = vld [vmem:[#allocation4 + $0x30] sm:$0xff]  ;;  %v103_v14 = vld [vmem:[#allocation4 + $0x68] sm:$0xff]  ;;  %v101_v15 = vld [vmem:[#allocation4 + $0x58] sm:$0xff] }
  0x4c   :  { %3854 = vmatprep.subr.bf16.mxu0 %v3853_v4  ;;  %v3887_v13 = vpack.c.bf16 %v96_v11, %v92_v10  ;;  %v105_v16 = vld [vmem:[#allocation4 + $0x78] sm:$0xff]  ;;  %3886 = vmatprep.subr.bf16.mxu1 %v3885_v8  ;;  %v3857_v17 = vpack.c.bf16 %v103_v14, %v99_v12  ;;  %v98_v19 = vld [vmem:[#allocation4 + $0x40] sm:$0xff]  ;;  %v100_v21 = vld [vmem:[#allocation4 + $0x50] sm:$0xff] }
  0x4d   :  { %3856 = vmatpush1.bf16.msra.mxu0 %v3855_v9  ;;  %v3889_v18 = vpack.c.bf16 %v105_v16, %v101_v15  ;;  %v102_v20 = vld [vmem:[#allocation4 + $0x60] sm:$0xff]  ;;  %v104_v23 = vld [vmem:[#allocation4 + $0x70] sm:$0xff]  ;;  %v107_v24 = vld [vmem:[#allocation4 + $0x88] sm:$0xff] }
  0x4e   :  { %3888 = vmatpush1.bf16.msra.mxu1 %v3887_v13  ;;  %v3859_v22 = vpack.c.bf16 %v102_v20, %v98_v19  ;;  %v111_v25 = vld [vmem:[#allocation4 + $0xa8] sm:$0xff]  ;;  %3858 = vmatprep.subr.bf16.mxu0 %v3857_v17  ;;  %v3891_v26 = vpack.c.bf16 %v104_v23, %v100_v21  ;;  %v109_v28 = vld [vmem:[#allocation4 + $0x98] sm:$0xff]  ;;  %v106_v30 = vld [vmem:[#allocation4 + $0x80] sm:$0xff] }
  0x4f   :  { %3890 = vmatprep.subr.bf16.mxu1 %v3889_v18  ;;  %v3861_v27 = vpack.c.bf16 %v111_v25, %v107_v24  ;;  %v113_v29 = vld [vmem:[#allocation4 + $0xb8] sm:$0xff]  ;;  %v110_v32 = vld [vmem:[#allocation4 + $0xa0] sm:$0xff]  ;;  %v108_v33 = vld [vmem:[#allocation4 + $0x90] sm:$0xff] }
  0x50   :  { %v3893_v31 = vpack.c.bf16 %v113_v29, %v109_v28  ;;  %v112_v34 = vld [vmem:[#allocation4 + $0xb0] sm:$0xff]  ;;  %v3863_v35 = vpack.c.bf16 %v110_v32, %v106_v30  ;;  %v115_v36 = vld [vmem:[#allocation4 + $0xc8] sm:$0xff]  ;;  %v117_v38 = vld [vmem:[#allocation4 + $0xd8] sm:$0xff] }
  0x51   :  { %3860 = vmatpush1.bf16.msra.mxu0 %v3859_v22  ;;  %v119_v37 = vld [vmem:[#allocation4 + $0xe8] sm:$0xff]  ;;  %v3895_v39 = vpack.c.bf16 %v112_v34, %v108_v33  ;;  %v121_v41 = vld [vmem:[#allocation4 + $0xf8] sm:$0xff]  ;;  %v114_v42 = vld [vmem:[#allocation4 + $0xc0] sm:$0xff] }
  0x52   :  { %3892 = vmatpush1.bf16.msra.mxu1 %v3891_v26  ;;  %3862 = vmatprep.subr.bf16.mxu0 %v3861_v27  ;;  %v3865_v40 = vpack.c.bf16 %v119_v37, %v115_v36  ;;  %v118_v43 = vld [vmem:[#allocation4 + $0xe0] sm:$0xff]  ;;  %v3897_v44 = vpack.c.bf16 %v121_v41, %v117_v38  ;;  %v116_v45 = vld [vmem:[#allocation4 + $0xd0] sm:$0xff]  ;;  %v123_v47 = vld [vmem:[#allocation4 + $0x108] sm:$0xff] }
  0x53   :  { %3894 = vmatprep.subr.bf16.mxu1 %v3893_v31  ;;  %v120_v46 = vld [vmem:[#allocation4 + $0xf0] sm:$0xff]  ;;  %v127_v48 = vld [vmem:[#allocation4 + $0x128] sm:$0xff]  ;;  %v125_v49 = vld [vmem:[#allocation4 + $0x118] sm:$0xff]  ;;  %v3867_v51 = vpack.c.bf16 %v118_v43, %v114_v42 }
  0x54   :  { %v129_v50 = vld [vmem:[#allocation4 + $0x138] sm:$0xff]  ;;  %v3899_v52 = vpack.c.bf16 %v120_v46, %v116_v45  ;;  %v3869_v53 = vpack.c.bf16 %v127_v48, %v123_v47  ;;  %v122_v54 = vld [vmem:[#allocation4 + $0x100] sm:$0xff]  ;;  %v124_v56 = vld [vmem:[#allocation4 + $0x110] sm:$0xff] }
  0x55   :  { %3864 = vmatpush1.bf16.msra.mxu0 %v3863_v35  ;;  %v126_v55 = vld [vmem:[#allocation4 + $0x120] sm:$0xff]  ;;  %v3901_v57 = vpack.c.bf16 %v129_v50, %v125_v49  ;;  %v128_v58 = vld [vmem:[#allocation4 + $0x130] sm:$0xff]  ;;  %v131_v59 = vld [vmem:[#allocation4 + $0x148] sm:$0xff] }
  0x56   :  { %3896 = vmatpush1.bf16.msra.mxu1 %v3895_v39  ;;  %3866 = vmatprep.subr.bf16.mxu0 %v3865_v40  ;;  %v135_v60 = vld [vmem:[#allocation4 + $0x168] sm:$0xff]  ;;  %v133_v61 = vld [vmem:[#allocation4 + $0x158] sm:$0xff]  ;;  %v3871_v63 = vpack.c.bf16 %v126_v55, %v122_v54  ;;  %v3903_v1 = vpack.c.bf16 %v128_v58, %v124_v56  ;;  %v130_v3 = vld [vmem:[#allocation4 + $0x140] sm:$0xff] }
  0x57   :  { %3898 = vmatprep.subr.bf16.mxu1 %v3897_v44  ;;  %v137_v62 = vld [vmem:[#allocation4 + $0x178] sm:$0xff]  ;;  %v3873_v2 = vpack.c.bf16 %v135_v60, %v131_v59  ;;  %v134_v4 = vld [vmem:[#allocation4 + $0x160] sm:$0xff]  ;;  %v132_v5 = vld [vmem:[#allocation4 + $0x150] sm:$0xff] }
  0x58   :  { %v3905_v6 = vpack.c.bf16 %v137_v62, %v133_v61  ;;  %v136_v7 = vld [vmem:[#allocation4 + $0x170] sm:$0xff]  ;;  %v139_v8 = vld [vmem:[#allocation4 + $0x188] sm:$0xff]  ;;  %v141_v10 = vld [vmem:[#allocation4 + $0x198] sm:$0xff]  ;;  %v3875_v12 = vpack.c.bf16 %v134_v4, %v130_v3 }
  0x59   :  { %3868 = vmatpush1.bf16.msra.mxu0 %v3867_v51  ;;  %v143_v9 = vld [vmem:[#allocation4 + $0x1a8] sm:$0xff]  ;;  %v145_v11 = vld [vmem:[#allocation4 + $0x1b8] sm:$0xff]  ;;  %v3907_v13 = vpack.c.bf16 %v136_v7, %v132_v5  ;;  %v138_v15 = vld [vmem:[#allocation4 + $0x180] sm:$0xff] }
  0x5a   :  { %3900 = vmatpush1.bf16.msra.mxu1 %v3899_v52  ;;  %3870 = vmatprep.subr.bf16.mxu0 %v3869_v53  ;;  %v3877_v14 = vpack.c.bf16 %v143_v9, %v139_v8  ;;  %v142_v16 = vld [vmem:[#allocation4 + $0x1a0] sm:$0xff]  ;;  %v140_v17 = vld [vmem:[#allocation4 + $0x190] sm:$0xff]  ;;  %v3909_v18 = vpack.c.bf16 %v145_v11, %v141_v10  ;;  %v147_v20 = vld [vmem:[#allocation4 + $0x1c8] sm:$0xff] }
  0x5b   :  { %3902 = vmatprep.subr.bf16.mxu1 %v3901_v57  ;;  %v144_v19 = vld [vmem:[#allocation4 + $0x1b0] sm:$0xff]  ;;  %v151_v21 = vld [vmem:[#allocation4 + $0x1e8] sm:$0xff]  ;;  %v149_v22 = vld [vmem:[#allocation4 + $0x1d8] sm:$0xff]  ;;  %v3879_v24 = vpack.c.bf16 %v142_v16, %v138_v15 }
  0x5c   :  { %v153_v23 = vld [vmem:[#allocation4 + $0x1f8] sm:$0xff]  ;;  %v3911_v25 = vpack.c.bf16 %v144_v19, %v140_v17  ;;  %v3881_v26 = vpack.c.bf16 %v151_v21, %v147_v20  ;;  %v146_v27 = vld [vmem:[#allocation4 + $0x1c0] sm:$0xff]  ;;  %v148_v29 = vld [vmem:[#allocation4 + $0x1d0] sm:$0xff] }
  0x5d   :  { %3872 = vmatpush1.bf16.msra.mxu0 %v3871_v63  ;;  %v150_v28 = vld [vmem:[#allocation4 + $0x1e0] sm:$0xff]  ;;  %v3913_v30 = vpack.c.bf16 %v153_v23, %v149_v22  ;;  %v152_v31 = vld [vmem:[#allocation4 + $0x1f0] sm:$0xff]  ;;  %v155_v32 = vld [vmem:[#allocation6 + $0x8] sm:$0xff] }
  0x5e   :  { %3904 = vmatpush1.bf16.msra.mxu1 %v3903_v1  ;;  %3874 = vmatprep.subr.bf16.mxu0 %v3873_v2  ;;  %v159_v33 = vld [vmem:[#allocation6 + $0x28] sm:$0xff]  ;;  %v157_v34 = vld [vmem:[#allocation6 + $0x18] sm:$0xff]  ;;  %v3883_v36 = vpack.c.bf16 %v150_v28, %v146_v27  ;;  %v3915_v37 = vpack.c.bf16 %v152_v31, %v148_v29  ;;  %v154_v39 = vld [vmem:[#allocation6] sm:$0xff] }
  0x5f   :  { %3906 = vmatprep.subr.bf16.mxu1 %v3905_v6  ;;  %v161_v35 = vld [vmem:[#allocation6 + $0x38] sm:$0xff]  ;;  %v5633_v38 = vpack.c.bf16 %v159_v33, %v155_v32  ;;  %v158_v40 = vld [vmem:[#allocation6 + $0x20] sm:$0xff]  ;;  %v156_v42 = vld [vmem:[#allocation6 + $0x10] sm:$0xff] }
  0x60   :  { %v5635_v41 = vpack.c.bf16 %v161_v35, %v157_v34  ;;  %v160_v43 = vld [vmem:[#allocation6 + $0x30] sm:$0xff]  ;;  %v163_v44 = vld [vmem:[#allocation6 + $0x48] sm:$0xff]  ;;  %v219_v46 = vld [vmem:[%s6609_s0] sm:$0xff]  ;;  %v5640_v47 = vpack.c.bf16 %v158_v40, %v154_v39 }
  0x61   :  { %3876 = vmatpush1.bf16.msra.mxu0 %v3875_v12  ;;  %v167_v45 = vld [vmem:[#allocation6 + $0x68] sm:$0xff]  ;;  %v165_v48 = vld [vmem:[#allocation6 + $0x58] sm:$0xff]  ;;  %v5643_v50 = vpack.c.bf16 %v160_v43, %v156_v42  ;;  %v162_v51 = vld [vmem:[#allocation6 + $0x40] sm:$0xff] }
  0x62   :  { %3908 = vmatpush1.bf16.msra.mxu1 %v3907_v13  ;;  %3878 = vmatprep.subr.bf16.mxu0 %v3877_v14  ;;  %v169_v49 = vld [vmem:[#allocation6 + $0x78] sm:$0xff]  ;;  %v166_v52 = vld [vmem:[#allocation6 + $0x60] sm:$0xff]  ;;  %v5646_v53 = vpack.c.bf16 %v167_v45, %v163_v44  ;;  %v164_v54 = vld [vmem:[#allocation6 + $0x50] sm:$0xff] }
  0x63   :  { %3910 = vmatprep.subr.bf16.mxu1 %v3909_v18  ;;  %v168_v55 = vld [vmem:[#allocation6 + $0x70] sm:$0xff]  ;;  %v5648_v56 = vpack.c.bf16 %v169_v49, %v165_v48  ;;  %v171_v57 = vld [vmem:[#allocation6 + $0x88] sm:$0xff]  ;;  %v5654_v60 = vpack.c.bf16 %v166_v52, %v162_v51  ;;  %v173_v61 = vld [vmem:[#allocation6 + $0x98] sm:$0xff] }
  0x64   :  { %v175_v58 = vld [vmem:[#allocation6 + $0xa8] sm:$0xff]  ;;  %v177_v62 = vld [vmem:[#allocation6 + $0xb8] sm:$0xff]  ;;  %v5658_v63 = vpack.c.bf16 %v168_v55, %v164_v54  ;;  %v170_v1 = vld [vmem:[#allocation6 + $0x80] sm:$0xff] }
  0x65   :  { %3880 = vmatpush1.bf16.msra.mxu0 %v3879_v24  ;;  %v220_v59 = vld [vmem:[%s6609_s0 + $0x8] sm:$0xff]  ;;  %v174_v2 = vld [vmem:[#allocation6 + $0xa0] sm:$0xff]  ;;  %v5662_v3 = vpack.c.bf16 %v175_v58, %v171_v57  ;;  %v172_v4 = vld [vmem:[#allocation6 + $0x90] sm:$0xff]  ;;  %v5665_v6 = vpack.c.bf16 %v177_v62, %v173_v61 }
  0x66   :  { %3912 = vmatpush1.bf16.msra.mxu1 %v3911_v25  ;;  %3882 = vmatprep.subr.bf16.mxu0 %v3881_v26  ;;  %v176_v5 = vld [vmem:[#allocation6 + $0xb0] sm:$0xff]  ;;  %v179_v7 = vld [vmem:[#allocation6 + $0xc8] sm:$0xff]  ;;  %v5671_v10 = vpack.c.bf16 %v174_v2, %v170_v1  ;;  %v181_v11 = vld [vmem:[#allocation6 + $0xd8] sm:$0xff] }
  0x67   :  { %3914 = vmatprep.subr.bf16.mxu1 %v3913_v30  ;;  %v183_v8 = vld [vmem:[#allocation6 + $0xe8] sm:$0xff]  ;;  %v221_v9 = vld [vmem:[%s6609_s0 + $0x10] sm:$0xff]  ;;  %v185_v12 = vld [vmem:[#allocation6 + $0xf8] sm:$0xff]  ;;  %v5675_v13 = vpack.c.bf16 %v176_v5, %v172_v4 }
  0x68   :  { %v178_v14 = vld [vmem:[#allocation6 + $0xc0] sm:$0xff]  ;;  %v5679_v16 = vpack.c.bf16 %v183_v8, %v179_v7  ;;  %v180_v17 = vld [vmem:[#allocation6 + $0xd0] sm:$0xff]  ;;  %v5682_v19 = vpack.c.bf16 %v185_v12, %v181_v11  ;;  %v187_v20 = vld [vmem:[#allocation6 + $0x108] sm:$0xff] }
  0x69   :  { %3884 = vmatpush1.bf16.msra.mxu0 %v3883_v36  ;;  %v182_v15 = vld [vmem:[#allocation6 + $0xe0] sm:$0xff]  ;;  %v184_v18 = vld [vmem:[#allocation6 + $0xf0] sm:$0xff]  ;;  %v191_v21 = vld [vmem:[#allocation6 + $0x128] sm:$0xff] }
  0x6a   :  { %3916 = vmatpush1.bf16.msra.mxu1 %v3915_v37  ;;  %3918 = vmatprep.subr.bf16.mxu0 %v5633_v38  ;;  %v222_v22 = vld [vmem:[%s6609_s0 + $0x18] sm:$0xff]  ;;  %v5688_v23 = vpack.c.bf16 %v182_v15, %v178_v14  ;;  %v5692_v26 = vpack.c.bf16 %v184_v18, %v180_v17  ;;  %v186_v27 = vld [vmem:[#allocation6 + $0x100] sm:$0xff]  ;;  %v5696_v29 = vpack.c.bf16 %v191_v21, %v187_v20  ;;  %v188_v30 = vld [vmem:[#allocation6 + $0x110] sm:$0xff] }
  0x6b   :  { %3950 = vmatprep.subr.bf16.mxu1 %v5635_v41  ;;  %v189_v24 = vld [vmem:[#allocation6 + $0x118] sm:$0xff]  ;;  %v190_v28 = vld [vmem:[#allocation6 + $0x120] sm:$0xff]  ;;  %v192_v31 = vld [vmem:[#allocation6 + $0x130] sm:$0xff] }
  0x6c   :  { %313 = vmatmul.mubr.f32.vlgmr.msra.gmra.mrb[0].mxu0 %v219_v46  ;;  %v193_v25 = vld [vmem:[#allocation6 + $0x138] sm:$0xff]  ;;  %v195_v33 = vld [vmem:[#allocation6 + $0x148] sm:$0xff]  ;;  %v223_v35 = vld [vmem:[%s6609_s0 + $0x20] sm:$0xff]  ;;  %v5705_v36 = vpack.c.bf16 %v190_v28, %v186_v27  ;;  %v5709_v40 = vpack.c.bf16 %v192_v31, %v188_v30  ;;  %v228_v30 = vlaneseq }
  0x6d   :  { %426 = vmatmul.mubr.f32.vlgmr.msra.gmra.mrb[0].mxu1 %v219_v46  ;;  %3920 = vmatpush1.bf16.msra.mxu0 %v5640_v47  ;;  %v5699_v32 = vpack.c.bf16 %v193_v25, %v189_v24  ;;  %v199_v34 = vld [vmem:[#allocation6 + $0x168] sm:$0xff]  ;;  %v197_v37 = vld [vmem:[#allocation6 + $0x158] sm:$0xff]  ;;  %v194_v42 = vld [vmem:[#allocation6 + $0x140] sm:$0xff] }
  0x6e   :  { %3952 = vmatpush1.bf16.msra.mxu1 %v5643_v50  ;;  %318 = vmatprep.mubr.f32.mxu0 %v5496_v0  ;;  %v201_v39 = vld [vmem:[#allocation6 + $0x178] sm:$0xff]  ;;  %v198_v43 = vld [vmem:[#allocation6 + $0x160] sm:$0xff]  ;;  %v5713_v44 = vpack.c.bf16 %v199_v34, %v195_v33  ;;  %v196_v45 = vld [vmem:[#allocation6 + $0x150] sm:$0xff]  ;;  %v5808_v31 = vshrl.u32 %v228_v30, 7 }
  0x6f   :  { %431 = vmatprep.mubr.f32.mxu1 %v5496_v0  ;;  %3922 = vmatprep.subr.bf16.mxu0 %v5646_v53  ;;  %v200_v46 = vld [vmem:[#allocation6 + $0x170] sm:$0xff]  ;;  %v5716_v48 = vpack.c.bf16 %v201_v39, %v197_v37  ;;  %v203_v49 = vld [vmem:[#allocation6 + $0x188] sm:$0xff]  ;;  %v5722_v54 = vpack.c.bf16 %v198_v43, %v194_v42  ;;  %v205_v55 = vld [vmem:[#allocation6 + $0x198] sm:$0xff] }
  0x70   :  { %319 = vmatmul.mubr.f32.gmra.mrb[2].mxu0 %v220_v59  ;;  %3954 = vmatprep.subr.bf16.mxu1 %v5648_v56  ;;  %v207_v51 = vld [vmem:[#allocation6 + $0x1a8] sm:$0xff]  ;;  %v209_v57 = vld [vmem:[#allocation6 + $0x1b8] sm:$0xff]  ;;  %v5726_v58 = vpack.c.bf16 %v200_v46, %v196_v45  ;;  %v206_v61 = vld [vmem:[#allocation6 + $0x1a0] sm:$0xff]  ;;  %v230_v33 = vsub.s32 0, %v5808_v31  ;;  %v242_v43 = vsub.s32 3, %v5808_v31 }
  0x71   :  { %432 = vmatmul.mubr.f32.gmra.mrb[2].mxu1 %v220_v59  ;;  %3924 = vmatpush1.bf16.msra.mxu0 %v5654_v60  ;;  %v224_v52 = vld [vmem:[%s6609_s0 + $0x28] sm:$0xff]  ;;  %v202_v59 = vld [vmem:[#allocation6 + $0x180] sm:$0xff]  ;;  %v5730_v62 = vpack.c.bf16 %v207_v51, %v203_v49  ;;  %v204_v1 = vld [vmem:[#allocation6 + $0x190] sm:$0xff]  ;;  %v5733_v4 = vpack.c.bf16 %v209_v57, %v205_v55 }
  0x72   :  { %3956 = vmatpush1.bf16.msra.mxu1 %v5658_v63  ;;  %324 = vmatprep.mubr.f32.mxu0 %v5496_v0  ;;  %v208_v2 = vld [vmem:[#allocation6 + $0x1b0] sm:$0xff]  ;;  %v211_v5 = vld [vmem:[#allocation6 + $0x1c8] sm:$0xff]  ;;  %v213_v11 = vld [vmem:[#allocation6 + $0x1d8] sm:$0xff] }
  0x73   :  { %437 = vmatprep.mubr.f32.mxu1 %v5496_v0  ;;  %3926 = vmatprep.subr.bf16.mxu0 %v5662_v3  ;;  %v215_v7 = vld [vmem:[#allocation6 + $0x1e8] sm:$0xff]  ;;  %v225_v8 = vld [vmem:[%s6609_s0 + $0x30] sm:$0xff]  ;;  %v217_v12 = vld [vmem:[#allocation6 + $0x1f8] sm:$0xff]  ;;  %v5743_v14 = vpack.c.bf16 %v208_v2, %v204_v1 }
  0x74   :  { %325 = vmatmul.mubr.f32.gmra.mrb[4].mxu0 %v221_v9  ;;  %3958 = vmatprep.subr.bf16.mxu1 %v5665_v6  ;;  %v210_v15 = vld [vmem:[#allocation6 + $0x1c0] sm:$0xff]  ;;  %v5747_v18 = vpack.c.bf16 %v215_v7, %v211_v5  ;;  %v212_v20 = vld [vmem:[#allocation6 + $0x1d0] sm:$0xff]  ;;  %v226_v24 = vld [vmem:[%s6609_s0 + $0x38] sm:$0xff] }
  0x75   :  { %438 = vmatmul.mubr.f32.gmra.mrb[4].mxu1 %v221_v9  ;;  %3928 = vmatpush1.bf16.msra.mxu0 %v5671_v10  ;;  %v5739_v9 = vpack.c.bf16 %v206_v61, %v202_v59  ;;  %v214_v17 = vld [vmem:[#allocation6 + $0x1e0] sm:$0xff]  ;;  %v216_v21 = vld [vmem:[#allocation6 + $0x1f0] sm:$0xff]  ;;  %v238_v61 = vsub.s32 2, %v5808_v31 }
  0x76   :  { %3960 = vmatpush1.bf16.msra.mxu1 %v5675_v13  ;;  %330 = vmatprep.mubr.f32.mxu0 %v5496_v0  ;;  %v5756_v25 = vpack.c.bf16 %v214_v17, %v210_v15  ;;  %v5760_v27 = vpack.c.bf16 %v216_v21, %v212_v20  ;;  %v506_v28 = vld [vmem:[%s6610_s1] sm:$0xff] }
  0x77   :  { %443 = vmatprep.mubr.f32.mxu1 %v5496_v0  ;;  %3930 = vmatprep.subr.bf16.mxu0 %v5679_v16  ;;  %v218_v34 = vld [vmem:[%s6614_s5] sm:$0xf] }
  0x78   :  { %331 = vmatmul.mubr.f32.gmra.mrb[6].mxu0 %v222_v22  ;;  %3962 = vmatprep.subr.bf16.mxu1 %v5682_v19  ;;  %v5817_v37 = vrot.slane %v218_v34, %v230_v33  ;;  %v5828_v59 = vrot.slane %v218_v34, %v242_v43  ;;  %v5834_v2 = vrot.slane %v218_v34, %v238_v61  ;;  %v507_v21 = vld [vmem:[%s6611_s2] sm:$0xff] }
  0x79   :  { %444 = vmatmul.mubr.f32.gmra.mrb[6].mxu1 %v222_v22  ;;  %3932 = vmatpush1.bf16.msra.mxu0 %v5688_v23  ;;  %v5750_v22 = vpack.c.bf16 %v217_v12, %v213_v11 }
  0x7a   :  { %3964 = vmatpush1.bf16.msra.mxu1 %v5692_v26  ;;  %336 = vmatprep.mubr.f32.mxu0 %v5496_v0 }
  0x7b   :  { %449 = vmatprep.mubr.f32.mxu1 %v5496_v0  ;;  %3934 = vmatprep.subr.bf16.mxu0 %v5696_v29 }
  0x7c   :  { %337 = vmatmul.mubr.f32.gmra.mrb[8].mxu0 %v223_v35  ;;  %3966 = vmatprep.subr.bf16.mxu1 %v5699_v32 }
  0x7d   :  { %450 = vmatmul.mubr.f32.gmra.mrb[8].mxu1 %v223_v35  ;;  %3936 = vmatpush1.bf16.msra.mxu0 %v5705_v36  ;;  %v234_v35 = vsub.s32 1, %v5808_v31 }
  0x7e   :  { %3968 = vmatpush1.bf16.msra.mxu1 %v5709_v40  ;;  %342 = vmatprep.mubr.f32.mxu0 %v5496_v0 }
  0x7f   :  { %455 = vmatprep.mubr.f32.mxu1 %v5496_v0  ;;  %3938 = vmatprep.subr.bf16.mxu0 %v5713_v44  ;;  %v5821_v39 = vrot.slane %v218_v34, %v234_v35 }
  0x80   :  { %343 = vmatmul.mubr.f32.gmra.mrb[10].mxu0 %v224_v52  ;;  %3970 = vmatprep.subr.bf16.mxu1 %v5716_v48 }
  0x81   :  { %456 = vmatmul.mubr.f32.gmra.mrb[10].mxu1 %v224_v52  ;;  %3940 = vmatpush1.bf16.msra.mxu0 %v5722_v54 }
  0x82   :  { %3972 = vmatpush1.bf16.msra.mxu1 %v5726_v58  ;;  %348 = vmatprep.mubr.f32.mxu0 %v5496_v0 }
  0x83   :  { %461 = vmatprep.mubr.f32.mxu1 %v5496_v0  ;;  %3942 = vmatprep.subr.bf16.mxu0 %v5730_v62 }
  0x84   :  { %349 = vmatmul.mubr.f32.gmra.mrb[12].mxu0 %v225_v8  ;;  %3974 = vmatprep.subr.bf16.mxu1 %v5733_v4 }
  0x85   :  { %462 = vmatmul.mubr.f32.gmra.mrb[12].mxu1 %v225_v8  ;;  %3944 = vmatpush1.bf16.msra.mxu0 %v5739_v9 }
  0x86   :  { %3976 = vmatpush1.bf16.msra.mxu1 %v5743_v14  ;;  %354 = vmatprep.mubr.f32.mxu0 %v5496_v0 }
  0x87   :  { %467 = vmatprep.mubr.f32.mxu1 %v5496_v0  ;;  %3946 = vmatprep.subr.bf16.mxu0 %v5747_v18 }
  0x88   :  { %355 = vmatmul.mubr.f32.gmra.mrb[14].mxu0 %v226_v24  ;;  %3978 = vmatprep.subr.bf16.mxu1 %v5750_v22 }
  0x89   :  { %468 = vmatmul.mubr.f32.gmra.mrb[14].mxu1 %v226_v24  ;;  %3948 = vmatpush1.bf16.msra.mxu0 %v5756_v25 }
  0x8a   :  { %3980 = vmatpush1.bf16.msra.mxu1 %v5760_v27  ;;  %579 = vmatprep.mubr.f32.mxu0 %v5496_v0 }
  0x8b   :  { %650 = vmatprep.mubr.f32.mxu1 %v5496_v0  ;;  %3982 = vmatprep.subr.bf16.mxu0 %v5633_v38 }
  0x8c   :  { %580 = vmatmul.mubr.f32.vlgmr.msra.gmra.mrb[0].mxu0 %v506_v28  ;;  %4014 = vmatprep.subr.bf16.mxu1 %v5635_v41 }
  0x8d   :  { %651 = vmatmul.mubr.f32.vlgmr.msra.gmra.mrb[0].mxu1 %v506_v28  ;;  %3984 = vmatpush1.bf16.msra.mxu0 %v5640_v47 }
  0x8e   :  { %4016 = vmatpush1.bf16.msra.mxu1 %v5643_v50  ;;  %3986 = vmatprep.subr.bf16.mxu0 %v5646_v53 }
  0x8f   :  { %4018 = vmatprep.subr.bf16.mxu1 %v5648_v56  ;;  %757 = vmatprep.mubr.f32.mxu0 %v5496_v0 }
  0x90   :  { %828 = vmatprep.mubr.f32.mxu1 %v5496_v0 }
  0x91   :  { %3988 = vmatpush1.bf16.msra.mxu0 %v5654_v60 }
  0x92   :  { %4020 = vmatpush1.bf16.msra.mxu1 %v5658_v63  ;;  %3990 = vmatprep.subr.bf16.mxu0 %v5662_v3 }
  0x93   :  { %4022 = vmatprep.subr.bf16.mxu1 %v5665_v6 }
  0x95   :  { %3992 = vmatpush1.bf16.msra.mxu0 %v5671_v10 }
  0x96   :  { %4024 = vmatpush1.bf16.msra.mxu1 %v5675_v13  ;;  %3994 = vmatprep.subr.bf16.mxu0 %v5679_v16 }
  0x97   :  { %4026 = vmatprep.subr.bf16.mxu1 %v5682_v19 }
  0x99   :  { %3996 = vmatpush1.bf16.msra.mxu0 %v5688_v23 }
  0x9a   :  { %4028 = vmatpush1.bf16.msra.mxu1 %v5692_v26  ;;  %3998 = vmatprep.subr.bf16.mxu0 %v5696_v29 }
  0x9b   :  { %4030 = vmatprep.subr.bf16.mxu1 %v5699_v32 }
  0x9d   :  { %4000 = vmatpush1.bf16.msra.mxu0 %v5705_v36 }
  0x9e   :  { %4032 = vmatpush1.bf16.msra.mxu1 %v5709_v40  ;;  %4002 = vmatprep.subr.bf16.mxu0 %v5713_v44 }
  0x9f   :  { %4034 = vmatprep.subr.bf16.mxu1 %v5716_v48 }
  0xa1   :  { %4004 = vmatpush1.bf16.msra.mxu0 %v5722_v54 }
  0xa2   :  { %4036 = vmatpush1.bf16.msra.mxu1 %v5726_v58  ;;  %4006 = vmatprep.subr.bf16.mxu0 %v5730_v62 }
  0xa3   :  { %4038 = vmatprep.subr.bf16.mxu1 %v5733_v4 }
  0xa5   :  { %4008 = vmatpush1.bf16.msra.mxu0 %v5739_v9 }
  0xa6   :  { %4040 = vmatpush1.bf16.msra.mxu1 %v5743_v14  ;;  %4010 = vmatprep.subr.bf16.mxu0 %v5747_v18 }
  0xa7   :  { %4042 = vmatprep.subr.bf16.mxu1 %v5750_v22 }
  0xa9   :  { %4012 = vmatpush1.bf16.msra.mxu0 %v5756_v25 }
  0xaa   :  { %4044 = vmatpush1.bf16.msra.mxu1 %v5760_v27  ;;  %4046 = vmatprep.subr.bf16.mxu0 %v5633_v38 }
  0xab   :  { %4078 = vmatprep.subr.bf16.mxu1 %v5635_v41 }
 0x15f   :  { %v581_v42 = vpop.f32.mrb[0].mxu0 }
 0x160   :  { %v5005_v45 = vadd.f32 %v581_v42, %v5817_v37  ;;  %v652_v46 = vpop.f32.mrb[0].mxu1  ;;  %v583_v49 = vpop.f32.mrb[1].mxu0 }
 0x161   :  { %v5006_v51 = vadd.f32 %v583_v49, %v5821_v39  ;;  %v654_v52 = vpop.f32.mrb[1].mxu1  ;;  %v5021_v7 = vadd.f32 %v652_v46, %v5834_v2 }
 0x162   :  { %v3794_v55 = vmul.f32 -1.442695, %v5005_v45  ;;  %v5022_v1 = vadd.f32 %v654_v52, %v5828_v59 }
 0x163   :  { %v3795_v57 = vmul.f32 -1.442695, %v5006_v51 }
 0x164   :  { %5140 = vpow2.f32 %v3794_v55  ;;  %v3796_v5 = vmul.f32 -1.442695, %v5022_v1 }
 0x165   :  { %5142 = vpow2.f32 %v3795_v57 }
 0x166   :  { %5144 = vpow2.f32 %v3796_v5 }
 0x167   :  { %5146 = vtanh.f32 %v5021_v7 }
 0x16e   :  { %v5141_v8 = vpop.eup %5140 }
 0x16f   :  { %v5143_v11 = vpop.eup %5142  ;;  %v664_v12 = vadd.f32 1.0, %v5141_v8 }
 0x170   :  { %v670_v15 = vadd.f32 1.0, %v5143_v11  ;;  %v5145_v17 = vpop.eup %5144 }
 0x171   :  { %5148 = vrcp.f32 %v664_v12  ;;  %v5147_v20 = vpop.eup %5146  ;;  %v677_v34 = vadd.f32 1.0, %v5145_v17 }
 0x172   :  { %5150 = vrcp.f32 %v670_v15 }
 0x173   :  { %5152 = vrcp.f32 %v677_v34 }
 0x17b   :  { %v5149_v24 = vpop.eup %5148 }
 0x17c   :  { %v5151_v28 = vpop.eup %5150  ;;  %v681_v30 = vmul.f32 %v5149_v24, %v5147_v20 }
 0x17d   :  { %v680_v42 = vmul.f32 %v5151_v28, %v507_v21  ;;  %v5153_v46 = vpop.eup %5152 }
 0x17f   :  { %v5840_v45 = vadd.f32 %v681_v30, %v680_v42 }
 0x181   :  { %5154 = vtanh.f32 %v5840_v45 }
 0x18b   :  { %v5155_v49 = vpop.eup %5154 }
 0x18c   :  { %v5843_v51 = vmul.f32 %v5155_v49, %v5153_v46 }
 0x18e   :  { %758 = vmatmul.mubr.f32.vlgmr.msra.gmra.mrb[2].mxu0 %v5843_v51  ;;  %829 = vmatmul.mubr.f32.vlgmr.msra.gmra.mrb[2].mxu1 %v5843_v51 }
 0x18f   :  { %4048 = vmatpush1.bf16.msra.mxu0 %v5640_v47  ;;  %4080 = vmatpush1.bf16.msra.mxu1 %v5643_v50 }
 0x190   :  { %4050 = vmatprep.subr.bf16.mxu0 %v5646_v53  ;;  %4082 = vmatprep.subr.bf16.mxu1 %v5648_v56 }
 0x191   :  { %936 = vmatprep.mubr.f32.mxu0 %v5496_v0  ;;  %1007 = vmatprep.mubr.f32.mxu1 %v5496_v0 }
 0x193   :  { %4052 = vmatpush1.bf16.msra.mxu0 %v5654_v60  ;;  %4084 = vmatpush1.bf16.msra.mxu1 %v5658_v63 }
 0x194   :  { %4054 = vmatprep.subr.bf16.mxu0 %v5662_v3  ;;  %4086 = vmatprep.subr.bf16.mxu1 %v5665_v6 }
 0x197   :  { %4056 = vmatpush1.bf16.msra.mxu0 %v5671_v10  ;;  %4088 = vmatpush1.bf16.msra.mxu1 %v5675_v13 }
 0x198   :  { %4058 = vmatprep.subr.bf16.mxu0 %v5679_v16  ;;  %4090 = vmatprep.subr.bf16.mxu1 %v5682_v19 }
 0x19b   :  { %4060 = vmatpush1.bf16.msra.mxu0 %v5688_v23  ;;  %4092 = vmatpush1.bf16.msra.mxu1 %v5692_v26 }
 0x19c   :  { %4062 = vmatprep.subr.bf16.mxu0 %v5696_v29  ;;  %4094 = vmatprep.subr.bf16.mxu1 %v5699_v32 }
 0x19f   :  { %4064 = vmatpush1.bf16.msra.mxu0 %v5705_v36  ;;  %4096 = vmatpush1.bf16.msra.mxu1 %v5709_v40 }
 0x1a0   :  { %4066 = vmatprep.subr.bf16.mxu0 %v5713_v44  ;;  %4098 = vmatprep.subr.bf16.mxu1 %v5716_v48 }
 0x1a3   :  { %4068 = vmatpush1.bf16.msra.mxu0 %v5722_v54  ;;  %4100 = vmatpush1.bf16.msra.mxu1 %v5726_v58 }
 0x1a4   :  { %4070 = vmatprep.subr.bf16.mxu0 %v5730_v62  ;;  %4102 = vmatprep.subr.bf16.mxu1 %v5733_v4 }
 0x1a7   :  { %4072 = vmatpush1.bf16.msra.mxu0 %v5739_v9  ;;  %4104 = vmatpush1.bf16.msra.mxu1 %v5743_v14 }
 0x1a8   :  { %4074 = vmatprep.subr.bf16.mxu0 %v5747_v18  ;;  %4106 = vmatprep.subr.bf16.mxu1 %v5750_v22 }
 0x1ab   :  { %4076 = vmatpush1.bf16.msra.mxu0 %v5756_v25  ;;  %4108 = vmatpush1.bf16.msra.mxu1 %v5760_v27 }
 0x1ac   :  { %4110 = vmatprep.subr.bf16.mxu0 %v5633_v38  ;;  %4142 = vmatprep.subr.bf16.mxu1 %v5635_v41 }
 0x261   :  { %v759_v52 = vpop.f32.mrb[2].mxu0  ;;  %v830_v55 = vpop.f32.mrb[2].mxu1 }
 0x262   :  { %v5007_v57 = vadd.f32 %v759_v52, %v5817_v37  ;;  %v761_v1 = vpop.f32.mrb[3].mxu0  ;;  %v832_v5 = vpop.f32.mrb[3].mxu1  ;;  %v5023_v17 = vadd.f32 %v830_v55, %v5834_v2 }
 0x263   :  { %v5008_v7 = vadd.f32 %v761_v1, %v5821_v39  ;;  %v5024_v12 = vadd.f32 %v832_v5, %v5828_v59 }
 0x264   :  { %v3797_v8 = vmul.f32 -1.442695, %v5007_v57 }
 0x265   :  { %v3798_v11 = vmul.f32 -1.442695, %v5008_v7  ;;  %v3799_v15 = vmul.f32 -1.442695, %v5024_v12 }
 0x266   :  { %5156 = vpow2.f32 %v3797_v8 }
 0x267   :  { %5158 = vpow2.f32 %v3798_v11 }
 0x268   :  { %5160 = vpow2.f32 %v3799_v15 }
 0x269   :  { %5162 = vtanh.f32 %v5023_v17 }
 0x270   :  { %v5157_v20 = vpop.eup %5156 }
 0x271   :  { %v5159_v21 = vpop.eup %5158  ;;  %v842_v24 = vadd.f32 1.0, %v5157_v20 }
 0x272   :  { %v848_v28 = vadd.f32 1.0, %v5159_v21  ;;  %v5161_v30 = vpop.eup %5160 }
 0x273   :  { %5164 = vrcp.f32 %v842_v24  ;;  %v5163_v34 = vpop.eup %5162  ;;  %v855_v52 = vadd.f32 1.0, %v5161_v30 }
 0x274   :  { %5166 = vrcp.f32 %v848_v28 }
 0x275   :  { %5168 = vrcp.f32 %v855_v52 }
 0x27d   :  { %v5165_v42 = vpop.eup %5164 }
 0x27e   :  { %v5167_v46 = vpop.eup %5166  ;;  %v859_v49 = vmul.f32 %v5165_v42, %v5163_v34 }
 0x27f   :  { %v858_v57 = vmul.f32 %v5167_v46, %v5840_v45  ;;  %v5169_v55 = vpop.eup %5168 }
 0x281   :  { %v5886_v1 = vadd.f32 %v859_v49, %v858_v57 }
 0x283   :  { %5170 = vtanh.f32 %v5886_v1 }
 0x28d   :  { %v5171_v5 = vpop.eup %5170 }
 0x28e   :  { %v5889_v7 = vmul.f32 %v5171_v5, %v5169_v55 }
 0x290   :  { %937 = vmatmul.mubr.f32.vlgmr.msra.gmra.mrb[4].mxu0 %v5889_v7  ;;  %1008 = vmatmul.mubr.f32.vlgmr.msra.gmra.mrb[4].mxu1 %v5889_v7 }
 0x291   :  { %4112 = vmatpush1.bf16.msra.mxu0 %v5640_v47  ;;  %4144 = vmatpush1.bf16.msra.mxu1 %v5643_v50 }
 0x292   :  { %4114 = vmatprep.subr.bf16.mxu0 %v5646_v53  ;;  %4146 = vmatprep.subr.bf16.mxu1 %v5648_v56 }
 0x293   :  { %1115 = vmatprep.mubr.f32.mxu0 %v5496_v0  ;;  %1186 = vmatprep.mubr.f32.mxu1 %v5496_v0 }
 0x295   :  { %4116 = vmatpush1.bf16.msra.mxu0 %v5654_v60  ;;  %4148 = vmatpush1.bf16.msra.mxu1 %v5658_v63 }
 0x296   :  { %4118 = vmatprep.subr.bf16.mxu0 %v5662_v3  ;;  %4150 = vmatprep.subr.bf16.mxu1 %v5665_v6 }
 0x299   :  { %4120 = vmatpush1.bf16.msra.mxu0 %v5671_v10  ;;  %4152 = vmatpush1.bf16.msra.mxu1 %v5675_v13 }
 0x29a   :  { %4122 = vmatprep.subr.bf16.mxu0 %v5679_v16  ;;  %4154 = vmatprep.subr.bf16.mxu1 %v5682_v19 }
 0x29d   :  { %4124 = vmatpush1.bf16.msra.mxu0 %v5688_v23  ;;  %4156 = vmatpush1.bf16.msra.mxu1 %v5692_v26 }
 0x29e   :  { %4126 = vmatprep.subr.bf16.mxu0 %v5696_v29  ;;  %4158 = vmatprep.subr.bf16.mxu1 %v5699_v32 }
 0x2a1   :  { %4128 = vmatpush1.bf16.msra.mxu0 %v5705_v36  ;;  %4160 = vmatpush1.bf16.msra.mxu1 %v5709_v40 }
 0x2a2   :  { %4130 = vmatprep.subr.bf16.mxu0 %v5713_v44  ;;  %4162 = vmatprep.subr.bf16.mxu1 %v5716_v48 }
 0x2a5   :  { %4132 = vmatpush1.bf16.msra.mxu0 %v5722_v54  ;;  %4164 = vmatpush1.bf16.msra.mxu1 %v5726_v58 }
 0x2a6   :  { %4134 = vmatprep.subr.bf16.mxu0 %v5730_v62  ;;  %4166 = vmatprep.subr.bf16.mxu1 %v5733_v4 }
 0x2a9   :  { %4136 = vmatpush1.bf16.msra.mxu0 %v5739_v9  ;;  %4168 = vmatpush1.bf16.msra.mxu1 %v5743_v14 }
 0x2aa   :  { %4138 = vmatprep.subr.bf16.mxu0 %v5747_v18  ;;  %4170 = vmatprep.subr.bf16.mxu1 %v5750_v22 }
 0x2ad   :  { %4140 = vmatpush1.bf16.msra.mxu0 %v5756_v25  ;;  %4172 = vmatpush1.bf16.msra.mxu1 %v5760_v27 }
 0x2ae   :  { %4174 = vmatprep.subr.bf16.mxu0 %v5633_v38  ;;  %4206 = vmatprep.subr.bf16.mxu1 %v5635_v41 }
 0x363   :  { %v938_v45 = vpop.f32.mrb[4].mxu0  ;;  %v1009_v8 = vpop.f32.mrb[4].mxu1 }
 0x364   :  { %v5009_v11 = vadd.f32 %v938_v45, %v5817_v37  ;;  %v940_v12 = vpop.f32.mrb[5].mxu0  ;;  %v1011_v15 = vpop.f32.mrb[5].mxu1  ;;  %v5025_v30 = vadd.f32 %v1009_v8, %v5834_v2 }
 0x365   :  { %v5010_v17 = vadd.f32 %v940_v12, %v5821_v39  ;;  %v5026_v24 = vadd.f32 %v1011_v15, %v5828_v59 }
 0x366   :  { %v3800_v20 = vmul.f32 -1.442695, %v5009_v11 }
 0x367   :  { %v3801_v21 = vmul.f32 -1.442695, %v5010_v17  ;;  %v3802_v28 = vmul.f32 -1.442695, %v5026_v24 }
 0x368   :  { %5172 = vpow2.f32 %v3800_v20 }
 0x369   :  { %5174 = vpow2.f32 %v3801_v21 }
 0x36a   :  { %5176 = vpow2.f32 %v3802_v28 }
 0x36b   :  { %5178 = vtanh.f32 %v5025_v30 }
 0x372   :  { %v5173_v34 = vpop.eup %5172 }
 0x373   :  { %v5175_v42 = vpop.eup %5174  ;;  %v1021_v46 = vadd.f32 1.0, %v5173_v34 }
 0x374   :  { %v1027_v49 = vadd.f32 1.0, %v5175_v42  ;;  %v5177_v52 = vpop.eup %5176 }
 0x375   :  { %5180 = vrcp.f32 %v1021_v46  ;;  %v5179_v57 = vpop.eup %5178  ;;  %v1034_v11 = vadd.f32 1.0, %v5177_v52 }
 0x376   :  { %5182 = vrcp.f32 %v1027_v49 }
 0x377   :  { %5184 = vrcp.f32 %v1034_v11 }
 0x37f   :  { %v5181_v55 = vpop.eup %5180 }
 0x380   :  { %v5183_v5 = vpop.eup %5182  ;;  %v1038_v45 = vmul.f32 %v5181_v55, %v5179_v57 }
 0x381   :  { %v1037_v12 = vmul.f32 %v5183_v5, %v5886_v1  ;;  %v5185_v8 = vpop.eup %5184 }
 0x383   :  { %v5932_v15 = vadd.f32 %v1038_v45, %v1037_v12 }
 0x385   :  { %5186 = vtanh.f32 %v5932_v15 }
 0x38f   :  { %v5187_v17 = vpop.eup %5186 }
 0x390   :  { %v5935_v20 = vmul.f32 %v5187_v17, %v5185_v8 }
 0x392   :  { %1116 = vmatmul.mubr.f32.vlgmr.msra.gmra.mrb[6].mxu0 %v5935_v20  ;;  %1187 = vmatmul.mubr.f32.vlgmr.msra.gmra.mrb[6].mxu1 %v5935_v20 }
 0x393   :  { %4176 = vmatpush1.bf16.msra.mxu0 %v5640_v47  ;;  %4208 = vmatpush1.bf16.msra.mxu1 %v5643_v50 }
 0x394   :  { %4178 = vmatprep.subr.bf16.mxu0 %v5646_v53  ;;  %4210 = vmatprep.subr.bf16.mxu1 %v5648_v56 }
 0x395   :  { %1294 = vmatprep.mubr.f32.mxu0 %v5496_v0  ;;  %1365 = vmatprep.mubr.f32.mxu1 %v5496_v0 }
 0x397   :  { %4180 = vmatpush1.bf16.msra.mxu0 %v5654_v60  ;;  %4212 = vmatpush1.bf16.msra.mxu1 %v5658_v63 }
 0x398   :  { %4182 = vmatprep.subr.bf16.mxu0 %v5662_v3  ;;  %4214 = vmatprep.subr.bf16.mxu1 %v5665_v6 }
 0x39b   :  { %4184 = vmatpush1.bf16.msra.mxu0 %v5671_v10  ;;  %4216 = vmatpush1.bf16.msra.mxu1 %v5675_v13 }
 0x39c   :  { %4186 = vmatprep.subr.bf16.mxu0 %v5679_v16  ;;  %4218 = vmatprep.subr.bf16.mxu1 %v5682_v19 }
 0x39f   :  { %4188 = vmatpush1.bf16.msra.mxu0 %v5688_v23  ;;  %4220 = vmatpush1.bf16.msra.mxu1 %v5692_v26 }
 0x3a0   :  { %4190 = vmatprep.subr.bf16.mxu0 %v5696_v29  ;;  %4222 = vmatprep.subr.bf16.mxu1 %v5699_v32 }
 0x3a3   :  { %4192 = vmatpush1.bf16.msra.mxu0 %v5705_v36  ;;  %4224 = vmatpush1.bf16.msra.mxu1 %v5709_v40 }
 0x3a4   :  { %4194 = vmatprep.subr.bf16.mxu0 %v5713_v44  ;;  %4226 = vmatprep.subr.bf16.mxu1 %v5716_v48 }
 0x3a7   :  { %4196 = vmatpush1.bf16.msra.mxu0 %v5722_v54  ;;  %4228 = vmatpush1.bf16.msra.mxu1 %v5726_v58 }
 0x3a8   :  { %4198 = vmatprep.subr.bf16.mxu0 %v5730_v62  ;;  %4230 = vmatprep.subr.bf16.mxu1 %v5733_v4 }
 0x3ab   :  { %4200 = vmatpush1.bf16.msra.mxu0 %v5739_v9  ;;  %4232 = vmatpush1.bf16.msra.mxu1 %v5743_v14 }
 0x3ac   :  { %4202 = vmatprep.subr.bf16.mxu0 %v5747_v18  ;;  %4234 = vmatprep.subr.bf16.mxu1 %v5750_v22 }
 0x3af   :  { %4204 = vmatpush1.bf16.msra.mxu0 %v5756_v25  ;;  %4236 = vmatpush1.bf16.msra.mxu1 %v5760_v27 }
 0x3b0   :  { %4238 = vmatprep.subr.bf16.mxu0 %v5633_v38  ;;  %4270 = vmatprep.subr.bf16.mxu1 %v5635_v41 }
 0x465   :  { %v1117_v1 = vpop.f32.mrb[6].mxu0  ;;  %v1188_v21 = vpop.f32.mrb[6].mxu1 }
 0x466   :  { %v5011_v24 = vadd.f32 %v1117_v1, %v5817_v37  ;;  %v1119_v28 = vpop.f32.mrb[7].mxu0  ;;  %v1190_v30 = vpop.f32.mrb[7].mxu1  ;;  %v5027_v57 = vadd.f32 %v1188_v21, %v5834_v2 }
 0x467   :  { %v5012_v34 = vadd.f32 %v1119_v28, %v5821_v39  ;;  %v5028_v49 = vadd.f32 %v1190_v30, %v5828_v59 }
 0x468   :  { %v3803_v42 = vmul.f32 -1.442695, %v5011_v24 }
 0x469   :  { %v3804_v46 = vmul.f32 -1.442695, %v5012_v34  ;;  %v3805_v52 = vmul.f32 -1.442695, %v5028_v49 }
 0x46a   :  { %5188 = vpow2.f32 %v3803_v42 }
 0x46b   :  { %5190 = vpow2.f32 %v3804_v46 }
 0x46c   :  { %5192 = vpow2.f32 %v3805_v52 }
 0x46d   :  { %5194 = vtanh.f32 %v5027_v57 }
 0x474   :  { %v5189_v55 = vpop.eup %5188 }
 0x475   :  { %v5191_v5 = vpop.eup %5190  ;;  %v1200_v45 = vadd.f32 1.0, %v5189_v55 }
 0x476   :  { %v1206_v11 = vadd.f32 1.0, %v5191_v5  ;;  %v5193_v12 = vpop.eup %5192 }
 0x477   :  { %5196 = vrcp.f32 %v1200_v45  ;;  %v5195_v8 = vpop.eup %5194  ;;  %v1213_v28 = vadd.f32 1.0, %v5193_v12 }
 0x478   :  { %5198 = vrcp.f32 %v1206_v11 }
 0x479   :  { %5200 = vrcp.f32 %v1213_v28 }
 0x481   :  { %v5197_v17 = vpop.eup %5196 }
 0x482   :  { %v5199_v1 = vpop.eup %5198  ;;  %v1217_v24 = vmul.f32 %v5197_v17, %v5195_v8 }
 0x483   :  { %v1216_v34 = vmul.f32 %v5199_v1, %v5932_v15  ;;  %v5201_v21 = vpop.eup %5200 }
 0x485   :  { %v5978_v30 = vadd.f32 %v1217_v24, %v1216_v34 }
 0x487   :  { %5202 = vtanh.f32 %v5978_v30 }
 0x491   :  { %v5203_v42 = vpop.eup %5202 }
 0x492   :  { %v5981_v46 = vmul.f32 %v5203_v42, %v5201_v21 }
 0x494   :  { %1295 = vmatmul.mubr.f32.vlgmr.msra.gmra.mrb[8].mxu0 %v5981_v46  ;;  %1366 = vmatmul.mubr.f32.vlgmr.msra.gmra.mrb[8].mxu1 %v5981_v46 }
 0x495   :  { %4240 = vmatpush1.bf16.msra.mxu0 %v5640_v47  ;;  %4272 = vmatpush1.bf16.msra.mxu1 %v5643_v50 }
 0x496   :  { %4242 = vmatprep.subr.bf16.mxu0 %v5646_v53  ;;  %4274 = vmatprep.subr.bf16.mxu1 %v5648_v56 }
 0x497   :  { %1473 = vmatprep.mubr.f32.mxu0 %v5496_v0  ;;  %1544 = vmatprep.mubr.f32.mxu1 %v5496_v0 }
 0x499   :  { %4244 = vmatpush1.bf16.msra.mxu0 %v5654_v60  ;;  %4276 = vmatpush1.bf16.msra.mxu1 %v5658_v63 }
 0x49a   :  { %4246 = vmatprep.subr.bf16.mxu0 %v5662_v3  ;;  %4278 = vmatprep.subr.bf16.mxu1 %v5665_v6 }
 0x49d   :  { %4248 = vmatpush1.bf16.msra.mxu0 %v5671_v10  ;;  %4280 = vmatpush1.bf16.msra.mxu1 %v5675_v13 }
 0x49e   :  { %4250 = vmatprep.subr.bf16.mxu0 %v5679_v16  ;;  %4282 = vmatprep.subr.bf16.mxu1 %v5682_v19 }
 0x4a1   :  { %4252 = vmatpush1.bf16.msra.mxu0 %v5688_v23  ;;  %4284 = vmatpush1.bf16.msra.mxu1 %v5692_v26 }
 0x4a2   :  { %4254 = vmatprep.subr.bf16.mxu0 %v5696_v29  ;;  %4286 = vmatprep.subr.bf16.mxu1 %v5699_v32 }
 0x4a5   :  { %4256 = vmatpush1.bf16.msra.mxu0 %v5705_v36  ;;  %4288 = vmatpush1.bf16.msra.mxu1 %v5709_v40 }
 0x4a6   :  { %4258 = vmatprep.subr.bf16.mxu0 %v5713_v44  ;;  %4290 = vmatprep.subr.bf16.mxu1 %v5716_v48 }
 0x4a9   :  { %4260 = vmatpush1.bf16.msra.mxu0 %v5722_v54  ;;  %4292 = vmatpush1.bf16.msra.mxu1 %v5726_v58 }
 0x4aa   :  { %4262 = vmatprep.subr.bf16.mxu0 %v5730_v62  ;;  %4294 = vmatprep.subr.bf16.mxu1 %v5733_v4 }
 0x4ad   :  { %4264 = vmatpush1.bf16.msra.mxu0 %v5739_v9  ;;  %4296 = vmatpush1.bf16.msra.mxu1 %v5743_v14 }
 0x4ae   :  { %4266 = vmatprep.subr.bf16.mxu0 %v5747_v18  ;;  %4298 = vmatprep.subr.bf16.mxu1 %v5750_v22 }
 0x4b1   :  { %4268 = vmatpush1.bf16.msra.mxu0 %v5756_v25  ;;  %4300 = vmatpush1.bf16.msra.mxu1 %v5760_v27 }
 0x4b2   :  { %4302 = vmatprep.subr.bf16.mxu0 %v5633_v38  ;;  %4334 = vmatprep.subr.bf16.mxu1 %v5635_v41 }
 0x567   :  { %v1296_v15 = vpop.f32.mrb[8].mxu0  ;;  %v1367_v49 = vpop.f32.mrb[8].mxu1 }
 0x568   :  { %v5013_v52 = vadd.f32 %v1296_v15, %v5817_v37  ;;  %v1298_v57 = vpop.f32.mrb[9].mxu0  ;;  %v1369_v55 = vpop.f32.mrb[9].mxu1  ;;  %v5029_v17 = vadd.f32 %v1367_v49, %v5834_v2 }
 0x569   :  { %v5014_v5 = vadd.f32 %v1298_v57, %v5821_v39  ;;  %v5030_v12 = vadd.f32 %v1369_v55, %v5828_v59 }
 0x56a   :  { %v3806_v45 = vmul.f32 -1.442695, %v5013_v52 }
 0x56b   :  { %v3807_v11 = vmul.f32 -1.442695, %v5014_v5  ;;  %v3808_v8 = vmul.f32 -1.442695, %v5030_v12 }
 0x56c   :  { %5204 = vpow2.f32 %v3806_v45 }
 0x56d   :  { %5206 = vpow2.f32 %v3807_v11 }
 0x56e   :  { %5208 = vpow2.f32 %v3808_v8 }
 0x56f   :  { %5210 = vtanh.f32 %v5029_v17 }
 0x576   :  { %v5205_v1 = vpop.eup %5204 }
 0x577   :  { %v5207_v24 = vpop.eup %5206  ;;  %v1379_v28 = vadd.f32 1.0, %v5205_v1 }
 0x578   :  { %v1385_v34 = vadd.f32 1.0, %v5207_v24  ;;  %v5209_v21 = vpop.eup %5208 }
 0x579   :  { %5212 = vrcp.f32 %v1379_v28  ;;  %v5211_v42 = vpop.eup %5210  ;;  %v1392_v5 = vadd.f32 1.0, %v5209_v21 }
 0x57a   :  { %5214 = vrcp.f32 %v1385_v34 }
 0x57b   :  { %5216 = vrcp.f32 %v1392_v5 }
 0x583   :  { %v5213_v15 = vpop.eup %5212 }
 0x584   :  { %v5215_v52 = vpop.eup %5214  ;;  %v1396_v57 = vmul.f32 %v5213_v15, %v5211_v42 }
 0x585   :  { %v1395_v45 = vmul.f32 %v5215_v52, %v5978_v30  ;;  %v5217_v49 = vpop.eup %5216 }
 0x587   :  { %v6024_v55 = vadd.f32 %v1396_v57, %v1395_v45 }
 0x589   :  { %5218 = vtanh.f32 %v6024_v55 }
 0x593   :  { %v5219_v11 = vpop.eup %5218 }
 0x594   :  { %v6027_v12 = vmul.f32 %v5219_v11, %v5217_v49 }
 0x596   :  { %1474 = vmatmul.mubr.f32.vlgmr.msra.gmra.mrb[10].mxu0 %v6027_v12  ;;  %1545 = vmatmul.mubr.f32.vlgmr.msra.gmra.mrb[10].mxu1 %v6027_v12 }
 0x597   :  { %4304 = vmatpush1.bf16.msra.mxu0 %v5640_v47  ;;  %4336 = vmatpush1.bf16.msra.mxu1 %v5643_v50 }
 0x598   :  { %4306 = vmatprep.subr.bf16.mxu0 %v5646_v53  ;;  %4338 = vmatprep.subr.bf16.mxu1 %v5648_v56 }
 0x599   :  { %1652 = vmatprep.mubr.f32.mxu0 %v5496_v0  ;;  %1723 = vmatprep.mubr.f32.mxu1 %v5496_v0 }
 0x59b   :  { %4308 = vmatpush1.bf16.msra.mxu0 %v5654_v60  ;;  %4340 = vmatpush1.bf16.msra.mxu1 %v5658_v63 }
 0x59c   :  { %4310 = vmatprep.subr.bf16.mxu0 %v5662_v3  ;;  %4342 = vmatprep.subr.bf16.mxu1 %v5665_v6 }
 0x59f   :  { %4312 = vmatpush1.bf16.msra.mxu0 %v5671_v10  ;;  %4344 = vmatpush1.bf16.msra.mxu1 %v5675_v13 }
 0x5a0   :  { %4314 = vmatprep.subr.bf16.mxu0 %v5679_v16  ;;  %4346 = vmatprep.subr.bf16.mxu1 %v5682_v19 }
 0x5a3   :  { %4316 = vmatpush1.bf16.msra.mxu0 %v5688_v23  ;;  %4348 = vmatpush1.bf16.msra.mxu1 %v5692_v26 }
 0x5a4   :  { %4318 = vmatprep.subr.bf16.mxu0 %v5696_v29  ;;  %4350 = vmatprep.subr.bf16.mxu1 %v5699_v32 }
 0x5a7   :  { %4320 = vmatpush1.bf16.msra.mxu0 %v5705_v36  ;;  %4352 = vmatpush1.bf16.msra.mxu1 %v5709_v40 }
 0x5a8   :  { %4322 = vmatprep.subr.bf16.mxu0 %v5713_v44  ;;  %4354 = vmatprep.subr.bf16.mxu1 %v5716_v48 }
 0x5ab   :  { %4324 = vmatpush1.bf16.msra.mxu0 %v5722_v54  ;;  %4356 = vmatpush1.bf16.msra.mxu1 %v5726_v58 }
 0x5ac   :  { %4326 = vmatprep.subr.bf16.mxu0 %v5730_v62  ;;  %4358 = vmatprep.subr.bf16.mxu1 %v5733_v4 }
 0x5af   :  { %4328 = vmatpush1.bf16.msra.mxu0 %v5739_v9  ;;  %4360 = vmatpush1.bf16.msra.mxu1 %v5743_v14 }
 0x5b0   :  { %4330 = vmatprep.subr.bf16.mxu0 %v5747_v18  ;;  %4362 = vmatprep.subr.bf16.mxu1 %v5750_v22 }
 0x5b3   :  { %4332 = vmatpush1.bf16.msra.mxu0 %v5756_v25  ;;  %4364 = vmatpush1.bf16.msra.mxu1 %v5760_v27 }
 0x5b4   :  { %4366 = vmatprep.subr.bf16.mxu0 %v5633_v38  ;;  %4398 = vmatprep.subr.bf16.mxu1 %v5635_v41 }
 0x669   :  { %v1475_v30 = vpop.f32.mrb[10].mxu0  ;;  %v1546_v8 = vpop.f32.mrb[10].mxu1 }
 0x66a   :  { %v5015_v17 = vadd.f32 %v1475_v30, %v5817_v37  ;;  %v1477_v1 = vpop.f32.mrb[11].mxu0  ;;  %v1548_v24 = vpop.f32.mrb[11].mxu1  ;;  %v5031_v52 = vadd.f32 %v1546_v8, %v5834_v2 }
 0x66b   :  { %v5016_v28 = vadd.f32 %v1477_v1, %v5821_v39  ;;  %v5032_v42 = vadd.f32 %v1548_v24, %v5828_v59 }
 0x66c   :  { %v3809_v34 = vmul.f32 -1.442695, %v5015_v17 }
 0x66d   :  { %v3810_v21 = vmul.f32 -1.442695, %v5016_v28  ;;  %v3811_v15 = vmul.f32 -1.442695, %v5032_v42  ;;  %v1943_v42 = vld [vmem:[#allocation8 + $0x10] sm:$0xff] }
 0x66e   :  { %5220 = vpow2.f32 %v3809_v34 }
 0x66f   :  { %5222 = vpow2.f32 %v3810_v21 }
 0x670   :  { %5224 = vpow2.f32 %v3811_v15  ;;  %v1947_v15 = vld [vmem:[#allocation8 + $0x30] sm:$0xff] }
 0x671   :  { %5226 = vtanh.f32 %v5031_v52  ;;  %v1950_v52 = vld [vmem:[#allocation8 + $0x48] sm:$0xff] }
 0x678   :  { %v5221_v38 = vpop.eup %5220 }
 0x679   :  { %v5223_v57 = vpop.eup %5222  ;;  %v1558_v41 = vadd.f32 1.0, %v5221_v38  ;;  %v1954_v38 = vld [vmem:[#allocation8 + $0x68] sm:$0xff] }
 0x67a   :  { %v1564_v5 = vadd.f32 1.0, %v5223_v57  ;;  %v5225_v45 = vpop.eup %5224  ;;  %v1952_v57 = vld [vmem:[#allocation8 + $0x58] sm:$0xff] }
 0x67b   :  { %5228 = vrcp.f32 %v1558_v41  ;;  %v5227_v49 = vpop.eup %5226  ;;  %v1571_v1 = vadd.f32 1.0, %v5225_v45  ;;  %v1956_v41 = vld [vmem:[#allocation8 + $0x78] sm:$0xff] }
 0x67c   :  { %5230 = vrcp.f32 %v1564_v5 }
 0x67d   :  { %5232 = vrcp.f32 %v1571_v1 }
 0x685   :  { %v5229_v11 = vpop.eup %5228 }
 0x686   :  { %v5231_v30 = vpop.eup %5230  ;;  %v1575_v17 = vmul.f32 %v5229_v11, %v5227_v49  ;;  %v4463_v11 = vpack.c.bf16 %v1947_v15, %v1943_v42  ;;  %v1973_v42 = vld [vmem:[#allocation8 + $0x100] sm:$0xff] }
 0x687   :  { %v1574_v28 = vmul.f32 %v5231_v30, %v6024_v55  ;;  %v5233_v8 = vpop.eup %5232  ;;  %v1945_v55 = vld [vmem:[#allocation8 + $0x20] sm:$0xff] }
 0x688   :  { %v1949_v30 = vld [vmem:[#allocation8 + $0x40] sm:$0xff] }
 0x689   :  { %v6070_v24 = vadd.f32 %v1575_v17, %v1574_v28  ;;  %v1953_v17 = vld [vmem:[#allocation8 + $0x60] sm:$0xff]  ;;  %v4433_v28 = vpack.c.bf16 %v1954_v38, %v1950_v52 }
 0x68a   :  { %v1977_v15 = vld [vmem:[#allocation8 + $0x120] sm:$0xff] }
 0x68b   :  { %5234 = vtanh.f32 %v6070_v24 }
 0x695   :  { %v5235_v34 = vpop.eup %5234 }
 0x696   :  { %v6073_v21 = vmul.f32 %v5235_v34, %v5233_v8  ;;  %v1951_v8 = vld [vmem:[#allocation8 + $0x50] sm:$0xff] }
 0x697   :  { %v1955_v34 = vld [vmem:[#allocation8 + $0x70] sm:$0xff] }
 0x698   :  { %1653 = vmatmul.mubr.f32.vlgmr.msra.gmra.mrb[12].mxu0 %v6073_v21  ;;  %1724 = vmatmul.mubr.f32.vlgmr.msra.gmra.mrb[12].mxu1 %v6073_v21 }
 0x699   :  { %4368 = vmatpush1.bf16.msra.mxu0 %v5640_v47  ;;  %4400 = vmatpush1.bf16.msra.mxu1 %v5643_v50  ;;  %v1942_v47 = vld [vmem:[#allocation8 + $0x8] sm:$0xff] }
 0x69a   :  { %4370 = vmatprep.subr.bf16.mxu0 %v5646_v53  ;;  %4402 = vmatprep.subr.bf16.mxu1 %v5648_v56  ;;  %v1946_v50 = vld [vmem:[#allocation8 + $0x28] sm:$0xff]  ;;  %v1944_v53 = vld [vmem:[#allocation8 + $0x18] sm:$0xff] }
 0x69b   :  { %1831 = vmatprep.mubr.f32.mxu0 %v5496_v0  ;;  %1902 = vmatprep.mubr.f32.mxu1 %v5496_v0  ;;  %v4429_v56 = vpack.c.bf16 %v1946_v50, %v1942_v47  ;;  %v1958_v47 = vld [vmem:[#allocation8 + $0x88] sm:$0xff] }
 0x69c   :  { %v1962_v50 = vld [vmem:[#allocation8 + $0xa8] sm:$0xff] }
 0x69d   :  { %4372 = vmatpush1.bf16.msra.mxu0 %v5654_v60  ;;  %4404 = vmatpush1.bf16.msra.mxu1 %v5658_v63  ;;  %v1948_v60 = vld [vmem:[#allocation8 + $0x38] sm:$0xff] }
 0x69e   :  { %4374 = vmatprep.subr.bf16.mxu0 %v5662_v3  ;;  %4406 = vmatprep.subr.bf16.mxu1 %v5665_v6  ;;  %v4461_v63 = vpack.c.bf16 %v1948_v60, %v1944_v53  ;;  %v1960_v53 = vld [vmem:[#allocation8 + $0x98] sm:$0xff]  ;;  %v4435_v60 = vpack.c.bf16 %v1953_v17, %v1949_v30  ;;  %v4447_v30 = vpack.c.bf16 %v1977_v15, %v1973_v42  ;;  %v2007_v15 = vld [vmem:[#allocation9 + $0x10] sm:$0xff] }
 0x6a1   :  { %4376 = vmatpush1.bf16.msra.mxu0 %v5671_v10  ;;  %4408 = vmatpush1.bf16.msra.mxu1 %v5675_v13 }
 0x6a2   :  { %4378 = vmatprep.subr.bf16.mxu0 %v5679_v16  ;;  %4410 = vmatprep.subr.bf16.mxu1 %v5682_v19 }
 0x6a5   :  { %4380 = vmatpush1.bf16.msra.mxu0 %v5688_v23  ;;  %4412 = vmatpush1.bf16.msra.mxu1 %v5692_v26 }
 0x6a6   :  { %4382 = vmatprep.subr.bf16.mxu0 %v5696_v29  ;;  %4414 = vmatprep.subr.bf16.mxu1 %v5699_v32 }
 0x6a9   :  { %4384 = vmatpush1.bf16.msra.mxu0 %v5705_v36  ;;  %4416 = vmatpush1.bf16.msra.mxu1 %v5709_v40 }
 0x6aa   :  { %4386 = vmatprep.subr.bf16.mxu0 %v5713_v44  ;;  %4418 = vmatprep.subr.bf16.mxu1 %v5716_v48 }
 0x6ad   :  { %4388 = vmatpush1.bf16.msra.mxu0 %v5722_v54  ;;  %4420 = vmatpush1.bf16.msra.mxu1 %v5726_v58 }
 0x6ae   :  { %4390 = vmatprep.subr.bf16.mxu0 %v5730_v62  ;;  %4422 = vmatprep.subr.bf16.mxu1 %v5733_v4 }
 0x6b1   :  { %4392 = vmatpush1.bf16.msra.mxu0 %v5739_v9  ;;  %4424 = vmatpush1.bf16.msra.mxu1 %v5743_v14 }
 0x6b2   :  { %4394 = vmatprep.subr.bf16.mxu0 %v5747_v18  ;;  %4426 = vmatprep.subr.bf16.mxu1 %v5750_v22 }
 0x6b5   :  { %4396 = vmatpush1.bf16.msra.mxu0 %v5756_v25  ;;  %4428 = vmatpush1.bf16.msra.mxu1 %v5760_v27  ;;  %v1941_v27 = vld [vmem:[#allocation8] sm:$0xff] }
 0x6b6   :  { %4430 = vmatprep.subr.bf16.mxu0 %v4429_v56  ;;  %4462 = vmatprep.subr.bf16.mxu1 %v4461_v63  ;;  %v4431_v49 = vpack.c.bf16 %v1945_v55, %v1941_v27  ;;  %v1964_v56 = vld [vmem:[#allocation8 + $0xb8] sm:$0xff]  ;;  %v4467_v63 = vpack.c.bf16 %v1955_v34, %v1951_v8 }
 0x76b   :  { %v1654_v3 = vpop.f32.mrb[12].mxu0  ;;  %v1725_v6 = vpop.f32.mrb[12].mxu1 }
 0x76c   :  { %v5017_v10 = vadd.f32 %v1654_v3, %v5817_v37  ;;  %v1656_v13 = vpop.f32.mrb[13].mxu0  ;;  %v1727_v16 = vpop.f32.mrb[13].mxu1  ;;  %v5033_v36 = vadd.f32 %v1725_v6, %v5834_v2  ;;  %v1957_v3 = vld [vmem:[#allocation8 + $0x80] sm:$0xff] }
 0x76d   :  { %v5018_v19 = vadd.f32 %v1656_v13, %v5821_v39  ;;  %v5034_v29 = vadd.f32 %v1727_v16, %v5828_v59  ;;  %v1961_v6 = vld [vmem:[#allocation8 + $0xa0] sm:$0xff]  ;;  %v4469_v13 = vpack.c.bf16 %v1964_v56, %v1960_v53  ;;  %v1959_v16 = vld [vmem:[#allocation8 + $0x90] sm:$0xff]  ;;  %v1990_v53 = vld [vmem:[#allocation8 + $0x188] sm:$0xff] }
 0x76e   :  { %v3812_v23 = vmul.f32 -1.442695, %v5017_v10  ;;  %v4437_v10 = vpack.c.bf16 %v1962_v50, %v1958_v47  ;;  %v1983_v47 = vld [vmem:[#allocation8 + $0x150] sm:$0xff]  ;;  %v1994_v56 = vld [vmem:[#allocation8 + $0x1a8] sm:$0xff] }
 0x76f   :  { %v3813_v26 = vmul.f32 -1.442695, %v5018_v19  ;;  %v3814_v32 = vmul.f32 -1.442695, %v5034_v29  ;;  %v1963_v19 = vld [vmem:[#allocation8 + $0xb0] sm:$0xff]  ;;  %v1968_v29 = vld [vmem:[#allocation8 + $0xd8] sm:$0xff] }
 0x770   :  { %5236 = vpow2.f32 %v3812_v23  ;;  %v1966_v23 = vld [vmem:[#allocation8 + $0xc8] sm:$0xff]  ;;  %v1987_v50 = vld [vmem:[#allocation8 + $0x170] sm:$0xff] }
 0x771   :  { %5238 = vpow2.f32 %v3813_v26  ;;  %v1970_v26 = vld [vmem:[#allocation8 + $0xe8] sm:$0xff] }
 0x772   :  { %5240 = vpow2.f32 %v3814_v32  ;;  %v1972_v32 = vld [vmem:[#allocation8 + $0xf8] sm:$0xff] }
 0x773   :  { %5242 = vtanh.f32 %v5033_v36  ;;  %v4439_v36 = vpack.c.bf16 %v1961_v6, %v1957_v3  ;;  %v4483_v6 = vpack.c.bf16 %v1987_v50, %v1983_v47  ;;  %v2026_v47 = vld [vmem:[#allocation9 + $0xa8] sm:$0xff]  ;;  %v2024_v50 = vld [vmem:[#allocation9 + $0x98] sm:$0xff] }
 0x77a   :  { %v5237_v40 = vpop.eup %5236 }
 0x77b   :  { %v5239_v44 = vpop.eup %5238  ;;  %v1737_v48 = vadd.f32 1.0, %v5237_v40  ;;  %v4471_v40 = vpack.c.bf16 %v1963_v19, %v1959_v16  ;;  %v4453_v16 = vpack.c.bf16 %v1994_v56, %v1990_v53  ;;  %v2028_v56 = vld [vmem:[#allocation9 + $0xb8] sm:$0xff] }
 0x77c   :  { %v1743_v54 = vadd.f32 1.0, %v5239_v44  ;;  %v5241_v58 = vpop.eup %5240  ;;  %v1965_v44 = vld [vmem:[#allocation8 + $0xc0] sm:$0xff] }
 0x77d   :  { %5244 = vrcp.f32 %v1737_v48  ;;  %v5243_v62 = vpop.eup %5242  ;;  %v1750_v18 = vadd.f32 1.0, %v5241_v58  ;;  %v1969_v48 = vld [vmem:[#allocation8 + $0xe0] sm:$0xff]  ;;  %v4473_v58 = vpack.c.bf16 %v1972_v32, %v1968_v29  ;;  %v1998_v29 = vld [vmem:[#allocation8 + $0x1c8] sm:$0xff] }
 0x77e   :  { %5246 = vrcp.f32 %v1743_v54  ;;  %v4441_v54 = vpack.c.bf16 %v1970_v26, %v1966_v23  ;;  %v4443_v27 = vpack.c.bf16 %v1969_v48, %v1965_v44  ;;  %v1991_v23 = vld [vmem:[#allocation8 + $0x190] sm:$0xff]  ;;  %v2002_v32 = vld [vmem:[#allocation8 + $0x1e8] sm:$0xff] }
 0x77f   :  { %5248 = vrcp.f32 %v1750_v18  ;;  %v1976_v18 = vld [vmem:[#allocation8 + $0x118] sm:$0xff]  ;;  %v1995_v26 = vld [vmem:[#allocation8 + $0x1b0] sm:$0xff] }
 0x780   :  { %v4487_v48 = vpack.c.bf16 %v1995_v26, %v1991_v23  ;;  %v2034_v23 = vld [vmem:[#allocation9 + $0xe8] sm:$0xff]  ;;  %v2032_v26 = vld [vmem:[#allocation9 + $0xd8] sm:$0xff] }
 0x787   :  { %v5245_v4 = vpop.eup %5244 }
 0x788   :  { %v5247_v9 = vpop.eup %5246  ;;  %v1754_v14 = vmul.f32 %v5245_v4, %v5243_v62  ;;  %v1967_v62 = vld [vmem:[#allocation8 + $0xd0] sm:$0xff] }
 0x789   :  { %v1753_v22 = vmul.f32 %v5247_v9, %v6070_v24  ;;  %v5249_v5 = vpop.eup %5248  ;;  %v4465_v24 = vpack.c.bf16 %v1956_v41, %v1952_v57  ;;  %v1971_v4 = vld [vmem:[#allocation8 + $0xf0] sm:$0xff]  ;;  %v1974_v9 = vld [vmem:[#allocation8 + $0x108] sm:$0xff] }
 0x78a   :  { %v4475_v55 = vpack.c.bf16 %v1971_v4, %v1967_v62  ;;  %v1975_v57 = vld [vmem:[#allocation8 + $0x110] sm:$0xff]  ;;  %v2001_v4 = vld [vmem:[#allocation8 + $0x1e0] sm:$0xff] }
 0x78b   :  { %v6114_v25 = vadd.f32 %v1754_v14, %v1753_v22  ;;  %v1978_v14 = vld [vmem:[#allocation8 + $0x128] sm:$0xff]  ;;  %v1980_v22 = vld [vmem:[#allocation8 + $0x138] sm:$0xff]  ;;  %v1979_v41 = vld [vmem:[#allocation8 + $0x130] sm:$0xff] }
 0x78c   :  { %v4445_v52 = vpack.c.bf16 %v1978_v14, %v1974_v9  ;;  %v4477_v38 = vpack.c.bf16 %v1980_v22, %v1976_v18  ;;  %v4479_v17 = vpack.c.bf16 %v1979_v41, %v1975_v57  ;;  %v1999_v9 = vld [vmem:[#allocation8 + $0x1d0] sm:$0xff]  ;;  %v2018_v57 = vld [vmem:[#allocation9 + $0x68] sm:$0xff]  ;;  %v2016_v41 = vld [vmem:[#allocation9 + $0x58] sm:$0xff] }
 0x78d   :  { %5250 = vtanh.f32 %v6114_v25  ;;  %v2003_v14 = vld [vmem:[#allocation8 + $0x1f0] sm:$0xff] }
 0x78e   :  { %v4491_v22 = vpack.c.bf16 %v2003_v14, %v1999_v9  ;;  %v2042_v9 = vld [vmem:[#allocation9 + $0x128] sm:$0xff]  ;;  %v2040_v14 = vld [vmem:[#allocation9 + $0x118] sm:$0xff] }
 0x797   :  { %v5251_v45 = vpop.eup %5250 }
 0x798   :  { %v6117_v1 = vmul.f32 %v5251_v45, %v5249_v5  ;;  %v1982_v5 = vld [vmem:[#allocation8 + $0x148] sm:$0xff] }
 0x799   :  { %v1986_v45 = vld [vmem:[#allocation8 + $0x168] sm:$0xff] }
 0x79a   :  { %1832 = vmatmul.mubr.f32.vlgmr.msra.gmra.mrb[14].mxu0 %v6117_v1  ;;  %1903 = vmatmul.mubr.f32.vlgmr.msra.gmra.mrb[14].mxu1 %v6117_v1  ;;  %v4449_v8 = vpack.c.bf16 %v1986_v45, %v1982_v5  ;;  %v2020_v45 = vld [vmem:[#allocation9 + $0x78] sm:$0xff] }
 0x79b   :  { %4432 = vmatpush1.bf16.msra.mxu0 %v4431_v49  ;;  %4464 = vmatpush1.bf16.msra.mxu1 %v4463_v11  ;;  %v1984_v49 = vld [vmem:[#allocation8 + $0x158] sm:$0xff] }
 0x79c   :  { %4434 = vmatprep.subr.bf16.mxu0 %v4433_v28  ;;  %4466 = vmatprep.subr.bf16.mxu1 %v4465_v24  ;;  %v1988_v11 = vld [vmem:[#allocation8 + $0x178] sm:$0xff]  ;;  %v1981_v28 = vld [vmem:[#allocation8 + $0x140] sm:$0xff] }
 0x79d   :  { %2163 = vmatprep.mubr.f32.mxu0 %v5496_v0  ;;  %2276 = vmatprep.mubr.f32.mxu1 %v5496_v0  ;;  %v1985_v24 = vld [vmem:[#allocation8 + $0x160] sm:$0xff]  ;;  %v4481_v34 = vpack.c.bf16 %v1988_v11, %v1984_v49 }
 0x79e   :  { %v4451_v3 = vpack.c.bf16 %v1985_v24, %v1981_v28  ;;  %v2013_v49 = vld [vmem:[#allocation9 + $0x40] sm:$0xff]  ;;  %v2015_v28 = vld [vmem:[#allocation9 + $0x50] sm:$0xff] }
 0x79f   :  { %4436 = vmatpush1.bf16.msra.mxu0 %v4435_v60  ;;  %4468 = vmatpush1.bf16.msra.mxu1 %v4467_v63  ;;  %v1992_v60 = vld [vmem:[#allocation8 + $0x198] sm:$0xff]  ;;  %v2017_v11 = vld [vmem:[#allocation9 + $0x60] sm:$0xff]  ;;  %v2019_v24 = vld [vmem:[#allocation9 + $0x70] sm:$0xff] }
 0x7a0   :  { %4438 = vmatprep.subr.bf16.mxu0 %v4437_v10  ;;  %4470 = vmatprep.subr.bf16.mxu1 %v4469_v13  ;;  %v1996_v63 = vld [vmem:[#allocation8 + $0x1b8] sm:$0xff]  ;;  %v1989_v10 = vld [vmem:[#allocation8 + $0x180] sm:$0xff] }
 0x7a1   :  { %v1993_v13 = vld [vmem:[#allocation8 + $0x1a0] sm:$0xff]  ;;  %v4485_v19 = vpack.c.bf16 %v1996_v63, %v1992_v60 }
 0x7a2   :  { %v4455_v44 = vpack.c.bf16 %v1993_v13, %v1989_v10  ;;  %v2021_v60 = vld [vmem:[#allocation9 + $0x80] sm:$0xff]  ;;  %v2023_v10 = vld [vmem:[#allocation9 + $0x90] sm:$0xff] }
 0x7a3   :  { %4440 = vmatpush1.bf16.msra.mxu0 %v4439_v36  ;;  %4472 = vmatpush1.bf16.msra.mxu1 %v4471_v40  ;;  %v2000_v36 = vld [vmem:[#allocation8 + $0x1d8] sm:$0xff]  ;;  %v2025_v63 = vld [vmem:[#allocation9 + $0xa0] sm:$0xff]  ;;  %v2027_v13 = vld [vmem:[#allocation9 + $0xb0] sm:$0xff] }
 0x7a4   :  { %4442 = vmatprep.subr.bf16.mxu0 %v4441_v54  ;;  %4474 = vmatprep.subr.bf16.mxu1 %v4473_v58  ;;  %v2004_v40 = vld [vmem:[#allocation8 + $0x1f8] sm:$0xff]  ;;  %v1997_v54 = vld [vmem:[#allocation8 + $0x1c0] sm:$0xff]  ;;  %v4457_v58 = vpack.c.bf16 %v2002_v32, %v1998_v29 }
 0x7a5   :  { %v4489_v62 = vpack.c.bf16 %v2004_v40, %v2000_v36  ;;  %v4459_v18 = vpack.c.bf16 %v2001_v4, %v1997_v54  ;;  %v2036_v32 = vld [vmem:[#allocation9 + $0xf8] sm:$0xff]  ;;  %v2029_v36 = vld [vmem:[#allocation9 + $0xc0] sm:$0xff]  ;;  %v2031_v54 = vld [vmem:[#allocation9 + $0xd0] sm:$0xff] }
 0x7a6   :  { %v2033_v40 = vld [vmem:[#allocation9 + $0xe0] sm:$0xff] }
 0x7a7   :  { %4444 = vmatpush1.bf16.msra.mxu0 %v4443_v27  ;;  %4476 = vmatpush1.bf16.msra.mxu1 %v4475_v55  ;;  %v2005_v27 = vld [vmem:[#allocation9] sm:$0xff] }
 0x7a8   :  { %4446 = vmatprep.subr.bf16.mxu0 %v4445_v52  ;;  %4478 = vmatprep.subr.bf16.mxu1 %v4477_v38  ;;  %v2011_v52 = vld [vmem:[#allocation9 + $0x30] sm:$0xff]  ;;  %v2014_v38 = vld [vmem:[#allocation9 + $0x48] sm:$0xff] }
 0x7a9   :  { %v6163_v5 = vpack.c.bf16 %v2018_v57, %v2014_v38 }
 0x7ab   :  { %4448 = vmatpush1.bf16.msra.mxu0 %v4447_v30  ;;  %4480 = vmatpush1.bf16.msra.mxu1 %v4479_v17  ;;  %v6165_v30 = vpack.c.bf16 %v2020_v45, %v2016_v41  ;;  %v6167_v17 = vpack.c.bf16 %v2017_v11, %v2013_v49  ;;  %v2048_v41 = vld [vmem:[#allocation9 + $0x158] sm:$0xff]  ;;  %v2045_v49 = vld [vmem:[#allocation9 + $0x140] sm:$0xff] }
 0x7ac   :  { %4450 = vmatprep.subr.bf16.mxu0 %v4449_v8  ;;  %4482 = vmatprep.subr.bf16.mxu1 %v4481_v34  ;;  %v6170_v8 = vpack.c.bf16 %v2019_v24, %v2015_v28  ;;  %v2022_v34 = vld [vmem:[#allocation9 + $0x88] sm:$0xff]  ;;  %v2052_v45 = vld [vmem:[#allocation9 + $0x178] sm:$0xff]  ;;  %v2049_v28 = vld [vmem:[#allocation9 + $0x160] sm:$0xff] }
 0x7ad   :  { %v6175_v53 = vpack.c.bf16 %v2026_v47, %v2022_v34  ;;  %v6211_v11 = vpack.c.bf16 %v2052_v45, %v2048_v41  ;;  %v2047_v24 = vld [vmem:[#allocation9 + $0x150] sm:$0xff]  ;;  %v6214_v47 = vpack.c.bf16 %v2049_v28, %v2045_v49 }
 0x7ae   :  { %v2051_v34 = vld [vmem:[#allocation9 + $0x170] sm:$0xff] }
 0x7af   :  { %4452 = vmatpush1.bf16.msra.mxu0 %v4451_v3  ;;  %4484 = vmatpush1.bf16.msra.mxu1 %v4483_v6  ;;  %v6177_v3 = vpack.c.bf16 %v2028_v56, %v2024_v50  ;;  %v6179_v6 = vpack.c.bf16 %v2025_v63, %v2021_v60  ;;  %v2054_v50 = vld [vmem:[#allocation9 + $0x188] sm:$0xff]  ;;  %v2056_v60 = vld [vmem:[#allocation9 + $0x198] sm:$0xff]  ;;  %v6218_v63 = vpack.c.bf16 %v2051_v34, %v2047_v24 }
 0x7b0   :  { %4454 = vmatprep.subr.bf16.mxu0 %v4453_v16  ;;  %4486 = vmatprep.subr.bf16.mxu1 %v4485_v19  ;;  %v6182_v16 = vpack.c.bf16 %v2027_v13, %v2023_v10  ;;  %v2030_v19 = vld [vmem:[#allocation9 + $0xc8] sm:$0xff]  ;;  %v2060_v13 = vld [vmem:[#allocation9 + $0x1b8] sm:$0xff] }
 0x7b1   :  { %v6187_v29 = vpack.c.bf16 %v2034_v23, %v2030_v19  ;;  %v2058_v56 = vld [vmem:[#allocation9 + $0x1a8] sm:$0xff]  ;;  %v2053_v19 = vld [vmem:[#allocation9 + $0x180] sm:$0xff] }
 0x7b2   :  { %v6220_v10 = vpack.c.bf16 %v2058_v56, %v2054_v50  ;;  %v2057_v23 = vld [vmem:[#allocation9 + $0x1a0] sm:$0xff] }
 0x7b3   :  { %4456 = vmatpush1.bf16.msra.mxu0 %v4455_v44  ;;  %4488 = vmatpush1.bf16.msra.mxu1 %v4487_v48  ;;  %v6189_v44 = vpack.c.bf16 %v2036_v32, %v2032_v26  ;;  %v6191_v48 = vpack.c.bf16 %v2033_v40, %v2029_v36  ;;  %v6223_v26 = vpack.c.bf16 %v2060_v13, %v2056_v60  ;;  %v2055_v32 = vld [vmem:[#allocation9 + $0x190] sm:$0xff] }
 0x7b4   :  { %4458 = vmatprep.subr.bf16.mxu0 %v4457_v58  ;;  %4490 = vmatprep.subr.bf16.mxu1 %v4489_v62  ;;  %v2035_v58 = vld [vmem:[#allocation9 + $0xf0] sm:$0xff]  ;;  %v2038_v62 = vld [vmem:[#allocation9 + $0x108] sm:$0xff]  ;;  %v6226_v40 = vpack.c.bf16 %v2057_v23, %v2053_v19 }
 0x7b5   :  { %v6194_v4 = vpack.c.bf16 %v2035_v58, %v2031_v54  ;;  %v2059_v36 = vld [vmem:[#allocation9 + $0x1b0] sm:$0xff]  ;;  %v2062_v58 = vld [vmem:[#allocation9 + $0x1c8] sm:$0xff] }
 0x7b6   :  { %v6230_v54 = vpack.c.bf16 %v2059_v36, %v2055_v32 }
 0x7b7   :  { %4460 = vmatpush1.bf16.msra.mxu0 %v4459_v18  ;;  %4492 = vmatpush1.bf16.msra.mxu1 %v4491_v22  ;;  %v2044_v18 = vld [vmem:[#allocation9 + $0x138] sm:$0xff]  ;;  %v6198_v22 = vpack.c.bf16 %v2042_v9, %v2038_v62  ;;  %v2066_v62 = vld [vmem:[#allocation9 + $0x1e8] sm:$0xff] }
 0x7b8   :  { %v2064_v9 = vld [vmem:[#allocation9 + $0x1d8] sm:$0xff] }
 0x7ba   :  { %2164 = vmatmul.mubr.f32.vlgmr.msra.gmra.mrb[16].mxu0 %v5843_v51  ;;  %2277 = vmatmul.mubr.f32.vlgmr.msra.gmra.mrb[16].mxu1 %v5843_v51  ;;  %v2006_v51 = vld [vmem:[#allocation9 + $0x8] sm:$0xff] }
 0x7bb   :  { %2169 = vmatprep.mubr.f32.mxu0 %v5496_v0  ;;  %2282 = vmatprep.mubr.f32.mxu1 %v5496_v0 }
 0x7be   :  { %2170 = vmatmul.mubr.f32.gmra.mrb[18].mxu0 %v5889_v7  ;;  %2283 = vmatmul.mubr.f32.gmra.mrb[18].mxu1 %v5889_v7  ;;  %v2010_v7 = vld [vmem:[#allocation9 + $0x28] sm:$0xff] }
 0x7bf   :  { %2175 = vmatprep.mubr.f32.mxu0 %v5496_v0  ;;  %2288 = vmatprep.mubr.f32.mxu1 %v5496_v0 }
 0x7c2   :  { %2176 = vmatmul.mubr.f32.gmra.mrb[20].mxu0 %v5935_v20  ;;  %2289 = vmatmul.mubr.f32.gmra.mrb[20].mxu1 %v5935_v20  ;;  %v2008_v20 = vld [vmem:[#allocation9 + $0x18] sm:$0xff] }
 0x7c3   :  { %2181 = vmatprep.mubr.f32.mxu0 %v5496_v0  ;;  %2294 = vmatprep.mubr.f32.mxu1 %v5496_v0 }
 0x7c6   :  { %2182 = vmatmul.mubr.f32.gmra.mrb[22].mxu0 %v5981_v46  ;;  %2295 = vmatmul.mubr.f32.gmra.mrb[22].mxu1 %v5981_v46  ;;  %v6151_v46 = vpack.c.bf16 %v2010_v7, %v2006_v51  ;;  %v6200_v51 = vpack.c.bf16 %v2044_v18, %v2040_v14  ;;  %v2037_v7 = vld [vmem:[#allocation9 + $0x100] sm:$0xff]  ;;  %v6235_v14 = vpack.c.bf16 %v2066_v62, %v2062_v58  ;;  %v2068_v18 = vld [vmem:[#allocation9 + $0x1f8] sm:$0xff] }
 0x7c7   :  { %2187 = vmatprep.mubr.f32.mxu0 %v5496_v0  ;;  %2300 = vmatprep.mubr.f32.mxu1 %v5496_v0 }
 0x7c8   :  { %4494 = vmatprep.subr.bf16.mxu0 %v6151_v46 }
 0x7ca   :  { %2188 = vmatmul.mubr.f32.gmra.mrb[24].mxu0 %v6027_v12  ;;  %2301 = vmatmul.mubr.f32.gmra.mrb[24].mxu1 %v6027_v12  ;;  %v2012_v12 = vld [vmem:[#allocation9 + $0x38] sm:$0xff] }
 0x7cb   :  { %2193 = vmatprep.mubr.f32.mxu0 %v5496_v0  ;;  %2306 = vmatprep.mubr.f32.mxu1 %v5496_v0  ;;  %v6153_v55 = vpack.c.bf16 %v2012_v12, %v2008_v20  ;;  %v2041_v20 = vld [vmem:[#allocation9 + $0x120] sm:$0xff]  ;;  %v2039_v12 = vld [vmem:[#allocation9 + $0x110] sm:$0xff] }
 0x7cd   :  { %4526 = vmatprep.subr.bf16.mxu1 %v6153_v55 }
 0x7ce   :  { %2194 = vmatmul.mubr.f32.gmra.mrb[26].mxu0 %v6073_v21  ;;  %2307 = vmatmul.mubr.f32.gmra.mrb[26].mxu1 %v6073_v21  ;;  %v2009_v21 = vld [vmem:[#allocation9 + $0x20] sm:$0xff] }
 0x7cf   :  { %2199 = vmatprep.mubr.f32.mxu0 %v5496_v0  ;;  %2312 = vmatprep.mubr.f32.mxu1 %v5496_v0  ;;  %v6155_v42 = vpack.c.bf16 %v2009_v21, %v2005_v27  ;;  %v6203_v27 = vpack.c.bf16 %v2041_v20, %v2037_v7  ;;  %v2043_v21 = vld [vmem:[#allocation9 + $0x130] sm:$0xff]  ;;  %v2061_v7 = vld [vmem:[#allocation9 + $0x1c0] sm:$0xff] }
 0x7d0   :  { %v6207_v38 = vpack.c.bf16 %v2043_v21, %v2039_v12  ;;  %v2065_v20 = vld [vmem:[#allocation9 + $0x1e0] sm:$0xff]  ;;  %v6237_v12 = vpack.c.bf16 %v2068_v18, %v2064_v9 }
 0x7d1   :  { %4496 = vmatpush1.bf16.msra.mxu0 %v6155_v42  ;;  %v6239_v21 = vpack.c.bf16 %v2065_v20, %v2061_v7 }
 0x7d2   :  { %2200 = vmatmul.mubr.f32.gmra.mrb[28].mxu0 %v6117_v1  ;;  %2313 = vmatmul.mubr.f32.gmra.mrb[28].mxu1 %v6117_v1  ;;  %v6158_v1 = vpack.c.bf16 %v2011_v52, %v2007_v15  ;;  %v2046_v15 = vld [vmem:[#allocation9 + $0x148] sm:$0xff] }
 0x7d3   :  { %2205 = vmatprep.mubr.f32.mxu0 %v5496_v0  ;;  %2318 = vmatprep.mubr.f32.mxu1 %v5496_v0  ;;  %v2050_v52 = vld [vmem:[#allocation9 + $0x168] sm:$0xff] }
 0x7d4   :  { %4528 = vmatpush1.bf16.msra.mxu1 %v6158_v1  ;;  %4498 = vmatprep.subr.bf16.mxu0 %v6163_v5  ;;  %v6209_v57 = vpack.c.bf16 %v2050_v52, %v2046_v15  ;;  %v2063_v15 = vld [vmem:[#allocation9 + $0x1d0] sm:$0xff] }
 0x7d5   :  { %4530 = vmatprep.subr.bf16.mxu1 %v6165_v30  ;;  %4500 = vmatpush1.bf16.msra.mxu0 %v6167_v17  ;;  %v2067_v52 = vld [vmem:[#allocation9 + $0x1f0] sm:$0xff] }
 0x7d6   :  { %4502 = vmatprep.subr.bf16.mxu0 %v6175_v53  ;;  %v6242_v41 = vpack.c.bf16 %v2067_v52, %v2063_v15 }
 0x7d8   :  { %4532 = vmatpush1.bf16.msra.mxu1 %v6170_v8 }
 0x7d9   :  { %4534 = vmatprep.subr.bf16.mxu1 %v6177_v3  ;;  %4504 = vmatpush1.bf16.msra.mxu0 %v6179_v6 }
 0x7da   :  { %4506 = vmatprep.subr.bf16.mxu0 %v6187_v29 }
 0x7dc   :  { %4536 = vmatpush1.bf16.msra.mxu1 %v6182_v16 }
 0x7dd   :  { %4538 = vmatprep.subr.bf16.mxu1 %v6189_v44  ;;  %4508 = vmatpush1.bf16.msra.mxu0 %v6191_v48 }
 0x7de   :  { %4510 = vmatprep.subr.bf16.mxu0 %v6198_v22 }
 0x7e0   :  { %4540 = vmatpush1.bf16.msra.mxu1 %v6194_v4 }
 0x7e1   :  { %4542 = vmatprep.subr.bf16.mxu1 %v6200_v51  ;;  %4512 = vmatpush1.bf16.msra.mxu0 %v6203_v27 }
 0x7e2   :  { %4514 = vmatprep.subr.bf16.mxu0 %v6209_v57 }
 0x7e4   :  { %4544 = vmatpush1.bf16.msra.mxu1 %v6207_v38 }
 0x7e5   :  { %4546 = vmatprep.subr.bf16.mxu1 %v6211_v11  ;;  %4516 = vmatpush1.bf16.msra.mxu0 %v6214_v47 }
 0x7e6   :  { %4518 = vmatprep.subr.bf16.mxu0 %v6220_v10 }
 0x7e8   :  { %4548 = vmatpush1.bf16.msra.mxu1 %v6218_v63 }
 0x7e9   :  { %4550 = vmatprep.subr.bf16.mxu1 %v6223_v26  ;;  %4520 = vmatpush1.bf16.msra.mxu0 %v6226_v40 }
 0x7ea   :  { %4522 = vmatprep.subr.bf16.mxu0 %v6235_v14 }
 0x7ec   :  { %4552 = vmatpush1.bf16.msra.mxu1 %v6230_v54 }
 0x7ed   :  { %4554 = vmatprep.subr.bf16.mxu1 %v6237_v12  ;;  %4524 = vmatpush1.bf16.msra.mxu0 %v6239_v21 }
 0x7ee   :  { %4558 = vmatprep.subr.bf16.mxu0 %v6151_v46 }
 0x7f0   :  { %4556 = vmatpush1.bf16.msra.mxu1 %v6242_v41 }
 0x7f1   :  { %4590 = vmatprep.subr.bf16.mxu1 %v6153_v55 }
 0x86d   :  { %v1833_v45 = vpop.f32.mrb[14].mxu0  ;;  %v1904_v49 = vpop.f32.mrb[14].mxu1 }
 0x86e   :  { %v5019_v28 = vadd.f32 %v1833_v45, %v5817_v37  ;;  %v1835_v24 = vpop.f32.mrb[15].mxu0  ;;  %v1906_v34 = vpop.f32.mrb[15].mxu1  ;;  %v5035_v23 = vadd.f32 %v1904_v49, %v5834_v2  ;;  %v2069_v49 = vld [vmem:[%s6617_s8] sm:$0xf] }
 0x86f   :  { %v5020_v50 = vadd.f32 %v1835_v24, %v5821_v39  ;;  %v5036_v13 = vadd.f32 %v1906_v34, %v5828_v59  ;;  %v6308_v24 = vrot.slane %v2069_v49, %v234_v35  ;;  %v6319_v35 = vrot.slane %v2069_v49, %v238_v61 }
 0x870   :  { %v3815_v56 = vmul.f32 -1.442695, %v5019_v28  ;;  %v6304_v28 = vrot.slane %v2069_v49, %v230_v33 }
 0x871   :  { %v3816_v60 = vmul.f32 -1.442695, %v5020_v50  ;;  %v3817_v19 = vmul.f32 -1.442695, %v5036_v13 }
 0x872   :  { %5252 = vpow2.f32 %v3815_v56 }
 0x873   :  { %5254 = vpow2.f32 %v3816_v60 }
 0x874   :  { %5256 = vpow2.f32 %v3817_v19 }
 0x875   :  { %5258 = vtanh.f32 %v5035_v23 }
 0x87c   :  { %v5253_v32 = vpop.eup %5252 }
 0x87d   :  { %v5255_v36 = vpop.eup %5254  ;;  %v1916_v58 = vadd.f32 1.0, %v5253_v32 }
 0x87e   :  { %v1922_v62 = vadd.f32 1.0, %v5255_v36  ;;  %v5257_v37 = vpop.eup %5256  ;;  %v6314_v36 = vrot.slane %v2069_v49, %v242_v43 }
 0x87f   :  { %5260 = vrcp.f32 %v1916_v58  ;;  %v5259_v9 = vpop.eup %5258  ;;  %v1929_v20 = vadd.f32 1.0, %v5257_v37 }
 0x880   :  { %5262 = vrcp.f32 %v1922_v62 }
 0x881   :  { %5264 = vrcp.f32 %v1929_v20  ;;  %v3819_v20 = vld [vmem:[%s6611_s2 + $0x8] sm:$0xff] }
 0x889   :  { %v5261_v39 = vpop.eup %5260 }
 0x88a   :  { %v5263_v18 = vpop.eup %5262  ;;  %v1933_v7 = vmul.f32 %v5261_v39, %v5259_v9 }
 0x88b   :  { %v1932_v15 = vmul.f32 %v5263_v18, %v6114_v25  ;;  %v5265_v2 = vpop.eup %5264  ;;  %v3818_v25 = vld [vmem:[%s6610_s1 + $0x8] sm:$0xff] }
 0x88d   :  { %v1934_v59 = vadd.f32 %v1933_v7, %v1932_v15 }
 0x88f   :  { %5266 = vtanh.f32 %v1934_v59  ;;  %1940 = vst [vmem:[%s6620_s11] sm:$0xff] %v1934_v59 }
 0x899   :  { %v5267_v52 = vpop.eup %5266 }
 0x89a   :  { %v1936_v45 = vmul.f32 %v5267_v52, %v5265_v2 }
 0x89c   :  { %1939 = vst [vmem:[%s6619_s10] sm:$0xff] %v1936_v45  ;;  %2206 = vmatmul.mubr.f32.gmra.mrb[30].mxu0 %v1936_v45  ;;  %2319 = vmatmul.mubr.f32.gmra.mrb[30].mxu1 %v1936_v45 }
 0x89d   :  { %2429 = vmatprep.mubr.f32.mxu0 %v5496_v0  ;;  %2500 = vmatprep.mubr.f32.mxu1 %v5496_v0 }
 0x8a0   :  { %2430 = vmatmul.mubr.f32.vlgmr.msra.gmra.mrb[16].mxu0 %v3818_v25  ;;  %2501 = vmatmul.mubr.f32.vlgmr.msra.gmra.mrb[16].mxu1 %v3818_v25 }
 0x8a1   :  { %4560 = vmatpush1.bf16.msra.mxu0 %v6155_v42  ;;  %4592 = vmatpush1.bf16.msra.mxu1 %v6158_v1 }
 0x8a2   :  { %4562 = vmatprep.subr.bf16.mxu0 %v6163_v5  ;;  %4594 = vmatprep.subr.bf16.mxu1 %v6165_v30 }
 0x8a3   :  { %2604 = vmatprep.mubr.f32.mxu0 %v5496_v0  ;;  %2675 = vmatprep.mubr.f32.mxu1 %v5496_v0 }
 0x8a5   :  { %4564 = vmatpush1.bf16.msra.mxu0 %v6167_v17  ;;  %4596 = vmatpush1.bf16.msra.mxu1 %v6170_v8 }
 0x8a6   :  { %4566 = vmatprep.subr.bf16.mxu0 %v6175_v53  ;;  %4598 = vmatprep.subr.bf16.mxu1 %v6177_v3 }
 0x8a9   :  { %4568 = vmatpush1.bf16.msra.mxu0 %v6179_v6  ;;  %4600 = vmatpush1.bf16.msra.mxu1 %v6182_v16 }
 0x8aa   :  { %4570 = vmatprep.subr.bf16.mxu0 %v6187_v29  ;;  %4602 = vmatprep.subr.bf16.mxu1 %v6189_v44 }
 0x8ad   :  { %4572 = vmatpush1.bf16.msra.mxu0 %v6191_v48  ;;  %4604 = vmatpush1.bf16.msra.mxu1 %v6194_v4 }
 0x8ae   :  { %4574 = vmatprep.subr.bf16.mxu0 %v6198_v22  ;;  %4606 = vmatprep.subr.bf16.mxu1 %v6200_v51 }
 0x8b1   :  { %4576 = vmatpush1.bf16.msra.mxu0 %v6203_v27  ;;  %4608 = vmatpush1.bf16.msra.mxu1 %v6207_v38 }
 0x8b2   :  { %4578 = vmatprep.subr.bf16.mxu0 %v6209_v57  ;;  %4610 = vmatprep.subr.bf16.mxu1 %v6211_v11 }
 0x8b5   :  { %4580 = vmatpush1.bf16.msra.mxu0 %v6214_v47  ;;  %4612 = vmatpush1.bf16.msra.mxu1 %v6218_v63 }
 0x8b6   :  { %4582 = vmatprep.subr.bf16.mxu0 %v6220_v10  ;;  %4614 = vmatprep.subr.bf16.mxu1 %v6223_v26 }
 0x8b9   :  { %4584 = vmatpush1.bf16.msra.mxu0 %v6226_v40  ;;  %4616 = vmatpush1.bf16.msra.mxu1 %v6230_v54 }
 0x8ba   :  { %4586 = vmatprep.subr.bf16.mxu0 %v6235_v14  ;;  %4618 = vmatprep.subr.bf16.mxu1 %v6237_v12 }
 0x8bd   :  { %4588 = vmatpush1.bf16.msra.mxu0 %v6239_v21  ;;  %4620 = vmatpush1.bf16.msra.mxu1 %v6242_v41 }
 0x8be   :  { %4622 = vmatprep.subr.bf16.mxu0 %v6151_v46  ;;  %4654 = vmatprep.subr.bf16.mxu1 %v6153_v55 }
 0x973   :  { %v2431_v34 = vpop.f32.mrb[16].mxu0  ;;  %v2502_v50 = vpop.f32.mrb[16].mxu1 }
 0x974   :  { %v5037_v56 = vadd.f32 %v2431_v34, %v6304_v28  ;;  %v2433_v60 = vpop.f32.mrb[17].mxu0  ;;  %v2504_v13 = vpop.f32.mrb[17].mxu1  ;;  %v5053_v62 = vadd.f32 %v2502_v50, %v6319_v35 }
 0x975   :  { %v5038_v19 = vadd.f32 %v2433_v60, %v6308_v24  ;;  %v5054_v33 = vadd.f32 %v2504_v13, %v6314_v36 }
 0x976   :  { %v3820_v23 = vmul.f32 -1.442695, %v5037_v56 }
 0x977   :  { %v3821_v32 = vmul.f32 -1.442695, %v5038_v19  ;;  %v3822_v58 = vmul.f32 -1.442695, %v5054_v33 }
 0x978   :  { %5268 = vpow2.f32 %v3820_v23 }
 0x979   :  { %5270 = vpow2.f32 %v3821_v32 }
 0x97a   :  { %5272 = vpow2.f32 %v3822_v58 }
 0x97b   :  { %5274 = vtanh.f32 %v5053_v62 }
 0x982   :  { %v5269_v37 = vpop.eup %5268 }
 0x983   :  { %v5271_v9 = vpop.eup %5270  ;;  %v2514_v39 = vadd.f32 1.0, %v5269_v37 }
 0x984   :  { %v2520_v18 = vadd.f32 1.0, %v5271_v9  ;;  %v5273_v43 = vpop.eup %5272 }
 0x985   :  { %5276 = vrcp.f32 %v2514_v39  ;;  %v5275_v7 = vpop.eup %5274  ;;  %v2527_v59 = vadd.f32 1.0, %v5273_v43 }
 0x986   :  { %5278 = vrcp.f32 %v2520_v18 }
 0x987   :  { %5280 = vrcp.f32 %v2527_v59 }
 0x98f   :  { %v5277_v31 = vpop.eup %5276 }
 0x990   :  { %v5279_v61 = vpop.eup %5278  ;;  %v2531_v15 = vmul.f32 %v5277_v31, %v5275_v7 }
 0x991   :  { %v2530_v2 = vmul.f32 %v5279_v61, %v3819_v20  ;;  %v5281_v45 = vpop.eup %5280 }
 0x993   :  { %v6325_v52 = vadd.f32 %v2531_v15, %v2530_v2 }
 0x995   :  { %5282 = vtanh.f32 %v6325_v52 }
 0x99f   :  { %v5283_v25 = vpop.eup %5282 }
 0x9a0   :  { %v2534_v49 = vmul.f32 %v5283_v25, %v5281_v45 }
 0x9a2   :  { %2535 = vst [vmem:[%s6618_s9] sm:$0xff] %v2534_v49  ;;  %2605 = vmatmul.mubr.f32.vlgmr.msra.gmra.mrb[18].mxu0 %v2534_v49  ;;  %2676 = vmatmul.mubr.f32.vlgmr.msra.gmra.mrb[18].mxu1 %v2534_v49 }
 0x9a3   :  { %4624 = vmatpush1.bf16.msra.mxu0 %v6155_v42  ;;  %4656 = vmatpush1.bf16.msra.mxu1 %v6158_v1 }
 0x9a4   :  { %4626 = vmatprep.subr.bf16.mxu0 %v6163_v5  ;;  %4658 = vmatprep.subr.bf16.mxu1 %v6165_v30 }
 0x9a5   :  { %2780 = vmatprep.mubr.f32.mxu0 %v5496_v0  ;;  %2851 = vmatprep.mubr.f32.mxu1 %v5496_v0 }
 0x9a7   :  { %4628 = vmatpush1.bf16.msra.mxu0 %v6167_v17  ;;  %4660 = vmatpush1.bf16.msra.mxu1 %v6170_v8 }
 0x9a8   :  { %4630 = vmatprep.subr.bf16.mxu0 %v6175_v53  ;;  %4662 = vmatprep.subr.bf16.mxu1 %v6177_v3 }
 0x9ab   :  { %4632 = vmatpush1.bf16.msra.mxu0 %v6179_v6  ;;  %4664 = vmatpush1.bf16.msra.mxu1 %v6182_v16 }
 0x9ac   :  { %4634 = vmatprep.subr.bf16.mxu0 %v6187_v29  ;;  %4666 = vmatprep.subr.bf16.mxu1 %v6189_v44 }
 0x9af   :  { %4636 = vmatpush1.bf16.msra.mxu0 %v6191_v48  ;;  %4668 = vmatpush1.bf16.msra.mxu1 %v6194_v4 }
 0x9b0   :  { %4638 = vmatprep.subr.bf16.mxu0 %v6198_v22  ;;  %4670 = vmatprep.subr.bf16.mxu1 %v6200_v51 }
 0x9b3   :  { %4640 = vmatpush1.bf16.msra.mxu0 %v6203_v27  ;;  %4672 = vmatpush1.bf16.msra.mxu1 %v6207_v38 }
 0x9b4   :  { %4642 = vmatprep.subr.bf16.mxu0 %v6209_v57  ;;  %4674 = vmatprep.subr.bf16.mxu1 %v6211_v11 }
 0x9b7   :  { %4644 = vmatpush1.bf16.msra.mxu0 %v6214_v47  ;;  %4676 = vmatpush1.bf16.msra.mxu1 %v6218_v63 }
 0x9b8   :  { %4646 = vmatprep.subr.bf16.mxu0 %v6220_v10  ;;  %4678 = vmatprep.subr.bf16.mxu1 %v6223_v26 }
 0x9bb   :  { %4648 = vmatpush1.bf16.msra.mxu0 %v6226_v40  ;;  %4680 = vmatpush1.bf16.msra.mxu1 %v6230_v54 }
 0x9bc   :  { %4650 = vmatprep.subr.bf16.mxu0 %v6235_v14  ;;  %4682 = vmatprep.subr.bf16.mxu1 %v6237_v12 }
 0x9bf   :  { %4652 = vmatpush1.bf16.msra.mxu0 %v6239_v21  ;;  %4684 = vmatpush1.bf16.msra.mxu1 %v6242_v41 }
 0x9c0   :  { %4686 = vmatprep.subr.bf16.mxu0 %v6151_v46  ;;  %4718 = vmatprep.subr.bf16.mxu1 %v6153_v55 }
 0xa75   :  { %v2606_v34 = vpop.f32.mrb[18].mxu0  ;;  %v2677_v50 = vpop.f32.mrb[18].mxu1 }
 0xa76   :  { %v5039_v56 = vadd.f32 %v2606_v34, %v6304_v28  ;;  %v2608_v60 = vpop.f32.mrb[19].mxu0  ;;  %v2679_v13 = vpop.f32.mrb[19].mxu1  ;;  %v5055_v62 = vadd.f32 %v2677_v50, %v6319_v35 }
 0xa77   :  { %v5040_v19 = vadd.f32 %v2608_v60, %v6308_v24  ;;  %v5056_v33 = vadd.f32 %v2679_v13, %v6314_v36 }
 0xa78   :  { %v3823_v23 = vmul.f32 -1.442695, %v5039_v56 }
 0xa79   :  { %v3824_v32 = vmul.f32 -1.442695, %v5040_v19  ;;  %v3825_v58 = vmul.f32 -1.442695, %v5056_v33 }
 0xa7a   :  { %5284 = vpow2.f32 %v3823_v23 }
 0xa7b   :  { %5286 = vpow2.f32 %v3824_v32 }
 0xa7c   :  { %5288 = vpow2.f32 %v3825_v58 }
 0xa7d   :  { %5290 = vtanh.f32 %v5055_v62 }
 0xa84   :  { %v5285_v37 = vpop.eup %5284 }
 0xa85   :  { %v5287_v9 = vpop.eup %5286  ;;  %v2689_v39 = vadd.f32 1.0, %v5285_v37 }
 0xa86   :  { %v2695_v18 = vadd.f32 1.0, %v5287_v9  ;;  %v5289_v43 = vpop.eup %5288 }
 0xa87   :  { %5292 = vrcp.f32 %v2689_v39  ;;  %v5291_v7 = vpop.eup %5290  ;;  %v2702_v15 = vadd.f32 1.0, %v5289_v43 }
 0xa88   :  { %5294 = vrcp.f32 %v2695_v18 }
 0xa89   :  { %5296 = vrcp.f32 %v2702_v15 }
 0xa91   :  { %v5293_v20 = vpop.eup %5292 }
 0xa92   :  { %v5295_v31 = vpop.eup %5294  ;;  %v2706_v61 = vmul.f32 %v5293_v20, %v5291_v7 }
 0xa93   :  { %v2705_v59 = vmul.f32 %v5295_v31, %v6325_v52  ;;  %v5297_v45 = vpop.eup %5296 }
 0xa95   :  { %v6370_v2 = vadd.f32 %v2706_v61, %v2705_v59 }
 0xa97   :  { %5298 = vtanh.f32 %v6370_v2 }
 0xaa1   :  { %v5299_v25 = vpop.eup %5298 }
 0xaa2   :  { %v2709_v49 = vmul.f32 %v5299_v25, %v5297_v45 }
 0xaa4   :  { %3826 = vst [vmem:[%s6618_s9 + $0x8] sm:$0xff] %v2709_v49  ;;  %2781 = vmatmul.mubr.f32.vlgmr.msra.gmra.mrb[20].mxu0 %v2709_v49  ;;  %2852 = vmatmul.mubr.f32.vlgmr.msra.gmra.mrb[20].mxu1 %v2709_v49 }
 0xaa5   :  { %4688 = vmatpush1.bf16.msra.mxu0 %v6155_v42  ;;  %4720 = vmatpush1.bf16.msra.mxu1 %v6158_v1 }
 0xaa6   :  { %4690 = vmatprep.subr.bf16.mxu0 %v6163_v5  ;;  %4722 = vmatprep.subr.bf16.mxu1 %v6165_v30 }
 0xaa7   :  { %2956 = vmatprep.mubr.f32.mxu0 %v5496_v0  ;;  %3027 = vmatprep.mubr.f32.mxu1 %v5496_v0 }
 0xaa9   :  { %4692 = vmatpush1.bf16.msra.mxu0 %v6167_v17  ;;  %4724 = vmatpush1.bf16.msra.mxu1 %v6170_v8 }
 0xaaa   :  { %4694 = vmatprep.subr.bf16.mxu0 %v6175_v53  ;;  %4726 = vmatprep.subr.bf16.mxu1 %v6177_v3 }
 0xaad   :  { %4696 = vmatpush1.bf16.msra.mxu0 %v6179_v6  ;;  %4728 = vmatpush1.bf16.msra.mxu1 %v6182_v16 }
 0xaae   :  { %4698 = vmatprep.subr.bf16.mxu0 %v6187_v29  ;;  %4730 = vmatprep.subr.bf16.mxu1 %v6189_v44 }
 0xab1   :  { %4700 = vmatpush1.bf16.msra.mxu0 %v6191_v48  ;;  %4732 = vmatpush1.bf16.msra.mxu1 %v6194_v4 }
 0xab2   :  { %4702 = vmatprep.subr.bf16.mxu0 %v6198_v22  ;;  %4734 = vmatprep.subr.bf16.mxu1 %v6200_v51 }
 0xab5   :  { %4704 = vmatpush1.bf16.msra.mxu0 %v6203_v27  ;;  %4736 = vmatpush1.bf16.msra.mxu1 %v6207_v38 }
 0xab6   :  { %4706 = vmatprep.subr.bf16.mxu0 %v6209_v57  ;;  %4738 = vmatprep.subr.bf16.mxu1 %v6211_v11 }
 0xab9   :  { %4708 = vmatpush1.bf16.msra.mxu0 %v6214_v47  ;;  %4740 = vmatpush1.bf16.msra.mxu1 %v6218_v63 }
 0xaba   :  { %4710 = vmatprep.subr.bf16.mxu0 %v6220_v10  ;;  %4742 = vmatprep.subr.bf16.mxu1 %v6223_v26 }
 0xabd   :  { %4712 = vmatpush1.bf16.msra.mxu0 %v6226_v40  ;;  %4744 = vmatpush1.bf16.msra.mxu1 %v6230_v54 }
 0xabe   :  { %4714 = vmatprep.subr.bf16.mxu0 %v6235_v14  ;;  %4746 = vmatprep.subr.bf16.mxu1 %v6237_v12 }
 0xac1   :  { %4716 = vmatpush1.bf16.msra.mxu0 %v6239_v21  ;;  %4748 = vmatpush1.bf16.msra.mxu1 %v6242_v41 }
 0xac2   :  { %4750 = vmatprep.subr.bf16.mxu0 %v6151_v46  ;;  %4782 = vmatprep.subr.bf16.mxu1 %v6153_v55 }
 0xb77   :  { %v2782_v52 = vpop.f32.mrb[20].mxu0  ;;  %v2853_v34 = vpop.f32.mrb[20].mxu1 }
 0xb78   :  { %v5041_v50 = vadd.f32 %v2782_v52, %v6304_v28  ;;  %v2784_v56 = vpop.f32.mrb[21].mxu0  ;;  %v2855_v60 = vpop.f32.mrb[21].mxu1  ;;  %v5057_v58 = vadd.f32 %v2853_v34, %v6319_v35 }
 0xb79   :  { %v5042_v13 = vadd.f32 %v2784_v56, %v6308_v24  ;;  %v5058_v32 = vadd.f32 %v2855_v60, %v6314_v36 }
 0xb7a   :  { %v3827_v19 = vmul.f32 -1.442695, %v5041_v50 }
 0xb7b   :  { %v3828_v23 = vmul.f32 -1.442695, %v5042_v13  ;;  %v3829_v33 = vmul.f32 -1.442695, %v5058_v32 }
 0xb7c   :  { %5300 = vpow2.f32 %v3827_v19 }
 0xb7d   :  { %5302 = vpow2.f32 %v3828_v23 }
 0xb7e   :  { %5304 = vpow2.f32 %v3829_v33 }
 0xb7f   :  { %5306 = vtanh.f32 %v5057_v58 }
 0xb86   :  { %v5301_v62 = vpop.eup %5300 }
 0xb87   :  { %v5303_v37 = vpop.eup %5302  ;;  %v2865_v9 = vadd.f32 1.0, %v5301_v62 }
 0xb88   :  { %v2871_v39 = vadd.f32 1.0, %v5303_v37  ;;  %v5305_v18 = vpop.eup %5304 }
 0xb89   :  { %5308 = vrcp.f32 %v2865_v9  ;;  %v5307_v43 = vpop.eup %5306  ;;  %v2878_v61 = vadd.f32 1.0, %v5305_v18 }
 0xb8a   :  { %5310 = vrcp.f32 %v2871_v39 }
 0xb8b   :  { %5312 = vrcp.f32 %v2878_v61 }
 0xb93   :  { %v5309_v7 = vpop.eup %5308 }
 0xb94   :  { %v5311_v20 = vpop.eup %5310  ;;  %v2882_v31 = vmul.f32 %v5309_v7, %v5307_v43 }
 0xb95   :  { %v2881_v15 = vmul.f32 %v5311_v20, %v6370_v2  ;;  %v5313_v45 = vpop.eup %5312 }
 0xb97   :  { %v6415_v59 = vadd.f32 %v2882_v31, %v2881_v15 }
 0xb99   :  { %5314 = vtanh.f32 %v6415_v59 }
 0xba3   :  { %v5315_v25 = vpop.eup %5314 }
 0xba4   :  { %v2885_v49 = vmul.f32 %v5315_v25, %v5313_v45 }
 0xba6   :  { %3830 = vst [vmem:[%s6618_s9 + $0x10] sm:$0xff] %v2885_v49  ;;  %2957 = vmatmul.mubr.f32.vlgmr.msra.gmra.mrb[22].mxu0 %v2885_v49  ;;  %3028 = vmatmul.mubr.f32.vlgmr.msra.gmra.mrb[22].mxu1 %v2885_v49 }
 0xba7   :  { %4752 = vmatpush1.bf16.msra.mxu0 %v6155_v42  ;;  %4784 = vmatpush1.bf16.msra.mxu1 %v6158_v1 }
 0xba8   :  { %4754 = vmatprep.subr.bf16.mxu0 %v6163_v5  ;;  %4786 = vmatprep.subr.bf16.mxu1 %v6165_v30 }
 0xba9   :  { %3132 = vmatprep.mubr.f32.mxu0 %v5496_v0  ;;  %3203 = vmatprep.mubr.f32.mxu1 %v5496_v0 }
 0xbab   :  { %4756 = vmatpush1.bf16.msra.mxu0 %v6167_v17  ;;  %4788 = vmatpush1.bf16.msra.mxu1 %v6170_v8 }
 0xbac   :  { %4758 = vmatprep.subr.bf16.mxu0 %v6175_v53  ;;  %4790 = vmatprep.subr.bf16.mxu1 %v6177_v3 }
 0xbaf   :  { %4760 = vmatpush1.bf16.msra.mxu0 %v6179_v6  ;;  %4792 = vmatpush1.bf16.msra.mxu1 %v6182_v16 }
 0xbb0   :  { %4762 = vmatprep.subr.bf16.mxu0 %v6187_v29  ;;  %4794 = vmatprep.subr.bf16.mxu1 %v6189_v44 }
 0xbb3   :  { %4764 = vmatpush1.bf16.msra.mxu0 %v6191_v48  ;;  %4796 = vmatpush1.bf16.msra.mxu1 %v6194_v4 }
 0xbb4   :  { %4766 = vmatprep.subr.bf16.mxu0 %v6198_v22  ;;  %4798 = vmatprep.subr.bf16.mxu1 %v6200_v51 }
 0xbb7   :  { %4768 = vmatpush1.bf16.msra.mxu0 %v6203_v27  ;;  %4800 = vmatpush1.bf16.msra.mxu1 %v6207_v38 }
 0xbb8   :  { %4770 = vmatprep.subr.bf16.mxu0 %v6209_v57  ;;  %4802 = vmatprep.subr.bf16.mxu1 %v6211_v11 }
 0xbbb   :  { %4772 = vmatpush1.bf16.msra.mxu0 %v6214_v47  ;;  %4804 = vmatpush1.bf16.msra.mxu1 %v6218_v63 }
 0xbbc   :  { %4774 = vmatprep.subr.bf16.mxu0 %v6220_v10  ;;  %4806 = vmatprep.subr.bf16.mxu1 %v6223_v26 }
 0xbbf   :  { %4776 = vmatpush1.bf16.msra.mxu0 %v6226_v40  ;;  %4808 = vmatpush1.bf16.msra.mxu1 %v6230_v54 }
 0xbc0   :  { %4778 = vmatprep.subr.bf16.mxu0 %v6235_v14  ;;  %4810 = vmatprep.subr.bf16.mxu1 %v6237_v12 }
 0xbc3   :  { %4780 = vmatpush1.bf16.msra.mxu0 %v6239_v21  ;;  %4812 = vmatpush1.bf16.msra.mxu1 %v6242_v41 }
 0xbc4   :  { %4814 = vmatprep.subr.bf16.mxu0 %v6151_v46  ;;  %4846 = vmatprep.subr.bf16.mxu1 %v6153_v55 }
 0xc79   :  { %v2958_v2 = vpop.f32.mrb[22].mxu0  ;;  %v3029_v52 = vpop.f32.mrb[22].mxu1 }
 0xc7a   :  { %v5043_v34 = vadd.f32 %v2958_v2, %v6304_v28  ;;  %v2960_v50 = vpop.f32.mrb[23].mxu0  ;;  %v3031_v56 = vpop.f32.mrb[23].mxu1  ;;  %v5059_v33 = vadd.f32 %v3029_v52, %v6319_v35 }
 0xc7b   :  { %v5044_v60 = vadd.f32 %v2960_v50, %v6308_v24  ;;  %v5060_v23 = vadd.f32 %v3031_v56, %v6314_v36 }
 0xc7c   :  { %v3831_v13 = vmul.f32 -1.442695, %v5043_v34 }
 0xc7d   :  { %v3832_v19 = vmul.f32 -1.442695, %v5044_v60  ;;  %v3833_v32 = vmul.f32 -1.442695, %v5060_v23 }
 0xc7e   :  { %5316 = vpow2.f32 %v3831_v13 }
 0xc7f   :  { %5318 = vpow2.f32 %v3832_v19 }
 0xc80   :  { %5320 = vpow2.f32 %v3833_v32 }
 0xc81   :  { %5322 = vtanh.f32 %v5059_v33 }
 0xc88   :  { %v5317_v58 = vpop.eup %5316 }
 0xc89   :  { %v5319_v62 = vpop.eup %5318  ;;  %v3041_v37 = vadd.f32 1.0, %v5317_v58 }
 0xc8a   :  { %v3047_v9 = vadd.f32 1.0, %v5319_v62  ;;  %v5321_v39 = vpop.eup %5320 }
 0xc8b   :  { %5324 = vrcp.f32 %v3041_v37  ;;  %v5323_v18 = vpop.eup %5322  ;;  %v3054_v31 = vadd.f32 1.0, %v5321_v39 }
 0xc8c   :  { %5326 = vrcp.f32 %v3047_v9 }
 0xc8d   :  { %5328 = vrcp.f32 %v3054_v31 }
 0xc95   :  { %v5325_v43 = vpop.eup %5324 }
 0xc96   :  { %v5327_v7 = vpop.eup %5326  ;;  %v3058_v20 = vmul.f32 %v5325_v43, %v5323_v18 }
 0xc97   :  { %v3057_v61 = vmul.f32 %v5327_v7, %v6415_v59  ;;  %v5329_v45 = vpop.eup %5328 }
 0xc99   :  { %v6460_v15 = vadd.f32 %v3058_v20, %v3057_v61 }
 0xc9b   :  { %5330 = vtanh.f32 %v6460_v15 }
 0xca5   :  { %v5331_v25 = vpop.eup %5330 }
 0xca6   :  { %v3061_v49 = vmul.f32 %v5331_v25, %v5329_v45 }
 0xca8   :  { %3834 = vst [vmem:[%s6618_s9 + $0x18] sm:$0xff] %v3061_v49  ;;  %3133 = vmatmul.mubr.f32.vlgmr.msra.gmra.mrb[24].mxu0 %v3061_v49  ;;  %3204 = vmatmul.mubr.f32.vlgmr.msra.gmra.mrb[24].mxu1 %v3061_v49 }
 0xca9   :  { %4816 = vmatpush1.bf16.msra.mxu0 %v6155_v42  ;;  %4848 = vmatpush1.bf16.msra.mxu1 %v6158_v1 }
 0xcaa   :  { %4818 = vmatprep.subr.bf16.mxu0 %v6163_v5  ;;  %4850 = vmatprep.subr.bf16.mxu1 %v6165_v30 }
 0xcab   :  { %3308 = vmatprep.mubr.f32.mxu0 %v5496_v0  ;;  %3379 = vmatprep.mubr.f32.mxu1 %v5496_v0 }
 0xcad   :  { %4820 = vmatpush1.bf16.msra.mxu0 %v6167_v17  ;;  %4852 = vmatpush1.bf16.msra.mxu1 %v6170_v8 }
 0xcae   :  { %4822 = vmatprep.subr.bf16.mxu0 %v6175_v53  ;;  %4854 = vmatprep.subr.bf16.mxu1 %v6177_v3 }
 0xcb1   :  { %4824 = vmatpush1.bf16.msra.mxu0 %v6179_v6  ;;  %4856 = vmatpush1.bf16.msra.mxu1 %v6182_v16 }
 0xcb2   :  { %4826 = vmatprep.subr.bf16.mxu0 %v6187_v29  ;;  %4858 = vmatprep.subr.bf16.mxu1 %v6189_v44 }
 0xcb5   :  { %4828 = vmatpush1.bf16.msra.mxu0 %v6191_v48  ;;  %4860 = vmatpush1.bf16.msra.mxu1 %v6194_v4 }
 0xcb6   :  { %4830 = vmatprep.subr.bf16.mxu0 %v6198_v22  ;;  %4862 = vmatprep.subr.bf16.mxu1 %v6200_v51 }
 0xcb9   :  { %4832 = vmatpush1.bf16.msra.mxu0 %v6203_v27  ;;  %4864 = vmatpush1.bf16.msra.mxu1 %v6207_v38 }
 0xcba   :  { %4834 = vmatprep.subr.bf16.mxu0 %v6209_v57  ;;  %4866 = vmatprep.subr.bf16.mxu1 %v6211_v11 }
 0xcbd   :  { %4836 = vmatpush1.bf16.msra.mxu0 %v6214_v47  ;;  %4868 = vmatpush1.bf16.msra.mxu1 %v6218_v63 }
 0xcbe   :  { %4838 = vmatprep.subr.bf16.mxu0 %v6220_v10  ;;  %4870 = vmatprep.subr.bf16.mxu1 %v6223_v26 }
 0xcc1   :  { %4840 = vmatpush1.bf16.msra.mxu0 %v6226_v40  ;;  %4872 = vmatpush1.bf16.msra.mxu1 %v6230_v54 }
 0xcc2   :  { %4842 = vmatprep.subr.bf16.mxu0 %v6235_v14  ;;  %4874 = vmatprep.subr.bf16.mxu1 %v6237_v12 }
 0xcc5   :  { %4844 = vmatpush1.bf16.msra.mxu0 %v6239_v21  ;;  %4876 = vmatpush1.bf16.msra.mxu1 %v6242_v41 }
 0xcc6   :  { %4878 = vmatprep.subr.bf16.mxu0 %v6151_v46  ;;  %4910 = vmatprep.subr.bf16.mxu1 %v6153_v55 }
 0xd7b   :  { %v3134_v59 = vpop.f32.mrb[24].mxu0  ;;  %v3205_v2 = vpop.f32.mrb[24].mxu1 }
 0xd7c   :  { %v5045_v52 = vadd.f32 %v3134_v59, %v6304_v28  ;;  %v3136_v34 = vpop.f32.mrb[25].mxu0  ;;  %v3207_v50 = vpop.f32.mrb[25].mxu1  ;;  %v5061_v32 = vadd.f32 %v3205_v2, %v6319_v35 }
 0xd7d   :  { %v5046_v56 = vadd.f32 %v3136_v34, %v6308_v24  ;;  %v5062_v19 = vadd.f32 %v3207_v50, %v6314_v36 }
 0xd7e   :  { %v3835_v60 = vmul.f32 -1.442695, %v5045_v52 }
 0xd7f   :  { %v3836_v13 = vmul.f32 -1.442695, %v5046_v56  ;;  %v3837_v23 = vmul.f32 -1.442695, %v5062_v19 }
 0xd80   :  { %5332 = vpow2.f32 %v3835_v60 }
 0xd81   :  { %5334 = vpow2.f32 %v3836_v13 }
 0xd82   :  { %5336 = vpow2.f32 %v3837_v23 }
 0xd83   :  { %5338 = vtanh.f32 %v5061_v32 }
 0xd8a   :  { %v5333_v33 = vpop.eup %5332 }
 0xd8b   :  { %v5335_v58 = vpop.eup %5334  ;;  %v3217_v62 = vadd.f32 1.0, %v5333_v33 }
 0xd8c   :  { %v3223_v37 = vadd.f32 1.0, %v5335_v58  ;;  %v5337_v9 = vpop.eup %5336 }
 0xd8d   :  { %5340 = vrcp.f32 %v3217_v62  ;;  %v5339_v39 = vpop.eup %5338  ;;  %v3230_v20 = vadd.f32 1.0, %v5337_v9 }
 0xd8e   :  { %5342 = vrcp.f32 %v3223_v37 }
 0xd8f   :  { %5344 = vrcp.f32 %v3230_v20 }
 0xd97   :  { %v5341_v18 = vpop.eup %5340 }
 0xd98   :  { %v5343_v43 = vpop.eup %5342  ;;  %v3234_v7 = vmul.f32 %v5341_v18, %v5339_v39 }
 0xd99   :  { %v3233_v31 = vmul.f32 %v5343_v43, %v6460_v15  ;;  %v5345_v45 = vpop.eup %5344 }
 0xd9b   :  { %v6505_v61 = vadd.f32 %v3234_v7, %v3233_v31 }
 0xd9d   :  { %5346 = vtanh.f32 %v6505_v61 }
 0xda7   :  { %v5347_v25 = vpop.eup %5346 }
 0xda8   :  { %v3237_v49 = vmul.f32 %v5347_v25, %v5345_v45 }
 0xdaa   :  { %3838 = vst [vmem:[%s6618_s9 + $0x20] sm:$0xff] %v3237_v49  ;;  %3309 = vmatmul.mubr.f32.vlgmr.msra.gmra.mrb[26].mxu0 %v3237_v49  ;;  %3380 = vmatmul.mubr.f32.vlgmr.msra.gmra.mrb[26].mxu1 %v3237_v49 }
 0xdab   :  { %4880 = vmatpush1.bf16.msra.mxu0 %v6155_v42  ;;  %4912 = vmatpush1.bf16.msra.mxu1 %v6158_v1 }
 0xdac   :  { %4882 = vmatprep.subr.bf16.mxu0 %v6163_v5  ;;  %4914 = vmatprep.subr.bf16.mxu1 %v6165_v30 }
 0xdad   :  { %3484 = vmatprep.mubr.f32.mxu0 %v5496_v0  ;;  %3555 = vmatprep.mubr.f32.mxu1 %v5496_v0 }
 0xdaf   :  { %4884 = vmatpush1.bf16.msra.mxu0 %v6167_v17  ;;  %4916 = vmatpush1.bf16.msra.mxu1 %v6170_v8 }
 0xdb0   :  { %4886 = vmatprep.subr.bf16.mxu0 %v6175_v53  ;;  %4918 = vmatprep.subr.bf16.mxu1 %v6177_v3 }
 0xdb3   :  { %4888 = vmatpush1.bf16.msra.mxu0 %v6179_v6  ;;  %4920 = vmatpush1.bf16.msra.mxu1 %v6182_v16 }
 0xdb4   :  { %4890 = vmatprep.subr.bf16.mxu0 %v6187_v29  ;;  %4922 = vmatprep.subr.bf16.mxu1 %v6189_v44 }
 0xdb7   :  { %4892 = vmatpush1.bf16.msra.mxu0 %v6191_v48  ;;  %4924 = vmatpush1.bf16.msra.mxu1 %v6194_v4 }
 0xdb8   :  { %4894 = vmatprep.subr.bf16.mxu0 %v6198_v22  ;;  %4926 = vmatprep.subr.bf16.mxu1 %v6200_v51 }
 0xdbb   :  { %4896 = vmatpush1.bf16.msra.mxu0 %v6203_v27  ;;  %4928 = vmatpush1.bf16.msra.mxu1 %v6207_v38 }
 0xdbc   :  { %4898 = vmatprep.subr.bf16.mxu0 %v6209_v57  ;;  %4930 = vmatprep.subr.bf16.mxu1 %v6211_v11 }
 0xdbf   :  { %4900 = vmatpush1.bf16.msra.mxu0 %v6214_v47  ;;  %4932 = vmatpush1.bf16.msra.mxu1 %v6218_v63 }
 0xdc0   :  { %4902 = vmatprep.subr.bf16.mxu0 %v6220_v10  ;;  %4934 = vmatprep.subr.bf16.mxu1 %v6223_v26 }
 0xdc3   :  { %4904 = vmatpush1.bf16.msra.mxu0 %v6226_v40  ;;  %4936 = vmatpush1.bf16.msra.mxu1 %v6230_v54 }
 0xdc4   :  { %4906 = vmatprep.subr.bf16.mxu0 %v6235_v14  ;;  %4938 = vmatprep.subr.bf16.mxu1 %v6237_v12 }
 0xdc7   :  { %4908 = vmatpush1.bf16.msra.mxu0 %v6239_v21  ;;  %4940 = vmatpush1.bf16.msra.mxu1 %v6242_v41 }
 0xdc8   :  { %4942 = vmatprep.subr.bf16.mxu0 %v6151_v46  ;;  %4974 = vmatprep.subr.bf16.mxu1 %v6153_v55 }
 0xe7d   :  { %v3310_v15 = vpop.f32.mrb[26].mxu0  ;;  %v3381_v59 = vpop.f32.mrb[26].mxu1 }
 0xe7e   :  { %v5047_v2 = vadd.f32 %v3310_v15, %v6304_v28  ;;  %v3312_v52 = vpop.f32.mrb[27].mxu0  ;;  %v3383_v34 = vpop.f32.mrb[27].mxu1  ;;  %v5063_v23 = vadd.f32 %v3381_v59, %v6319_v35 }
 0xe7f   :  { %v5048_v50 = vadd.f32 %v3312_v52, %v6308_v24  ;;  %v5064_v13 = vadd.f32 %v3383_v34, %v6314_v36 }
 0xe80   :  { %v3839_v56 = vmul.f32 -1.442695, %v5047_v2 }
 0xe81   :  { %v3840_v60 = vmul.f32 -1.442695, %v5048_v50  ;;  %v3841_v19 = vmul.f32 -1.442695, %v5064_v13 }
 0xe82   :  { %5348 = vpow2.f32 %v3839_v56 }
 0xe83   :  { %5350 = vpow2.f32 %v3840_v60 }
 0xe84   :  { %5352 = vpow2.f32 %v3841_v19 }
 0xe85   :  { %5354 = vtanh.f32 %v5063_v23 }
 0xe8c   :  { %v5349_v46 = vpop.eup %5348 }
 0xe8d   :  { %v5351_v32 = vpop.eup %5350  ;;  %v3393_v55 = vadd.f32 1.0, %v5349_v46 }
 0xe8e   :  { %v3399_v33 = vadd.f32 1.0, %v5351_v32  ;;  %v5353_v58 = vpop.eup %5352 }
 0xe8f   :  { %5356 = vrcp.f32 %v3393_v55  ;;  %v5355_v62 = vpop.eup %5354  ;;  %v3406_v18 = vadd.f32 1.0, %v5353_v58 }
 0xe90   :  { %5358 = vrcp.f32 %v3399_v33 }
 0xe91   :  { %5360 = vrcp.f32 %v3406_v18 }
 0xe99   :  { %v5357_v37 = vpop.eup %5356 }
 0xe9a   :  { %v5359_v9 = vpop.eup %5358  ;;  %v3410_v39 = vmul.f32 %v5357_v37, %v5355_v62 }
 0xe9b   :  { %v3409_v43 = vmul.f32 %v5359_v9, %v6505_v61  ;;  %v5361_v20 = vpop.eup %5360 }
 0xe9d   :  { %v6550_v7 = vadd.f32 %v3410_v39, %v3409_v43 }
 0xe9f   :  { %5362 = vtanh.f32 %v6550_v7 }
 0xea9   :  { %v5363_v31 = vpop.eup %5362 }
 0xeaa   :  { %v3413_v45 = vmul.f32 %v5363_v31, %v5361_v20 }
 0xeac   :  { %3842 = vst [vmem:[%s6618_s9 + $0x28] sm:$0xff] %v3413_v45  ;;  %3485 = vmatmul.mubr.f32.vlgmr.msra.gmra.mrb[28].mxu0 %v3413_v45  ;;  %3556 = vmatmul.mubr.f32.vlgmr.msra.gmra.mrb[28].mxu1 %v3413_v45 }
 0xead   :  { %4944 = vmatpush1.bf16.msra.mxu0 %v6155_v42  ;;  %4976 = vmatpush1.bf16.msra.mxu1 %v6158_v1 }
 0xeae   :  { %4946 = vmatprep.subr.bf16.mxu0 %v6163_v5  ;;  %4978 = vmatprep.subr.bf16.mxu1 %v6165_v30 }
 0xeaf   :  { %3660 = vmatprep.mubr.f32.mxu0 %v5496_v0  ;;  %3731 = vmatprep.mubr.f32.mxu1 %v5496_v0 }
 0xeb1   :  { %4948 = vmatpush1.bf16.msra.mxu0 %v6167_v17  ;;  %4980 = vmatpush1.bf16.msra.mxu1 %v6170_v8 }
 0xeb2   :  { %4950 = vmatprep.subr.bf16.mxu0 %v6175_v53  ;;  %4982 = vmatprep.subr.bf16.mxu1 %v6177_v3 }
 0xeb5   :  { %4952 = vmatpush1.bf16.msra.mxu0 %v6179_v6  ;;  %4984 = vmatpush1.bf16.msra.mxu1 %v6182_v16 }
 0xeb6   :  { %4954 = vmatprep.subr.bf16.mxu0 %v6187_v29  ;;  %4986 = vmatprep.subr.bf16.mxu1 %v6189_v44 }
 0xeb9   :  { %4956 = vmatpush1.bf16.msra.mxu0 %v6191_v48  ;;  %4988 = vmatpush1.bf16.msra.mxu1 %v6194_v4 }
 0xeba   :  { %4958 = vmatprep.subr.bf16.mxu0 %v6198_v22  ;;  %4990 = vmatprep.subr.bf16.mxu1 %v6200_v51 }
 0xebd   :  { %4960 = vmatpush1.bf16.msra.mxu0 %v6203_v27  ;;  %4992 = vmatpush1.bf16.msra.mxu1 %v6207_v38 }
 0xebe   :  { %4962 = vmatprep.subr.bf16.mxu0 %v6209_v57  ;;  %4994 = vmatprep.subr.bf16.mxu1 %v6211_v11 }
 0xec1   :  { %4964 = vmatpush1.bf16.msra.mxu0 %v6214_v47  ;;  %4996 = vmatpush1.bf16.msra.mxu1 %v6218_v63 }
 0xec2   :  { %4966 = vmatprep.subr.bf16.mxu0 %v6220_v10  ;;  %4998 = vmatprep.subr.bf16.mxu1 %v6223_v26 }
 0xec5   :  { %4968 = vmatpush1.bf16.msra.mxu0 %v6226_v40  ;;  %5000 = vmatpush1.bf16.msra.mxu1 %v6230_v54 }
 0xec6   :  { %4970 = vmatprep.subr.bf16.mxu0 %v6235_v14  ;;  %5002 = vmatprep.subr.bf16.mxu1 %v6237_v12 }
 0xec9   :  { %4972 = vmatpush1.bf16.msra.mxu0 %v6239_v21  ;;  %5004 = vmatpush1.bf16.msra.mxu1 %v6242_v41 }
 0xf7f   :  { %v3486_v0 = vpop.f32.mrb[28].mxu0  ;;  %v3557_v42 = vpop.f32.mrb[28].mxu1 }
 0xf80   :  { %v5049_v1 = vadd.f32 %v3486_v0, %v6304_v28  ;;  %v3488_v5 = vpop.f32.mrb[29].mxu0  ;;  %v3559_v30 = vpop.f32.mrb[29].mxu1  ;;  %v5065_v16 = vadd.f32 %v3557_v42, %v6319_v35 }
 0xf81   :  { %v5050_v17 = vadd.f32 %v3488_v5, %v6308_v24  ;;  %v5066_v3 = vadd.f32 %v3559_v30, %v6314_v36 }
 0xf82   :  { %v3843_v8 = vmul.f32 -1.442695, %v5049_v1 }
 0xf83   :  { %v3844_v53 = vmul.f32 -1.442695, %v5050_v17  ;;  %v3845_v6 = vmul.f32 -1.442695, %v5066_v3 }
 0xf84   :  { %5364 = vpow2.f32 %v3843_v8 }
 0xf85   :  { %5366 = vpow2.f32 %v3844_v53 }
 0xf86   :  { %5368 = vpow2.f32 %v3845_v6 }
 0xf87   :  { %5370 = vtanh.f32 %v5065_v16 }
 0xf8e   :  { %v5365_v29 = vpop.eup %5364 }
 0xf8f   :  { %v5367_v44 = vpop.eup %5366  ;;  %v3569_v48 = vadd.f32 1.0, %v5365_v29 }
 0xf90   :  { %v3575_v4 = vadd.f32 1.0, %v5367_v44  ;;  %v5369_v22 = vpop.eup %5368 }
 0xf91   :  { %5372 = vrcp.f32 %v3569_v48  ;;  %v5371_v51 = vpop.eup %5370  ;;  %v3582_v11 = vadd.f32 1.0, %v5369_v22 }
 0xf92   :  { %5374 = vrcp.f32 %v3575_v4 }
 0xf93   :  { %5376 = vrcp.f32 %v3582_v11 }
 0xf9b   :  { %v5373_v27 = vpop.eup %5372 }
 0xf9c   :  { %v5375_v38 = vpop.eup %5374  ;;  %v3586_v57 = vmul.f32 %v5373_v27, %v5371_v51 }
 0xf9d   :  { %v3585_v47 = vmul.f32 %v5375_v38, %v6550_v7  ;;  %v5377_v10 = vpop.eup %5376 }
 0xf9f   :  { %v3587_v63 = vadd.f32 %v3586_v57, %v3585_v47 }
 0xfa1   :  { %5378 = vtanh.f32 %v3587_v63 }
 0xfab   :  { %v5379_v26 = vpop.eup %5378 }
 0xfac   :  { %v3589_v40 = vmul.f32 %v5379_v26, %v5377_v10 }
 0xfae   :  { %3846 = vst [vmem:[%s6618_s9 + $0x30] sm:$0xff] %v3589_v40  ;;  %3661 = vmatmul.mubr.f32.vlgmr.msra.gmra.mrb[30].mxu0 %v3589_v40  ;;  %3732 = vmatmul.mubr.f32.vlgmr.msra.gmra.mrb[30].mxu1 %v3589_v40 }
0x1081   :  { %v3662_v54 = vpop.f32.mrb[30].mxu0  ;;  %v3733_v14 = vpop.f32.mrb[30].mxu1 }
0x1082   :  { %v5051_v12 = vadd.f32 %v3662_v54, %v6304_v28  ;;  %v3664_v21 = vpop.f32.mrb[31].mxu0  ;;  %v3735_v41 = vpop.f32.mrb[31].mxu1  ;;  %v5067_v2 = vadd.f32 %v3733_v14, %v6319_v35 }
0x1083   :  { %v5052_v61 = vadd.f32 %v3664_v21, %v6308_v24  ;;  %v5068_v15 = vadd.f32 %v3735_v41, %v6314_v36 }
0x1084   :  { %v3847_v25 = vmul.f32 -1.442695, %v5051_v12 }
0x1085   :  { %v3848_v49 = vmul.f32 -1.442695, %v5052_v61  ;;  %v3849_v59 = vmul.f32 -1.442695, %v5068_v15 }
0x1086   :  { %5380 = vpow2.f32 %v3847_v25 }
0x1087   :  { %5382 = vpow2.f32 %v3848_v49 }
0x1088   :  { %5384 = vpow2.f32 %v3849_v59 }
0x1089   :  { %5386 = vtanh.f32 %v5067_v2 }
0x1090   :  { %v5381_v52 = vpop.eup %5380 }
0x1091   :  { %v5383_v34 = vpop.eup %5382  ;;  %v3745_v50 = vadd.f32 1.0, %v5381_v52 }
0x1092   :  { %v3751_v56 = vadd.f32 1.0, %v5383_v34  ;;  %v5385_v28 = vpop.eup %5384 }
0x1093   :  { %5388 = vrcp.f32 %v3745_v50  ;;  %v5387_v60 = vpop.eup %5386  ;;  %v3758_v23 = vadd.f32 1.0, %v5385_v28 }
0x1094   :  { %5390 = vrcp.f32 %v3751_v56 }
0x1095   :  { %5392 = vrcp.f32 %v3758_v23 }
0x109d   :  { %v5389_v24 = vpop.eup %5388 }
0x109e   :  { %v5391_v13 = vpop.eup %5390  ;;  %v3762_v19 = vmul.f32 %v5389_v24, %v5387_v60 }
0x109f   :  { %v3761_v46 = vmul.f32 %v5391_v13, %v3587_v63  ;;  %v5393_v36 = vpop.eup %5392 }
0x10a1   :  { %v3763_v32 = vadd.f32 %v3762_v19, %v3761_v46 }
0x10a3   :  { %5394 = vtanh.f32 %v3763_v32  ;;  %3852 = vst [vmem:[%s6620_s11 + $0x8] sm:$0xff] %v3763_v32 }
0x10ad   :  { %v5395_v35 = vpop.eup %5394 }
0x10ae   :  { %v3765_v55 = vmul.f32 %v5395_v35, %v5393_v36 }
0x10b0   :  { %3850 = vst [vmem:[%s6618_s9 + $0x38] sm:$0xff] %v3765_v55  ;;  %3851 = vst [vmem:[%s6619_s10 + $0x8] sm:$0xff] %v3765_v55 }
0x10b1   :  { %3784 = vsyncpa [#allocation5], 1 }
0x10b2   :  { %3785 = vsyncpa [#allocation7], 1 }
0x10b3   :  { %3786 = vsyncpa [#allocation10], 1 }

</bundles_post_ra>
